<compile_context>
chip_gen: v5e
topology: v5e:2x2
jax: 0.10.0
libtpu: 0.0.40
codegen_flags: <defaults>
</compile_context>

<pallas_src>
import functools

import numpy as np
import jax
import jax.numpy as jnp
from jax.experimental import pallas as pl
from jax.experimental.pallas import tpu as pltpu


# ----------------------------------------------------------------------------
# Fused kernel: scatter-mean over vertices + index_fill(0) + gather + subtract
#               + masked_fill, all in one VMEM-resident step, (N, D) layout.
# ----------------------------------------------------------------------------
def _distribute_kernel(idx_row_ref, idx_col_ref, dist_ref, out_ref, *,
                       pos_dim, nr_vertices, subtract_mean):
    N, D = dist_ref.shape
    V = nr_vertices

    dist = dist_ref[...]                                     # (N, D) f32
    idx_col = jnp.maximum(idx_col_ref[...], 0)               # (N, 1), clamp -1 -> 0
    valid = idx_col != 0                                      # (N, 1)

    result = dist
    if subtract_mean:
        idx_row = jnp.maximum(idx_row_ref[...], 0)            # (1, N)

        # ---- scatter-mean over vertices, entirely on the MXU -------------------
        # RHS (N, D) bf16: columns < pos_dim are the positions, column pos_dim is a
        # constant 1 (count accumulator, rides in the free MXU lane padding), the
        # remaining value columns are zeroed.  No concatenation needed.
        col = jax.lax.broadcasted_iota(jnp.int32, (N, D), 1)
        rhs = jnp.where(col < pos_dim, dist,
                        jnp.where(col == pos_dim, 1.0, 0.0)).astype(jnp.bfloat16)

        # Scatter one-hot (V, N), bf16 (0/1 exact; half the vregs/stores of f32).
        oh_vn = jnp.where(
            jax.lax.broadcasted_iota(jnp.int32, (V, N), 0) == idx_row,
            1.0, 0.0).astype(jnp.bfloat16)                     # (V, N)

        sums_counts = jnp.dot(oh_vn, rhs,
                              preferred_element_type=jnp.float32)      # (V, D) f32
        counts = sums_counts[:, pos_dim:pos_dim + 1]                    # (V, 1)

        # Mean positions; index_fill: vertex 0 -> 0; non-position columns -> 0 so the
        # gathered correction only ever touches the position columns.
        vrow = jax.lax.broadcasted_iota(jnp.int32, (V, D), 0)
        vcol = jax.lax.broadcasted_iota(jnp.int32, (V, D), 1)
        means = jnp.where((vrow != 0) & (vcol < pos_dim),
                          sums_counts / jnp.maximum(counts, 1.0),
                          0.0).astype(jnp.bfloat16)                     # (V, D)

        # ---- gather + subtract --------------------------------------------------
        # Gather one-hot (N, V), bf16; standard-orientation matmul gives the gathered
        # means directly in the output (N, D) layout (no transposes anywhere).
        oh_nv = jnp.where(
            jax.lax.broadcasted_iota(jnp.int32, (N, V), 1) == idx_col,
            1.0, 0.0).astype(jnp.bfloat16)                     # (N, V)
        gathered = jnp.dot(oh_nv, means,
                           preferred_element_type=jnp.float32)          # (N, D) f32
        result = dist - gathered

    # masked_fill: rows that splat onto vertex 0 or are invalid are fully zeroed.
    out_ref[...] = jnp.where(valid, result, 0.0)


# ----------------------------------------------------------------------------
# Wrapper: module-native (N, D) layout in and out; indices/weights pass through.
# ----------------------------------------------------------------------------
_NO_MEAN_EXPERIMENTS = ("pointnet_no_local_mean",
                        "pointnet_no_elevate_no_local_mean",
                        "splat")


def distribute_lattice_forward(distributed, splatting_indices, splatting_weights, *,
                               pos_dim, nr_vertices, experiment=""):
    N, D = distributed.shape
    # Needs at least one value column (always true: values carry a homogeneous coord),
    # so the count column rides in column `pos_dim` of the scatter RHS.
    assert D > pos_dim
    subtract_mean = experiment not in _NO_MEAN_EXPERIMENTS

    idx = splatting_indices.astype(jnp.int32)
    idx_row = idx.reshape(1, N)    # lane-broadcast form (scatter one-hot)
    idx_col = idx.reshape(N, 1)    # sublane-broadcast form (gather one-hot + row mask)
    dist = distributed.astype(jnp.float32)

    kernel = functools.partial(_distribute_kernel, pos_dim=pos_dim,
                               nr_vertices=nr_vertices, subtract_mean=subtract_mean)
    new_distributed = pl.pallas_call(
        kernel,
        out_shape=jax.ShapeDtypeStruct((N, D), jnp.float32),
        in_specs=[pl.BlockSpec(memory_space=pltpu.MemorySpace.VMEM)] * 3,
        out_specs=pl.BlockSpec(memory_space=pltpu.MemorySpace.VMEM),
        # Semantically in-place on `distributed` (input 2): lets XLA reuse the buffer
        # when the caller donates it.
        input_output_aliases={2: 0},
    )(idx_row, idx_col, dist)

    # The module also returns the (backend-owned) lattice object; indices/weights
    # pass through unchanged.
    return new_distributed, splatting_indices, splatting_weights


# ----------------------------------------------------------------------------
# Pure-JAX reference for verification
# ----------------------------------------------------------------------------
def reference(distributed, splatting_indices, pos_dim, nr_vertices):
    N, D = distributed.shape
    idx = jnp.maximum(splatting_indices.astype(jnp.int32), 0)
    pos = distributed[:, :pos_dim]
    sums = jax.ops.segment_sum(pos, idx, num_segments=nr_vertices)
    counts = jax.ops.segment_sum(jnp.ones((N,), jnp.float32), idx,
                                 num_segments=nr_vertices)
    means = sums / jnp.maximum(counts, 1.0)[:, None]
    means = means.at[0].set(0.0)
    gathered = means[idx]
    out = distributed.at[:, :pos_dim].set(pos - gathered)
    out = jnp.where((idx == 0)[:, None], 0.0, out)
    return out


if __name__ == "__main__":
    # Small, module-consistent shapes.
    pos_dim = 3
    val_full_dim = 4                       # values + homogeneous coordinate
    D = pos_dim + val_full_dim             # 7 feature columns in `distributed`
    n_positions = 256
    N = n_positions * (pos_dim + 1)        # 1024 splat rows (pos_dim+1 per point)
    V = 128                                # nr lattice vertices (synthetic hashmap size)

    key = jax.random.PRNGKey(0)
    k1, k2, k3, k4 = jax.random.split(key, 4)

    distributed = jax.random.normal(k1, (N, D), jnp.float32)
    # Synthetic splatting indices from the permutohedral backend: in [0, V), ~5% invalid.
    splatting_indices = jax.random.randint(k2, (N,), 0, V)
    invalid = jax.random.uniform(k3, (N,)) < 0.05
    splatting_indices = jnp.where(invalid, -1, splatting_indices).astype(jnp.int32)
    splatting_weights = jax.random.uniform(k4, (N,), jnp.float32)

    ref = reference(distributed, splatting_indices, pos_dim, V)

    out, idx_out, w_out = distribute_lattice_forward(
        distributed, splatting_indices, splatting_weights,
        pos_dim=pos_dim, nr_vertices=V, experiment="lnn")
    out = jax.block_until_ready(out)

    # bf16 one-hots/means: positions lose ~3 decimal digits, well inside tolerance.
    np.testing.assert_allclose(np.asarray(out), np.asarray(ref), rtol=3e-2, atol=3e-2)
    print("KERNEL_OK")
</pallas_src>

<mosaic_0001>
module attributes {stable_mosaic.version = 11 : i64} {
  func.func @_distribute_kernel(%arg0: memref<1x1024xi32, #tpu.memory_space<vmem>>, %arg1: memref<1024x1xi32, #tpu.memory_space<vmem>>, %arg2: memref<1024x7xf32, #tpu.memory_space<vmem>>, %arg3: memref<1024x7xf32, #tpu.memory_space<vmem>>) attributes {dimension_semantics = [], scalar_prefetch = 0 : i64, scratch_operands = 0 : i64, tpu.core_type = #tpu.core_type<tc>} {
    %c0 = arith.constant 0 : index
    %c0_0 = arith.constant 0 : index
    %0 = vector.load %arg2[%c0, %c0_0] : memref<1024x7xf32, #tpu.memory_space<vmem>>, vector<1024x7xf32>
    %c0_1 = arith.constant 0 : index
    %c0_2 = arith.constant 0 : index
    %1 = vector.load %arg1[%c0_1, %c0_2] : memref<1024x1xi32, #tpu.memory_space<vmem>>, vector<1024x1xi32>
    %c0_i32 = arith.constant 0 : i32
    %2 = vector.broadcast %c0_i32 : i32 to vector<1024x1xi32>
    %3 = arith.maxsi %1, %2 : vector<1024x1xi32>
    %c0_i32_3 = arith.constant 0 : i32
    %4 = vector.broadcast %c0_i32_3 : i32 to vector<1024x1xi32>
    %5 = arith.cmpi ne, %3, %4 : vector<1024x1xi32>
    %c0_4 = arith.constant 0 : index
    %c0_5 = arith.constant 0 : index
    %6 = vector.load %arg0[%c0_4, %c0_5] : memref<1x1024xi32, #tpu.memory_space<vmem>>, vector<1x1024xi32>
    %c0_i32_6 = arith.constant 0 : i32
    %7 = vector.broadcast %c0_i32_6 : i32 to vector<1x1024xi32>
    %8 = arith.maxsi %6, %7 : vector<1x1024xi32>
    %9 = tpu.iota {dimensions = array<i32: 1>} : vector<1024x7xi32>
    %c3_i32 = arith.constant 3 : i32
    %10 = vector.broadcast %c3_i32 : i32 to vector<1024x7xi32>
    %11 = arith.cmpi slt, %9, %10 : vector<1024x7xi32>
    %c3_i32_7 = arith.constant 3 : i32
    %12 = vector.broadcast %c3_i32_7 : i32 to vector<1024x7xi32>
    %13 = arith.cmpi eq, %9, %12 : vector<1024x7xi32>
    %cst = arith.constant 1.000000e+00 : f32
    %cst_8 = arith.constant 0.000000e+00 : f32
    %14 = vector.broadcast %cst : f32 to vector<1024x7xf32>
    %15 = vector.broadcast %cst_8 : f32 to vector<1024x7xf32>
    %16 = arith.select %13, %14, %15 : vector<1024x7xi1>, vector<1024x7xf32>
    %17 = arith.select %11, %0, %16 : vector<1024x7xi1>, vector<1024x7xf32>
    %18 = arith.truncf %17 : vector<1024x7xf32> to vector<1024x7xbf16>
    %19 = tpu.iota {dimensions = array<i32: 0>} : vector<128x1024xi32>
    %20 = vector.broadcast %8 : vector<1x1024xi32> to vector<128x1024xi32>
    %21 = arith.cmpi eq, %19, %20 : vector<128x1024xi32>
    %cst_9 = arith.constant 1.000000e+00 : f32
    %cst_10 = arith.constant 0.000000e+00 : f32
    %22 = vector.broadcast %cst_9 : f32 to vector<128x1024xf32>
    %23 = vector.broadcast %cst_10 : f32 to vector<128x1024xf32>
    %24 = arith.select %21, %22, %23 : vector<128x1024xi1>, vector<128x1024xf32>
    %25 = arith.truncf %24 : vector<128x1024xf32> to vector<128x1024xbf16>
    %cst_11 = arith.constant dense<0.000000e+00> : vector<128x7xf32>
    %26 = tpu.matmul %25, %18, %cst_11 {dimension_numbers = #tpu.dot_dimension_numbers<[1], [0], [0], [1], [0, 0, 1, 1], [], []>} : vector<128x1024xbf16>, vector<1024x7xbf16>, vector<128x7xf32> -> vector<128x7xf32>
    %27 = vector.extract_strided_slice %26 {offsets = [0, 3], sizes = [128, 1], strides = [1, 1]} : vector<128x7xf32> to vector<128x1xf32>
    %28 = tpu.iota {dimensions = array<i32: 0>} : vector<128x7xi32>
    %29 = tpu.iota {dimensions = array<i32: 1>} : vector<128x7xi32>
    %c0_i32_12 = arith.constant 0 : i32
    %30 = vector.broadcast %c0_i32_12 : i32 to vector<128x7xi32>
    %31 = arith.cmpi ne, %28, %30 : vector<128x7xi32>
    %c3_i32_13 = arith.constant 3 : i32
    %32 = vector.broadcast %c3_i32_13 : i32 to vector<128x7xi32>
    %33 = arith.cmpi slt, %29, %32 : vector<128x7xi32>
    %34 = arith.andi %31, %33 : vector<128x7xi1>
    %cst_14 = arith.constant 1.000000e+00 : f32
    %35 = vector.broadcast %cst_14 : f32 to vector<128x1xf32>
    %36 = arith.maximumf %27, %35 : vector<128x1xf32>
    %37 = vector.broadcast %36 : vector<128x1xf32> to vector<128x7xf32>
    %38 = arith.divf %26, %37 : vector<128x7xf32>
    %cst_15 = arith.constant 0.000000e+00 : f32
    %39 = vector.broadcast %cst_15 : f32 to vector<128x7xf32>
    %40 = arith.select %34, %38, %39 : vector<128x7xi1>, vector<128x7xf32>
    %41 = arith.truncf %40 : vector<128x7xf32> to vector<128x7xbf16>
    %42 = tpu.iota {dimensions = array<i32: 1>} : vector<1024x128xi32>
    %43 = vector.broadcast %3 : vector<1024x1xi32> to vector<1024x128xi32>
    %44 = arith.cmpi eq, %42, %43 : vector<1024x128xi32>
    %cst_16 = arith.constant 1.000000e+00 : f32
    %cst_17 = arith.constant 0.000000e+00 : f32
    %45 = vector.broadcast %cst_16 : f32 to vector<1024x128xf32>
    %46 = vector.broadcast %cst_17 : f32 to vector<1024x128xf32>
    %47 = arith.select %44, %45, %46 : vector<1024x128xi1>, vector<1024x128xf32>
    %48 = arith.truncf %47 : vector<1024x128xf32> to vector<1024x128xbf16>
    %cst_18 = arith.constant dense<0.000000e+00> : vector<1024x7xf32>
    %49 = tpu.matmul %48, %41, %cst_18 {dimension_numbers = #tpu.dot_dimension_numbers<[1], [0], [0], [1], [0, 0, 1, 1], [], []>} : vector<1024x128xbf16>, vector<128x7xbf16>, vector<1024x7xf32> -> vector<1024x7xf32>
    %50 = arith.subf %0, %49 : vector<1024x7xf32>
    %cst_19 = arith.constant 0.000000e+00 : f32
    %51 = vector.shape_cast %5 : vector<1024x1xi1> to vector<1024x1xi1>
    %52 = vector.broadcast %51 : vector<1024x1xi1> to vector<1024x7xi1>
    %53 = vector.broadcast %cst_19 : f32 to vector<1024x7xf32>
    %54 = arith.select %52, %50, %53 : vector<1024x7xi1>, vector<1024x7xf32>
    %c0_20 = arith.constant 0 : index
    %c0_21 = arith.constant 0 : index
    %55 = vector.load %arg3[%c0_20, %c0_21] : memref<1024x7xf32, #tpu.memory_space<vmem>>, vector<1024x7xf32>
    tpu.vector_store %arg3[%c0_20, %c0_21], %54 {strides = array<i32>} : memref<1024x7xf32, #tpu.memory_space<vmem>>, vector<1024x7xf32>,
    return
  }
}

</mosaic_0001>

<bundles_post_ra>
// kernel: tpu_custom_call.1
= control target key start
LH: loop header
LB: loop body
LE: loop exit
PB: predicated region body
PF: predicated region fallthrough
CT: control target
= control target key end

     0   :  { %v657_v0 = vlaneseq  ;;  %v9733_v1 = vmov 0   ;;  %v4523_v17 = vmov 0.0   ;;  %s9729_s1 = inlined_call_operand.vmem [shape: s32[1024,1], index: 1, kind: input, shape index: {}]   ;;  %s9730_s2 = inlined_call_operand.vmem [shape: f32[1024,7], index: 2, kind: input, shape index: {}, may-alias: {2,3}]   ;;  %s9731_s0 = inlined_call_operand.vmem [shape: s32[1,1024], index: 0, kind: input, shape index: {}]   ;;  %s9732_s3 = inlined_call_operand.vmem [shape: f32[1024,7], index: 3, kind: output, shape index: {}, may-alias: {2,3}]  }
   0x1   :  { %4355 = vset.pattern.permute.xlu0 %v9733_v1  ;;  %4354 = vset.pattern.permute.xlu2 %v9733_v1  ;;  %v144_v2 = vld [vmem:[%s9729_s1 + $0x10] sm:$0xff]  ;;  %v143_v3 = vld [vmem:[%s9729_s1 + $0x8] sm:$0xff]  ;;  %v142_v4 = vld [vmem:[%s9729_s1] sm:$0xff] }
   0x2   :  { %4353 = vset.pattern.permute.xlu1 %v9733_v1  ;;  %vm274_vm0 = vcmp.gt.s32.totalorder %v144_v2, 0  ;;  %vm272_vm1 = vcmp.gt.s32.totalorder %v143_v3, 0  ;;  %vm270_vm2 = vcmp.gt.s32.totalorder %v142_v4, 0  ;;  %v4559_v5 = vand.u32 127, %v657_v0  ;;  %v28_v9 = vld [vmem:[%s9730_s2 + $0x70] sm:$0xff]  ;;  %v29_v10 = vld [vmem:[%s9730_s2 + $0x78] sm:$0xff] }
   0x3   :  { %v4561_v6 = vsel %vm274_vm0, %v144_v2, 0  ;;  %v4563_v7 = vsel %vm272_vm1, %v143_v3, 0  ;;  %v4565_v8 = vsel %vm270_vm2, %v142_v4, 0  ;;  %v44_v11 = vld [vmem:[%s9730_s2 + $0xf0] sm:$0xff]  ;;  %v45_v12 = vld [vmem:[%s9730_s2 + $0xf8] sm:$0xff]  ;;  %v146_v16 = vld [vmem:[%s9729_s1 + $0x20] sm:$0xff] }
   0x4   :  { %1990 = vperm.xlu0 %4355, %v4561_v6   ;;  %1987 = vperm.xlu2 %4354, %v4563_v7   ;;  %vm9941_vm3 = vcmp.lt.s32.totalorder %v4559_v5, 3  ;;  %v60_v13 = vld [vmem:[%s9730_s2 + $0x170] sm:$0xff]  ;;  %vm660_vm4 = vcmp.eq.s32.totalorder %v4559_v5, 3  ;;  %v61_v14 = vld [vmem:[%s9730_s2 + $0x178] sm:$0xff]  ;;  %vm278_vm6 = vcmp.gt.s32.totalorder %v146_v16, 0  ;;  %v26_v30 = vld [vmem:[%s9730_s2 + $0x60] sm:$0xff] }
   0x5   :  { %1984 = vperm.xlu1 %4353, %v4565_v8   ;;  %v149_v15 = vld [vmem:[%s9729_s1 + $0x38] sm:$0xff]  ;;  %v4596_v18 = vsel %vm660_vm4, 1.0, %v4523_v17  ;;  %v76_v19 = vld [vmem:[%s9730_s2 + $0x1f0] sm:$0xff]  ;;  %v27_v31 = vld [vmem:[%s9730_s2 + $0x68] sm:$0xff]  ;;  %v4647_v39 = vsel %vm278_vm6, %v146_v16, 0 }
   0x6   :  { %v77_v20 = vld [vmem:[%s9730_s2 + $0x1f8] sm:$0xff]  ;;  %vm284_vm5 = vcmp.gt.s32.totalorder %v149_v15, 0  ;;  %v676_v21 = vsel %vm9941_vm3, %v28_v9, %v4596_v18  ;;  %v677_v22 = vsel %vm9941_vm3, %v29_v10, %v4596_v18  ;;  %v692_v23 = vsel %vm9941_vm3, %v44_v11, %v4596_v18  ;;  %v42_v36 = vld [vmem:[%s9730_s2 + $0xe0] sm:$0xff]  ;;  %v43_v37 = vld [vmem:[%s9730_s2 + $0xe8] sm:$0xff] }
   0x7   :  { %v693_v24 = vsel %vm9941_vm3, %v45_v12, %v4596_v18  ;;  %v145_v25 = vld [vmem:[%s9729_s1 + $0x18] sm:$0xff]  ;;  %v797_v26 = vpack.c.bf16 %v677_v22, %v676_v21  ;;  %v708_v28 = vsel %vm9941_vm3, %v60_v13, %v4596_v18  ;;  %v709_v29 = vsel %vm9941_vm3, %v61_v14, %v4596_v18  ;;  %v58_v40 = vld [vmem:[%s9730_s2 + $0x160] sm:$0xff]  ;;  %v59_v41 = vld [vmem:[%s9730_s2 + $0x168] sm:$0xff] }
   0x8   :  { %v805_v27 = vpack.c.bf16 %v693_v24, %v692_v23  ;;  %v813_v32 = vpack.c.bf16 %v709_v29, %v708_v28  ;;  %v724_v33 = vsel %vm9941_vm3, %v76_v19, %v4596_v18  ;;  %v725_v34 = vsel %vm9941_vm3, %v77_v20, %v4596_v18  ;;  %v74_v42 = vld [vmem:[%s9730_s2 + $0x1e0] sm:$0xff]  ;;  %v75_v46 = vld [vmem:[%s9730_s2 + $0x1e8] sm:$0xff]  ;;  %v24_v47 = vld [vmem:[%s9730_s2 + $0x50] sm:$0xff] }
   0x9   :  { %v4638_v35 = vsel %vm284_vm5, %v149_v15, 0  ;;  %1199 = vmatpush.bf16.msra.mxu0 %v797_v26  ;;  %v821_v38 = vpack.c.bf16 %v725_v34, %v724_v33  ;;  %vm276_vm7 = vcmp.gt.s32.totalorder %v145_v25, 0  ;;  %v674_v44 = vsel %vm9941_vm3, %v26_v30, %v4596_v18  ;;  %v152_v48 = vld [vmem:[%s9729_s1 + $0x50] sm:$0xff]  ;;  %v25_v52 = vld [vmem:[%s9730_s2 + $0x58] sm:$0xff]  ;;  %v147_v13 = vld [vmem:[%s9729_s1 + $0x28] sm:$0xff] }
   0xa   :  { %1248 = vmatpush.bf16.msra.mxu1 %v805_v27  ;;  %1297 = vmatpush.bf16.msra.mxu2 %v813_v32  ;;  %v4658_v43 = vsel %vm276_vm7, %v145_v25, 0  ;;  %v675_v45 = vsel %vm9941_vm3, %v27_v31, %v4596_v18  ;;  %v690_v50 = vsel %vm9941_vm3, %v42_v36, %v4596_v18  ;;  %v691_v51 = vsel %vm9941_vm3, %v43_v37, %v4596_v18  ;;  %v40_v53 = vld [vmem:[%s9730_s2 + $0xd0] sm:$0xff]  ;;  %v41_v54 = vld [vmem:[%s9730_s2 + $0xd8] sm:$0xff]  ;;  %v22_v19 = vld [vmem:[%s9730_s2 + $0x40] sm:$0xff] }
   0xb   :  { %1346 = vmatpush.bf16.msra.mxu3 %v821_v38  ;;  %v796_v49 = vpack.c.bf16 %v675_v45, %v674_v44  ;;  %v804_v55 = vpack.c.bf16 %v691_v51, %v690_v50  ;;  %v706_v56 = vsel %vm9941_vm3, %v58_v40, %v4596_v18  ;;  %v707_v57 = vsel %vm9941_vm3, %v59_v41, %v4596_v18  ;;  %v56_v58 = vld [vmem:[%s9730_s2 + $0x150] sm:$0xff]  ;;  %v57_v59 = vld [vmem:[%s9730_s2 + $0x158] sm:$0xff]  ;;  %v23_v20 = vld [vmem:[%s9730_s2 + $0x48] sm:$0xff] }
   0xc   :  { %2005 = vperm.xlu0 %4355, %v4638_v35   ;;  %1996 = vperm.xlu2 %4354, %v4647_v39   ;;  %vm290_vm8 = vcmp.gt.s32.totalorder %v152_v48, 0  ;;  %v812_v60 = vpack.c.bf16 %v707_v57, %v706_v56  ;;  %v722_v61 = vsel %vm9941_vm3, %v74_v42, %v4596_v18  ;;  %v723_v62 = vsel %vm9941_vm3, %v75_v46, %v4596_v18  ;;  %v72_v2 = vld [vmem:[%s9730_s2 + $0x1d0] sm:$0xff]  ;;  %v73_v3 = vld [vmem:[%s9730_s2 + $0x1d8] sm:$0xff]  ;;  %v38_v25 = vld [vmem:[%s9730_s2 + $0xc0] sm:$0xff] }
   0xd   :  { %1993 = vperm.xlu1 %4353, %v4658_v43   ;;  %1200 = vmatpush.bf16.msra.mxu0 %v796_v49  ;;  %v672_v63 = vsel %vm9941_vm3, %v24_v47, %v4596_v18  ;;  %v820_v4 = vpack.c.bf16 %v723_v62, %v722_v61  ;;  %v673_v9 = vsel %vm9941_vm3, %v25_v52, %v4596_v18  ;;  %v148_v12 = vld [vmem:[%s9729_s1 + $0x30] sm:$0xff]  ;;  %v4754_v24 = vsel %vm290_vm8, %v152_v48, 0  ;;  %v39_v26 = vld [vmem:[%s9730_s2 + $0xc8] sm:$0xff]  ;;  %v54_v28 = vld [vmem:[%s9730_s2 + $0x140] sm:$0xff] }
   0xe   :  { %1249 = vmatpush.bf16.msra.mxu1 %v804_v55  ;;  %v688_v10 = vsel %vm9941_vm3, %v40_v53, %v4596_v18  ;;  %v689_v11 = vsel %vm9941_vm3, %v41_v54, %v4596_v18  ;;  %1298 = vmatpush.bf16.msra.mxu2 %v812_v60  ;;  %v795_v14 = vpack.c.bf16 %v673_v9, %v672_v63  ;;  %vm282_vm9 = vcmp.gt.s32.totalorder %v148_v12, 0  ;;  %v55_v29 = vld [vmem:[%s9730_s2 + $0x148] sm:$0xff]  ;;  %v70_v36 = vld [vmem:[%s9730_s2 + $0x1c0] sm:$0xff]  ;;  %v20_v41 = vld [vmem:[%s9730_s2 + $0x30] sm:$0xff] }
   0xf   :  { %v803_v15 = vpack.c.bf16 %v689_v11, %v688_v10  ;;  %v704_v16 = vsel %vm9941_vm3, %v56_v58, %v4596_v18  ;;  %v705_v17 = vsel %vm9941_vm3, %v57_v59, %v4596_v18  ;;  %1347 = vmatpush.bf16.msra.mxu3 %v820_v4  ;;  %v720_v22 = vsel %vm9941_vm3, %v72_v2, %v4596_v18  ;;  %v155_v30 = vld [vmem:[%s9729_s1 + $0x68] sm:$0xff]  ;;  %v21_v42 = vld [vmem:[%s9730_s2 + $0x38] sm:$0xff]  ;;  %v36_v44 = vld [vmem:[%s9730_s2 + $0xb0] sm:$0xff] }
  0x10   :  { %v811_v21 = vpack.c.bf16 %v705_v17, %v704_v16  ;;  %v721_v23 = vsel %vm9941_vm3, %v73_v3, %v4596_v18  ;;  %vm280_vm10 = vcmp.gt.s32.totalorder %v147_v13, 0  ;;  %v4771_v31 = vsel %vm282_vm9, %v148_v12, 0  ;;  %v71_v37 = vld [vmem:[%s9730_s2 + $0x1c8] sm:$0xff]  ;;  %v37_v48 = vld [vmem:[%s9730_s2 + $0xb8] sm:$0xff]  ;;  %v52_v52 = vld [vmem:[%s9730_s2 + $0x130] sm:$0xff] }
  0x11   :  { %1201 = vmatpush.bf16.msra.mxu0 %v795_v14  ;;  %v819_v27 = vpack.c.bf16 %v721_v23, %v720_v22  ;;  %v4773_v32 = vsel %vm280_vm10, %v147_v13, 0  ;;  %v670_v33 = vsel %vm9941_vm3, %v22_v19, %v4596_v18  ;;  %v671_v34 = vsel %vm9941_vm3, %v23_v20, %v4596_v18  ;;  %v53_v53 = vld [vmem:[%s9730_s2 + $0x138] sm:$0xff]  ;;  %v68_v54 = vld [vmem:[%s9730_s2 + $0x1b0] sm:$0xff]  ;;  %v151_v60 = vld [vmem:[%s9729_s1 + $0x48] sm:$0xff] }
  0x12   :  { %1250 = vmatpush.bf16.msra.mxu1 %v803_v15  ;;  %1299 = vmatpush.bf16.msra.mxu2 %v811_v21  ;;  %v794_v38 = vpack.c.bf16 %v671_v34, %v670_v33  ;;  %v686_v40 = vsel %vm9941_vm3, %v38_v25, %v4596_v18  ;;  %v687_v45 = vsel %vm9941_vm3, %v39_v26, %v4596_v18  ;;  %vm296_vm11 = vcmp.gt.s32.totalorder %v155_v30, 0  ;;  %v69_v59 = vld [vmem:[%s9730_s2 + $0x1b8] sm:$0xff]  ;;  %v150_v61 = vld [vmem:[%s9729_s1 + $0x40] sm:$0xff]  ;;  %v19_v13 = vld [vmem:[%s9730_s2 + $0x28] sm:$0xff] }
  0x13   :  { %1348 = vmatpush.bf16.msra.mxu3 %v819_v27  ;;  %v702_v46 = vsel %vm9941_vm3, %v54_v28, %v4596_v18  ;;  %v703_v47 = vsel %vm9941_vm3, %v55_v29, %v4596_v18  ;;  %v802_v49 = vpack.c.bf16 %v687_v45, %v686_v40  ;;  %v718_v51 = vsel %vm9941_vm3, %v70_v36, %v4596_v18  ;;  %v18_v4 = vld [vmem:[%s9730_s2 + $0x20] sm:$0xff]  ;;  %v35_v17 = vld [vmem:[%s9730_s2 + $0xa8] sm:$0xff]  ;;  %v16_v33 = vld [vmem:[%s9730_s2 + $0x10] sm:$0xff] }
  0x14   :  { %2014 = vperm.xlu0 %4355, %v4754_v24   ;;  %2002 = vperm.xlu2 %4354, %v4771_v31   ;;  %v810_v50 = vpack.c.bf16 %v703_v47, %v702_v46  ;;  %v719_v55 = vsel %vm9941_vm3, %v71_v37, %v4596_v18  ;;  %v668_v56 = vsel %vm9941_vm3, %v20_v41, %v4596_v18  ;;  %v4851_v3 = vsel %vm296_vm11, %v155_v30, 0  ;;  %v34_v14 = vld [vmem:[%s9730_s2 + $0xa0] sm:$0xff]  ;;  %v51_v25 = vld [vmem:[%s9730_s2 + $0x128] sm:$0xff]  ;;  %v17_v34 = vld [vmem:[%s9730_s2 + $0x18] sm:$0xff] }
  0x15   :  { %1999 = vperm.xlu1 %4353, %v4773_v32   ;;  %1202 = vmatpush.bf16.msra.mxu0 %v794_v38  ;;  %v669_v57 = vsel %vm9941_vm3, %v21_v42, %v4596_v18  ;;  %v684_v58 = vsel %vm9941_vm3, %v36_v44, %v4596_v18  ;;  %v818_v62 = vpack.c.bf16 %v719_v55, %v718_v51  ;;  %vm288_vm12 = vcmp.gt.s32.totalorder %v151_v60, 0  ;;  %v50_v19 = vld [vmem:[%s9730_s2 + $0x120] sm:$0xff]  ;;  %v67_v30 = vld [vmem:[%s9730_s2 + $0x1a8] sm:$0xff]  ;;  %v32_v40 = vld [vmem:[%s9730_s2 + $0x90] sm:$0xff] }
  0x16   :  { %1251 = vmatpush.bf16.msra.mxu1 %v802_v49  ;;  %1300 = vmatpush.bf16.msra.mxu2 %v810_v50  ;;  %v793_v63 = vpack.c.bf16 %v669_v57, %v668_v56  ;;  %v685_v2 = vsel %vm9941_vm3, %v37_v48, %v4596_v18  ;;  %v700_v10 = vsel %vm9941_vm3, %v52_v52, %v4596_v18  ;;  %vm286_vm13 = vcmp.gt.s32.totalorder %v150_v61, 0  ;;  %v66_v26 = vld [vmem:[%s9730_s2 + $0x1a0] sm:$0xff]  ;;  %v33_v41 = vld [vmem:[%s9730_s2 + $0x98] sm:$0xff]  ;;  %v48_v46 = vld [vmem:[%s9730_s2 + $0x110] sm:$0xff] }
  0x17   :  { %v801_v9 = vpack.c.bf16 %v685_v2, %v684_v58  ;;  %v701_v11 = vsel %vm9941_vm3, %v53_v53, %v4596_v18  ;;  %v716_v12 = vsel %vm9941_vm3, %v68_v54, %v4596_v18  ;;  %1349 = vmatpush.bf16.msra.mxu3 %v818_v62  ;;  %v717_v16 = vsel %vm9941_vm3, %v69_v59, %v4596_v18  ;;  %v158_v27 = vld [vmem:[%s9729_s1 + $0x80] sm:$0xff]  ;;  %v49_v47 = vld [vmem:[%s9730_s2 + $0x118] sm:$0xff]  ;;  %v64_v48 = vld [vmem:[%s9730_s2 + $0x190] sm:$0xff] }
  0x18   :  { %v809_v15 = vpack.c.bf16 %v701_v11, %v700_v10  ;;  %v817_v20 = vpack.c.bf16 %v717_v16, %v716_v12  ;;  %v4880_v21 = vsel %vm288_vm12, %v151_v60, 0  ;;  %v4882_v22 = vsel %vm286_vm13, %v150_v61, 0  ;;  %v65_v53 = vld [vmem:[%s9730_s2 + $0x198] sm:$0xff]  ;;  %v154_v54 = vld [vmem:[%s9729_s1 + $0x60] sm:$0xff] }
  0x19   :  { %1203 = vmatpush.bf16.msra.mxu0 %v793_v63  ;;  %v666_v23 = vsel %vm9941_vm3, %v18_v4, %v4596_v18  ;;  %v667_v28 = vsel %vm9941_vm3, %v19_v13, %v4596_v18  ;;  %v682_v29 = vsel %vm9941_vm3, %v34_v14, %v4596_v18  ;;  %v683_v37 = vsel %vm9941_vm3, %v35_v17, %v4596_v18  ;;  %v153_v59 = vld [vmem:[%s9729_s1 + $0x58] sm:$0xff]  ;;  %v14_v60 = vld [vmem:[%s9730_s2] sm:$0xff]  ;;  %v15_v4 = vld [vmem:[%s9730_s2 + $0x8] sm:$0xff] }
  0x1a   :  { %1252 = vmatpush.bf16.msra.mxu1 %v801_v9  ;;  %1301 = vmatpush.bf16.msra.mxu2 %v809_v15  ;;  %v792_v36 = vpack.c.bf16 %v667_v28, %v666_v23  ;;  %v698_v38 = vsel %vm9941_vm3, %v50_v19, %v4596_v18  ;;  %v800_v42 = vpack.c.bf16 %v683_v37, %v682_v29  ;;  %vm302_vm14 = vcmp.gt.s32.totalorder %v158_v27, 0  ;;  %v30_v9 = vld [vmem:[%s9730_s2 + $0x80] sm:$0xff]  ;;  %v31_v13 = vld [vmem:[%s9730_s2 + $0x88] sm:$0xff] }
  0x1b   :  { %1350 = vmatpush.bf16.msra.mxu3 %v817_v20  ;;  %v699_v44 = vsel %vm9941_vm3, %v51_v25, %v4596_v18  ;;  %v714_v45 = vsel %vm9941_vm3, %v66_v26, %v4596_v18  ;;  %v715_v50 = vsel %vm9941_vm3, %v67_v30, %v4596_v18  ;;  %v664_v51 = vsel %vm9941_vm3, %v16_v33, %v4596_v18  ;;  %v46_v14 = vld [vmem:[%s9730_s2 + $0x100] sm:$0xff]  ;;  %v47_v19 = vld [vmem:[%s9730_s2 + $0x108] sm:$0xff] }
  0x1c   :  { %2023 = vperm.xlu0 %4355, %v4851_v3   ;;  %2011 = vperm.xlu2 %4354, %v4880_v21   ;;  %v808_v49 = vpack.c.bf16 %v699_v44, %v698_v38  ;;  %v665_v52 = vsel %vm9941_vm3, %v17_v34, %v4596_v18  ;;  %v816_v55 = vpack.c.bf16 %v715_v50, %v714_v45  ;;  %v4987_v12 = vsel %vm302_vm14, %v158_v27, 0  ;;  %v62_v20 = vld [vmem:[%s9730_s2 + $0x180] sm:$0xff]  ;;  %v63_v28 = vld [vmem:[%s9730_s2 + $0x188] sm:$0xff]  ;;  %v161_v38 = vld [vmem:[%s9729_s1 + $0x98] sm:$0xff] }
  0x1d   :  { %2008 = vperm.xlu1 %4353, %v4882_v22   ;;  %1204 = vmatpush.bf16.msra.mxu0 %v792_v36  ;;  %v791_v56 = vpack.c.bf16 %v665_v52, %v664_v51  ;;  %v680_v57 = vsel %vm9941_vm3, %v32_v40, %v4596_v18  ;;  %v681_v58 = vsel %vm9941_vm3, %v33_v41, %v4596_v18  ;;  %vm294_vm15 = vcmp.gt.s32.totalorder %v154_v54, 0  ;;  %v654_v23 = vld [vmem:[%s9731_s0] sm:$0xff]  ;;  %v157_v45 = vld [vmem:[%s9729_s1 + $0x78] sm:$0xff]  ;;  %v156_v52 = vld [vmem:[%s9729_s1 + $0x70] sm:$0xff] }
  0x1e   :  { %1253 = vmatpush.bf16.msra.mxu1 %v800_v42  ;;  %1302 = vmatpush.bf16.msra.mxu2 %v808_v49  ;;  %v799_v61 = vpack.c.bf16 %v681_v58, %v680_v57  ;;  %v696_v62 = vsel %vm9941_vm3, %v48_v46, %v4596_v18  ;;  %v697_v63 = vsel %vm9941_vm3, %v49_v47, %v4596_v18  ;;  %v4995_v16 = vsel %vm294_vm15, %v154_v54, 0  ;;  %v164_v54 = vld [vmem:[%s9729_s1 + $0xb0] sm:$0xff]  ;;  %v159_v58 = vld [vmem:[%s9729_s1 + $0x88] sm:$0xff] }
  0x1f   :  { %v712_v2 = vsel %vm9941_vm3, %v64_v48, %v4596_v18  ;;  %1351 = vmatpush.bf16.msra.mxu3 %v816_v55  ;;  %v807_v10 = vpack.c.bf16 %v697_v63, %v696_v62  ;;  %v713_v11 = vsel %vm9941_vm3, %v65_v53, %v4596_v18  ;;  %9950 = vst [vmem:[#allocation2_spill] sm:$0xff] %v4987_v12  ;;  %vm292_vm0 = vcmp.gt.s32.totalorder %v153_v59, 0 }
  0x20   :  { %v815_v15 = vpack.c.bf16 %v713_v11, %v712_v2  ;;  %v662_v17 = vsel %vm9941_vm3, %v14_v60, %v4596_v18  ;;  %v5009_v25 = vsel %vm292_vm0, %v153_v59, 0  ;;  %v663_v26 = vsel %vm9941_vm3, %v15_v4, %v4596_v18  ;;  %v167_v2 = vld [vmem:[%s9729_s1 + $0xc8] sm:$0xff] }
  0x21   :  { %1205 = vmatpush.bf16.msra.mxu0 %v791_v56  ;;  %v678_v27 = vsel %vm9941_vm3, %v30_v9, %v4596_v18  ;;  %v790_v29 = vpack.c.bf16 %v663_v26, %v662_v17  ;;  %v679_v30 = vsel %vm9941_vm3, %v31_v13, %v4596_v18  ;;  %v694_v33 = vsel %vm9941_vm3, %v46_v14, %v4596_v18  ;;  %v160_v56 = vld [vmem:[%s9729_s1 + $0x90] sm:$0xff]  ;;  %v163_v4 = vld [vmem:[%s9729_s1 + $0xa8] sm:$0xff]  ;;  %v162_v9 = vld [vmem:[%s9729_s1 + $0xa0] sm:$0xff] }
  0x22   :  { %1254 = vmatpush.bf16.msra.mxu1 %v799_v61  ;;  %1303 = vmatpush.bf16.msra.mxu2 %v807_v10  ;;  %v798_v34 = vpack.c.bf16 %v679_v30, %v678_v27  ;;  %v695_v36 = vsel %vm9941_vm3, %v47_v19, %v4596_v18  ;;  %v710_v37 = vsel %vm9941_vm3, %v62_v20, %v4596_v18  ;;  %vm655_vm1 = vcmp.gt.s32.totalorder %v654_v23, 0  ;;  %v170_v14 = vld [vmem:[%s9729_s1 + $0xe0] sm:$0xff]  ;;  %v165_v17 = vld [vmem:[%s9729_s1 + $0xb8] sm:$0xff]  ;;  %v168_v30 = vld [vmem:[%s9729_s1 + $0xd0] sm:$0xff] }
  0x23   :  { %1352 = vmatpush.bf16.msra.mxu3 %v815_v15  ;;  %v806_v40 = vpack.c.bf16 %v695_v36, %v694_v33  ;;  %v711_v41 = vsel %vm9941_vm3, %v63_v28, %v4596_v18  ;;  %v5041_v42 = vsel %vm655_vm1, %v654_v23, 0  ;;  %v5044_v44 = vshrl.u32 %v657_v0, 7  ;;  %v166_v15 = vld [vmem:[%s9729_s1 + $0xc0] sm:$0xff]  ;;  %v173_v28 = vld [vmem:[%s9729_s1 + $0xf8] sm:$0xff] }
  0x24   :  { %2032 = vperm.xlu0 %4355, %v4987_v12   ;;  %2020 = vperm.xlu2 %4354, %v4995_v16   ;;  %v814_v46 = vpack.c.bf16 %v711_v41, %v710_v37  ;;  %v5050_v47 = vperm.slane %v5041_v42, 0  ;;  %v5053_v48 = vperm.slane %v5041_v42, 1  ;;  %v5059_v50 = vperm.slane %v5041_v42, 2  ;;  %v176_v37 = vld [vmem:[%s9729_s1 + $0x110] sm:$0xff]  ;;  %v113_v12 = vld [vmem:[%s9730_s2 + $0x318] sm:$0xff] }
  0x25   :  { %2017 = vperm.xlu1 %4353, %v5009_v25   ;;  %1206 = vmatpush.bf16.msra.mxu0 %v790_v29  ;;  %9951 = vst [vmem:[#allocation3_spill] sm:$0xff] %v5044_v44  ;;  %v5056_v49 = vadd.s32 8, %v5044_v44  ;;  %v5062_v0 = vperm.slane %v5041_v42, 3  ;;  %vm308_vm2 = vcmp.gt.s32.totalorder %v161_v38, 0  ;;  %vm300_vm6 = vcmp.gt.s32.totalorder %v157_v45, 0  ;;  %v169_v29 = vld [vmem:[%s9729_s1 + $0xd8] sm:$0xff] }
  0x26   :  { %1255 = vmatpush.bf16.msra.mxu1 %v798_v34  ;;  %1304 = vmatpush.bf16.msra.mxu2 %v806_v40  ;;  %vm879_vm4 = vcmp.eq.s32.totalorder %v5044_v44, %v5050_v47  ;;  %vm880_vm5 = vcmp.eq.s32.totalorder %v5044_v44, %v5053_v48  ;;  %v5068_v51 = vsel %vm308_vm2, %v161_v38, 0  ;;  %vm881_vm9 = vcmp.eq.s32.totalorder %v5044_v44, %v5059_v50  ;;  %v172_v38 = vld [vmem:[%s9729_s1 + $0xf0] sm:$0xff]  ;;  %v171_v40 = vld [vmem:[%s9729_s1 + $0xe8] sm:$0xff] }
  0x27   :  { %1353 = vmatpush.bf16.msra.mxu3 %v814_v46  ;;  %9952 = vst [vmem:[#allocation4_spill] sm:$0xff] %v5068_v51  ;;  %vm887_vm7 = vcmp.eq.s32.totalorder %v5056_v49, %v5050_v47  ;;  %vm888_vm8 = vcmp.eq.s32.totalorder %v5056_v49, %v5053_v48  ;;  %vm889_vm10 = vcmp.eq.s32.totalorder %v5056_v49, %v5059_v50  ;;  %v5085_v53 = vsel %vm300_vm6, %v157_v45, 0 }
  0x28   :  { %vm4045_vm11 = vmpackc.low %vm887_vm7, %vm879_vm4  ;;  %vm882_vm12 = vcmp.eq.s32.totalorder %v5044_v44, %v5062_v0  ;;  %vm890_vm13 = vcmp.eq.s32.totalorder %v5056_v49, %v5062_v0  ;;  %v9735_v55 = vmov 1.0|1.0   ;;  %vm298_vm15 = vcmp.gt.s32.totalorder %v156_v52, 0 }
  0x29   :  { %4046 = vmatmul.msk.bf16.vlgmr.msra.gmra.mxu0 %vm4045_vm11, %v9735_v55  ;;  %vm4061_vm14 = vmpackc.low %vm888_vm8, %vm880_vm5  ;;  %v5100_v57 = vsel %vm298_vm15, %v156_v52, 0  ;;  %vm314_vm2 = vcmp.gt.s32.totalorder %v164_v54, 0  ;;  %vm306_vm4 = vcmp.gt.s32.totalorder %v160_v56, 0  ;;  %vm304_vm5 = vcmp.gt.s32.totalorder %v159_v58, 0 }
  0x2a   :  { %4062 = vmatmul.msk.bf16.vlgmr.msra.gmra.mxu1 %vm4061_vm14, %v9735_v55  ;;  %vm4077_vm0 = vmpackc.low %vm889_vm10, %vm881_vm9  ;;  %9953 = vst [vmem:[#allocation5_spill] sm:$0xff] %v5100_v57  ;;  %v5114_v59 = vsel %vm314_vm2, %v164_v54, 0  ;;  %v5116_v60 = vsel %vm306_vm4, %v160_v56, 0  ;;  %v5119_v61 = vadd.s32 16, %v5044_v44  ;;  %v5122_v62 = vadd.s32 24, %v5044_v44  ;;  %v179_v56 = vld [vmem:[%s9729_s1 + $0x128] sm:$0xff] }
  0x2b   :  { %4078 = vmatmul.msk.bf16.vlgmr.msra.gmra.mxu2 %vm4077_vm0, %v9735_v55  ;;  %vm4093_vm1 = vmpackc.low %vm890_vm13, %vm882_vm12  ;;  %9954 = vst [vmem:[#allocation6_spill] sm:$0xff] %v5114_v59  ;;  %v5124_v63 = vsel %vm304_vm5, %v159_v58, 0  ;;  %vm320_vm8 = vcmp.gt.s32.totalorder %v167_v2, 0  ;;  %vm312_vm11 = vcmp.gt.s32.totalorder %v163_v4, 0  ;;  %vm310_vm14 = vcmp.gt.s32.totalorder %v162_v9, 0  ;;  %v175_v58 = vld [vmem:[%s9729_s1 + $0x108] sm:$0xff] }
  0x2c   :  { %2041 = vperm.xlu0 %4355, %v5068_v51   ;;  %2029 = vperm.xlu2 %4354, %v5085_v53   ;;  %9955 = vst [vmem:[#allocation7_spill] sm:$0xff] %v5124_v63  ;;  %vm895_vm6 = vcmp.eq.s32.totalorder %v5119_v61, %v5050_v47  ;;  %vm903_vm7 = vcmp.eq.s32.totalorder %v5122_v62, %v5050_v47  ;;  %v5154_v10 = vsel %vm320_vm8, %v167_v2, 0  ;;  %v5156_v11 = vsel %vm312_vm11, %v163_v4, 0  ;;  %v174_v2 = vld [vmem:[%s9729_s1 + $0x100] sm:$0xff] }
  0x2d   :  { %2026 = vperm.xlu1 %4353, %v5100_v57   ;;  %4094 = vmatmul.msk.bf16.vlgmr.msra.gmra.mxu3 %vm4093_vm1, %v9735_v55  ;;  %vm896_vm9 = vcmp.eq.s32.totalorder %v5119_v61, %v5053_v48  ;;  %vm904_vm10 = vcmp.eq.s32.totalorder %v5122_v62, %v5053_v48  ;;  %vm897_vm12 = vcmp.eq.s32.totalorder %v5119_v61, %v5059_v50  ;;  %vm4047_vm15 = vmpackc.low %vm903_vm7, %vm895_vm6  ;;  %v5158_v13 = vsel %vm310_vm14, %v162_v9, 0 }
  0x2e   :  { %vm905_vm13 = vcmp.eq.s32.totalorder %v5122_v62, %v5059_v50  ;;  %vm898_vm0 = vcmp.eq.s32.totalorder %v5119_v61, %v5062_v0  ;;  %vm906_vm1 = vcmp.eq.s32.totalorder %v5122_v62, %v5062_v0  ;;  %9956 = vst [vmem:[#allocation8_spill] sm:$0xff] %v5154_v10  ;;  %vm4063_vm2 = vmpackc.low %vm904_vm10, %vm896_vm9  ;;  %vm326_vm6 = vcmp.gt.s32.totalorder %v170_v14, 0 }
  0x2f   :  { %9957 = vst [vmem:[#allocation9_spill] sm:$0xff] %v5156_v11  ;;  %vm4079_vm4 = vmpackc.low %vm905_vm13, %vm897_vm12  ;;  %vm318_vm7 = vcmp.gt.s32.totalorder %v166_v15, 0  ;;  %vm316_vm8 = vcmp.gt.s32.totalorder %v165_v17, 0  ;;  %v5176_v19 = vsel %vm326_vm6, %v170_v14, 0  ;;  %v5181_v23 = vadd.s32 32, %v5044_v44 }
  0x30   :  { %9958 = vst [vmem:[#allocation10_spill] sm:$0xff] %v5158_v13  ;;  %vm4095_vm5 = vmpackc.low %vm906_vm1, %vm898_vm0  ;;  %v5178_v20 = vsel %vm318_vm7, %v166_v15, 0  ;;  %v5184_v26 = vadd.s32 40, %v5044_v44  ;;  %v5186_v27 = vsel %vm316_vm8, %v165_v17, 0  ;;  %vm332_vm11 = vcmp.gt.s32.totalorder %v173_v28, 0  ;;  %v182_v15 = vld [vmem:[%s9729_s1 + $0x140] sm:$0xff] }
  0x31   :  { %9959 = vst [vmem:[#allocation11_spill] sm:$0xff] %v5176_v19  ;;  %vm911_vm9 = vcmp.eq.s32.totalorder %v5181_v23, %v5050_v47  ;;  %vm912_vm12 = vcmp.eq.s32.totalorder %v5181_v23, %v5053_v48  ;;  %vm324_vm14 = vcmp.gt.s32.totalorder %v169_v29, 0  ;;  %vm322_vm1 = vcmp.gt.s32.totalorder %v168_v30, 0  ;;  %v178_v17 = vld [vmem:[%s9729_s1 + $0x120] sm:$0xff] }
  0x32   :  { %9960 = vst [vmem:[#allocation12_spill] sm:$0xff] %v5178_v20  ;;  %vm919_vm10 = vcmp.eq.s32.totalorder %v5184_v26, %v5050_v47  ;;  %vm920_vm13 = vcmp.eq.s32.totalorder %v5184_v26, %v5053_v48  ;;  %vm921_vm0 = vcmp.eq.s32.totalorder %v5184_v26, %v5059_v50  ;;  %v5216_v33 = vsel %vm332_vm11, %v173_v28, 0  ;;  %v177_v28 = vld [vmem:[%s9729_s1 + $0x118] sm:$0xff] }
  0x33   :  { %9961 = vst [vmem:[#allocation13_spill] sm:$0xff] %v5186_v27  ;;  %vm4065_vm6 = vmpackc.low %vm920_vm13, %vm912_vm12  ;;  %v5218_v34 = vsel %vm324_vm14, %v169_v29, 0  ;;  %v5220_v36 = vsel %vm322_vm1, %v168_v30, 0  ;;  %vm328_vm11 = vcmp.gt.s32.totalorder %v171_v40, 0  ;;  %v5243_v46 = vadd.s32 48, %v5044_v44 }
  0x34   :  { %2050 = vperm.xlu0 %4355, %v5114_v59   ;;  %2038 = vperm.xlu2 %4354, %v5116_v60   ;;  %9962 = vst [vmem:[#allocation14_spill] sm:$0xff] %v5216_v33  ;;  %v5246_v52 = vadd.s32 56, %v5044_v44  ;;  %v5248_v54 = vsel %vm328_vm11, %v171_v40, 0  ;;  %vm344_vm14 = vcmp.gt.s32.totalorder %v179_v56, 0  ;;  %vm336_vm1 = vcmp.gt.s32.totalorder %v175_v58, 0 }
  0x35   :  { %2035 = vperm.xlu1 %4353, %v5124_v63   ;;  %9963 = vst [vmem:[#allocation15_spill] sm:$0xff] %v5218_v34  ;;  %vm927_vm12 = vcmp.eq.s32.totalorder %v5243_v46, %v5050_v47  ;;  %v5278_v4 = vsel %vm344_vm14, %v179_v56, 0  ;;  %v5280_v9 = vsel %vm336_vm1, %v175_v58, 0  ;;  %vm340_vm14 = vcmp.gt.s32.totalorder %v177_v28, 0  ;;  %v185_v56 = vld [vmem:[%s9729_s1 + $0x158] sm:$0xff] }
  0x36   :  { %9964 = vst [vmem:[#allocation16_spill] sm:$0xff] %v5220_v36  ;;  %vm935_vm13 = vcmp.eq.s32.totalorder %v5246_v52, %v5050_v47  ;;  %v5310_v40 = vsel %vm340_vm14, %v177_v28, 0  ;;  %v181_v58 = vld [vmem:[%s9729_s1 + $0x138] sm:$0xff]  ;;  %vm356_vm1 = vcmp.gt.s32.totalorder %v185_v56, 0  ;;  %v184_v28 = vld [vmem:[%s9729_s1 + $0x150] sm:$0xff] }
  0x37   :  { %9967 = vst [vmem:[#allocation19_spill] sm:$0xff] %v5248_v54 }
  0x38   :  { %9968 = vst [vmem:[#allocation20_spill] sm:$0xff] %v5278_v4 }
  0x39   :  { %4048 = vmatmul.msk.bf16.gmra.mxu0 %vm4047_vm15, %v9735_v55  ;;  %vm913_vm15 = vcmp.eq.s32.totalorder %v5181_v23, %v5059_v50  ;;  %9969 = vst [vmem:[#allocation21_spill] sm:$0xff] %v5280_v9 }
  0x3a   :  { %4064 = vmatmul.msk.bf16.gmra.mxu1 %vm4063_vm2, %v9735_v55  ;;  %vm4049_vm2 = vmpackc.low %vm919_vm10, %vm911_vm9  ;;  %vm338_vm9 = vcmp.gt.s32.totalorder %v176_v37, 0  ;;  %vm330_vm10 = vcmp.gt.s32.totalorder %v172_v38, 0  ;;  %9973 = vst [vmem:[#allocation25_spill] sm:$0xff] %v5310_v40 }
  0x3b   :  { %4080 = vmatmul.msk.bf16.gmra.mxu2 %vm4079_vm4, %v9735_v55  ;;  %vm914_vm4 = vcmp.eq.s32.totalorder %v5181_v23, %v5062_v0  ;;  %vm4081_vm7 = vmpackc.low %vm921_vm0, %vm913_vm15  ;;  %v5238_v41 = vsel %vm338_vm9, %v176_v37, 0  ;;  %v5240_v45 = vsel %vm330_vm10, %v172_v38, 0  ;;  %vm928_vm15 = vcmp.eq.s32.totalorder %v5243_v46, %v5053_v48 }
  0x3c   :  { %2059 = vperm.xlu0 %4355, %v5154_v10   ;;  %2047 = vperm.xlu2 %4354, %v5156_v11   ;;  %9965 = vst [vmem:[#allocation17_spill] sm:$0xff] %v5238_v41  ;;  %vm936_vm0 = vcmp.eq.s32.totalorder %v5246_v52, %v5053_v48  ;;  %v5305_v37 = vadd.s32 64, %v5044_v44  ;;  %v5308_v38 = vadd.s32 72, %v5044_v44  ;;  %v112_v11 = vld [vmem:[%s9730_s2 + $0x310] sm:$0xff] }
  0x3d   :  { %2044 = vperm.xlu1 %4353, %v5158_v13   ;;  %4096 = vmatmul.msk.bf16.gmra.mxu3 %vm4095_vm5, %v9735_v55  ;;  %vm922_vm5 = vcmp.eq.s32.totalorder %v5184_v26, %v5062_v0  ;;  %9966 = vst [vmem:[#allocation18_spill] sm:$0xff] %v5240_v45  ;;  %vm4067_vm9 = vmpackc.low %vm936_vm0, %vm928_vm15  ;;  %v104_v13 = vld [vmem:[%s9730_s2 + $0x2d0] sm:$0xff] }
  0x3e   :  { %vm4097_vm8 = vmpackc.low %vm922_vm5, %vm914_vm4  ;;  %vm937_vm4 = vcmp.eq.s32.totalorder %v5246_v52, %v5059_v50  ;;  %vm334_vm5 = vcmp.gt.s32.totalorder %v174_v2, 0  ;;  %vm943_vm15 = vcmp.eq.s32.totalorder %v5305_v37, %v5050_v47  ;;  %vm951_vm0 = vcmp.eq.s32.totalorder %v5308_v38, %v5050_v47 }
  0x3f   :  { %v5282_v14 = vsel %vm334_vm5, %v174_v2, 0  ;;  %v180_v2 = vld [vmem:[%s9729_s1 + $0x130] sm:$0xff]  ;;  %vm348_vm5 = vcmp.gt.s32.totalorder %v181_v58, 0 }
  0x40   :  { %9970 = vst [vmem:[#allocation22_spill] sm:$0xff] %v5282_v14  ;;  %v5348_v1 = vsel %vm348_vm5, %v181_v58, 0  ;;  %v92_v58 = vld [vmem:[%s9730_s2 + $0x270] sm:$0xff] }
  0x41   :  { %9975 = vst [vmem:[#allocation27_spill] sm:$0xff] %v5348_v1 }
  0x44   :  { %2068 = vperm.xlu0 %4355, %v5176_v19   ;;  %2056 = vperm.xlu2 %4354, %v5178_v20   ;;  %v97_v20 = vld [vmem:[%s9730_s2 + $0x298] sm:$0xff] }
  0x45   :  { %2053 = vperm.xlu1 %4353, %v5186_v27  }
  0x49   :  { %4050 = vmatmul.msk.bf16.gmra.mxu0 %vm4049_vm2, %v9735_v55  ;;  %vm929_vm2 = vcmp.eq.s32.totalorder %v5243_v46, %v5059_v50 }
  0x4a   :  { %4066 = vmatmul.msk.bf16.gmra.mxu1 %vm4065_vm6, %v9735_v55  ;;  %vm4051_vm6 = vmpackc.low %vm935_vm13, %vm927_vm12  ;;  %vm350_vm12 = vcmp.gt.s32.totalorder %v182_v15, 0  ;;  %vm342_vm13 = vcmp.gt.s32.totalorder %v178_v17, 0 }
  0x4b   :  { %4082 = vmatmul.msk.bf16.gmra.mxu2 %vm4081_vm7, %v9735_v55  ;;  %vm930_vm7 = vcmp.eq.s32.totalorder %v5243_v46, %v5062_v0  ;;  %vm4083_vm10 = vmpackc.low %vm937_vm4, %vm929_vm2  ;;  %v5300_v29 = vsel %vm350_vm12, %v182_v15, 0  ;;  %v5302_v30 = vsel %vm342_vm13, %v178_v17, 0  ;;  %vm944_vm2 = vcmp.eq.s32.totalorder %v5305_v37, %v5053_v48  ;;  %v188_v15 = vld [vmem:[%s9729_s1 + $0x170] sm:$0xff] }
  0x4c   :  { %2077 = vperm.xlu0 %4355, %v5216_v33   ;;  %2065 = vperm.xlu2 %4354, %v5218_v34   ;;  %9971 = vst [vmem:[#allocation23_spill] sm:$0xff] %v5300_v29  ;;  %vm952_vm4 = vcmp.eq.s32.totalorder %v5308_v38, %v5053_v48  ;;  %v5343_v17 = vsel %vm356_vm1, %v185_v56, 0  ;;  %vm362_vm13 = vcmp.gt.s32.totalorder %v188_v15, 0  ;;  %v141_v56 = vld [vmem:[%s9730_s2 + $0x3f8] sm:$0xff]  ;;  %v118_v34 = vld [vmem:[%s9730_s2 + $0x340] sm:$0xff] }
  0x4d   :  { %2062 = vperm.xlu1 %4353, %v5220_v36   ;;  %4098 = vmatmul.msk.bf16.gmra.mxu3 %vm4097_vm8, %v9735_v55  ;;  %vm938_vm8 = vcmp.eq.s32.totalorder %v5246_v52, %v5062_v0  ;;  %9972 = vst [vmem:[#allocation24_spill] sm:$0xff] %v5302_v30  ;;  %vm4069_vm12 = vmpackc.low %vm952_vm4, %vm944_vm2 }
  0x4e   :  { %vm4099_vm11 = vmpackc.low %vm938_vm8, %vm930_vm7  ;;  %vm953_vm7 = vcmp.eq.s32.totalorder %v5308_v38, %v5059_v50  ;;  %vm346_vm8 = vcmp.gt.s32.totalorder %v180_v2, 0  ;;  %9974 = vst [vmem:[#allocation26_spill] sm:$0xff] %v5343_v17 }
  0x54   :  { %2086 = vperm.xlu0 %4355, %v5238_v41   ;;  %2074 = vperm.xlu2 %4354, %v5240_v45   ;;  %v109_v41 = vld [vmem:[%s9730_s2 + $0x2f8] sm:$0xff]  ;;  %v88_v45 = vld [vmem:[%s9730_s2 + $0x250] sm:$0xff] }
  0x55   :  { %2071 = vperm.xlu1 %4353, %v5248_v54   ;;  %v757_v36 = vsel %vm9941_vm3, %v109_v41, %v4596_v18 }
  0x59   :  { %4052 = vmatmul.msk.bf16.gmra.mxu0 %vm4051_vm6, %v9735_v55  ;;  %vm945_vm6 = vcmp.eq.s32.totalorder %v5305_v37, %v5059_v50 }
  0x5a   :  { %4068 = vmatmul.msk.bf16.gmra.mxu1 %vm4067_vm9, %v9735_v55  ;;  %vm4053_vm9 = vmpackc.low %vm951_vm0, %vm943_vm15  ;;  %vm354_vm0 = vcmp.gt.s32.totalorder %v184_v28, 0 }
  0x5b   :  { %4084 = vmatmul.msk.bf16.gmra.mxu2 %vm4083_vm10, %v9735_v55  ;;  %vm946_vm10 = vcmp.eq.s32.totalorder %v5305_v37, %v5062_v0  ;;  %vm4085_vm14 = vmpackc.low %vm953_vm7, %vm945_vm6  ;;  %v5401_v33 = vsel %vm354_vm0, %v184_v28, 0 }
  0x5c   :  { %2095 = vperm.xlu0 %4355, %v5278_v4   ;;  %2083 = vperm.xlu2 %4354, %v5280_v9   ;;  %v5369_v4 = vsel %vm362_vm13, %v188_v15, 0  ;;  %v740_v15 = vsel %vm9941_vm3, %v92_v58, %v4596_v18  ;;  %9981 = vst [vmem:[#allocation30_spill] sm:$0xff] %v5401_v33  ;;  %v140_v9 = vld [vmem:[%s9730_s2 + $0x3f0] sm:$0xff] }
  0x5d   :  { %2080 = vperm.xlu1 %4353, %v5282_v14   ;;  %4100 = vmatmul.msk.bf16.gmra.mxu3 %vm4099_vm11, %v9735_v55  ;;  %vm954_vm11 = vcmp.eq.s32.totalorder %v5308_v38, %v5062_v0  ;;  %v5350_v55 = vsel %vm346_vm8, %v180_v2, 0  ;;  %v93_v2 = vld [vmem:[%s9730_s2 + $0x278] sm:$0xff]  ;;  %9980 = vst [vmem:[#allocation29_spill] sm:$0xff] %v5369_v4  ;;  %v5372_v14 = vadd.s32 80, %v5044_v44 }
  0x5e   :  { %9976 = vst [vmem:[#allocation28_spill] sm:$0xff] %v5350_v55  ;;  %vm5356_vm15 = vmpackc.low %vm954_vm11, %vm946_vm10  ;;  %v741_v54 = vsel %vm9941_vm3, %v93_v2, %v4596_v18 }
  0x5f   :  { %v829_v58 = vpack.c.bf16 %v741_v54, %v740_v15  ;;  %v191_v54 = vld [vmem:[%s9729_s1 + $0x188] sm:$0xff]  ;;  %v788_v15 = vsel %vm9941_vm3, %v140_v9, %v4596_v18  ;;  %vm959_vm2 = vcmp.eq.s32.totalorder %v5372_v14, %v5050_v47  ;;  %vm960_vm5 = vcmp.eq.s32.totalorder %v5372_v14, %v5053_v48 }
  0x60   :  { %v91_v9 = vld [vmem:[%s9730_s2 + $0x268] sm:$0xff]  ;;  %vm961_vm7 = vcmp.eq.s32.totalorder %v5372_v14, %v5059_v50  ;;  %vm368_vm10 = vcmp.gt.s32.totalorder %v191_v54, 0 }
  0x61   :  { %1395 = vmatpush.bf16.msrb.mxu0 %v829_v58 }
  0x64   :  { %2104 = vperm.xlu0 %4355, %v5300_v29   ;;  %2092 = vperm.xlu2 %4354, %v5302_v30   ;;  %v183_v29 = vld [vmem:[%s9729_s1 + $0x148] sm:$0xff]  ;;  %v124_v30 = vld [vmem:[%s9730_s2 + $0x370] sm:$0xff] }
  0x65   :  { %2089 = vperm.xlu1 %4353, %v5310_v40   ;;  %v9977_v40 = vmov 1.0|1.0   ;;  %vm352_vm1 = vcmp.gt.s32.totalorder %v183_v29, 0 }
  0x66   :  { %v5428_v19 = vsel %vm352_vm1, %v183_v29, 0  ;;  %v106_v29 = vld [vmem:[%s9730_s2 + $0x2e0] sm:$0xff] }
  0x67   :  { %9982 = vst [vmem:[#allocation31_spill] sm:$0xff] %v5428_v19  ;;  %v754_v27 = vsel %vm9941_vm3, %v106_v29, %v4596_v18 }
  0x69   :  { %4054 = vmatmul.msk.bf16.gmra.mxu0 %vm4053_vm9, %v9977_v40  ;;  %vm962_vm9 = vcmp.eq.s32.totalorder %v5372_v14, %v5062_v0 }
  0x6a   :  { %4070 = vmatmul.msk.bf16.gmra.mxu1 %vm4069_vm12, %v9977_v40 }
  0x6b   :  { %4086 = vmatmul.msk.bf16.gmra.mxu2 %vm4085_vm14, %v9977_v40 }
  0x6c   :  { %2113 = vperm.xlu0 %4355, %v5343_v17   ;;  %2101 = vperm.xlu2 %4354, %v5348_v1   ;;  %v108_v17 = vld [vmem:[%s9730_s2 + $0x2f0] sm:$0xff]  ;;  %v5383_v1 = vadd.s32 88, %v5044_v44 }
  0x6d   :  { %2098 = vperm.xlu1 %4353, %v5350_v55   ;;  %v125_v55 = vld [vmem:[%s9730_s2 + $0x378] sm:$0xff]  ;;  %4102 = vmatmul.msk.bf16.gmra.mxu3 %vm5356_vm15, %v9977_v40  ;;  %v756_v2 = vsel %vm9941_vm3, %v108_v17, %v4596_v18  ;;  %v772_v17 = vsel %vm9941_vm3, %v124_v30, %v4596_v18  ;;  %v789_v30 = vsel %vm9941_vm3, %v141_v56, %v4596_v18  ;;  %v122_v56 = vld [vmem:[%s9730_s2 + $0x360] sm:$0xff] }
  0x6e   :  { %v837_v28 = vpack.c.bf16 %v757_v36, %v756_v2  ;;  %v773_v41 = vsel %vm9941_vm3, %v125_v55, %v4596_v18  ;;  %v90_v55 = vld [vmem:[%s9730_s2 + $0x260] sm:$0xff]  ;;  %vm967_vm4 = vcmp.eq.s32.totalorder %v5383_v1, %v5050_v47  ;;  %vm968_vm6 = vcmp.eq.s32.totalorder %v5383_v1, %v5053_v48  ;;  %v107_v2 = vld [vmem:[%s9730_s2 + $0x2e8] sm:$0xff] }
  0x6f   :  { %v845_v36 = vpack.c.bf16 %v773_v41, %v772_v17  ;;  %v853_v58 = vpack.c.bf16 %v789_v30, %v788_v15  ;;  %v123_v17 = vld [vmem:[%s9730_s2 + $0x368] sm:$0xff]  ;;  %vm969_vm8 = vcmp.eq.s32.totalorder %v5383_v1, %v5059_v50  ;;  %v138_v41 = vld [vmem:[%s9730_s2 + $0x3e0] sm:$0xff]  ;;  %vm970_vm11 = vcmp.eq.s32.totalorder %v5383_v1, %v5062_v0  ;;  %vm5539_vm14 = vmpackc.low %vm967_vm4, %vm959_vm2 }
  0x70   :  { %1444 = vmatpush.bf16.msrb.mxu1 %v837_v28  ;;  %v738_v28 = vsel %vm9941_vm3, %v90_v55, %v4596_v18  ;;  %v139_v15 = vld [vmem:[%s9730_s2 + $0x3e8] sm:$0xff]  ;;  %v739_v55 = vsel %vm9941_vm3, %v91_v9, %v4596_v18  ;;  %v770_v9 = vsel %vm9941_vm3, %v122_v56, %v4596_v18  ;;  %v771_v29 = vsel %vm9941_vm3, %v123_v17, %v4596_v18  ;;  %vm5561_vm15 = vmpackc.low %vm968_vm6, %vm960_vm5 }
  0x71   :  { %1493 = vmatpush.bf16.msrb.mxu2 %v845_v36  ;;  %v187_v30 = vld [vmem:[%s9729_s1 + $0x168] sm:$0xff]  ;;  %v186_v36 = vld [vmem:[%s9729_s1 + $0x160] sm:$0xff]  ;;  %1542 = vmatpush.bf16.msrb.mxu3 %v853_v58  ;;  %v828_v10 = vpack.c.bf16 %v739_v55, %v738_v28  ;;  %v786_v56 = vsel %vm9941_vm3, %v138_v41, %v4596_v18  ;;  %v787_v17 = vsel %vm9941_vm3, %v139_v15, %v4596_v18  ;;  %v120_v28 = vld [vmem:[%s9730_s2 + $0x350] sm:$0xff] }
  0x72   :  { %v121_v55 = vld [vmem:[%s9730_s2 + $0x358] sm:$0xff]  ;;  %vm360_vm12 = vcmp.gt.s32.totalorder %v187_v30, 0  ;;  %vm358_vm13 = vcmp.gt.s32.totalorder %v186_v36, 0  ;;  %v852_v41 = vpack.c.bf16 %v787_v17, %v786_v56  ;;  %v136_v15 = vld [vmem:[%s9730_s2 + $0x3d0] sm:$0xff]  ;;  %v86_v17 = vld [vmem:[%s9730_s2 + $0x240] sm:$0xff] }
  0x73   :  { %1396 = vmatpush.bf16.msrb.mxu0 %v828_v10  ;;  %v736_v10 = vsel %vm9941_vm3, %v88_v45, %v4596_v18  ;;  %vm5601_vm0 = vmpackc.low %vm969_vm8, %vm961_vm7  ;;  %v5655_v45 = vadd.s32 96, %v5044_v44 }
  0x74   :  { %2122 = vperm.xlu0 %4355, %v5369_v4   ;;  %v755_v4 = vsel %vm9941_vm3, %v107_v2, %v4596_v18  ;;  %2110 = vperm.xlu2 %4354, %v5401_v33   ;;  %v89_v2 = vld [vmem:[%s9730_s2 + $0x258] sm:$0xff]  ;;  %v87_v33 = vld [vmem:[%s9730_s2 + $0x248] sm:$0xff]  ;;  %vm5623_vm1 = vmpackc.low %vm970_vm11, %vm962_vm9 }
  0x75   :  { %v836_v58 = vpack.c.bf16 %v755_v4, %v754_v27  ;;  %v105_v27 = vld [vmem:[%s9730_s2 + $0x2d8] sm:$0xff]  ;;  %2107 = vperm.xlu1 %4353, %v5428_v19   ;;  %v844_v4 = vpack.c.bf16 %v771_v29, %v770_v9  ;;  %v5525_v19 = vsel %vm368_vm10, %v191_v54, 0  ;;  %v752_v29 = vsel %vm9941_vm3, %v104_v13, %v4596_v18  ;;  %1543 = vmatpush.bf16.msrb.mxu3 %v852_v41 }
  0x76   :  { %9983 = vst [vmem:[#allocation32_spill] sm:$0xff] %v5525_v19  ;;  %v137_v9 = vld [vmem:[%s9730_s2 + $0x3d8] sm:$0xff]  ;;  %v753_v56 = vsel %vm9941_vm3, %v105_v27, %v4596_v18  ;;  %v768_v13 = vsel %vm9941_vm3, %v120_v28, %v4596_v18  ;;  %v769_v27 = vsel %vm9941_vm3, %v121_v55, %v4596_v18  ;;  %v5578_v41 = vsel %vm360_vm12, %v187_v30, 0  ;;  %v190_v28 = vld [vmem:[%s9729_s1 + $0x180] sm:$0xff] }
  0x77   :  { %1445 = vmatpush.bf16.msrb.mxu1 %v836_v58  ;;  %1494 = vmatpush.bf16.msrb.mxu2 %v844_v4  ;;  %v737_v58 = vsel %vm9941_vm3, %v89_v2, %v4596_v18  ;;  %v835_v4 = vpack.c.bf16 %v753_v56, %v752_v29  ;;  %9988 = vst [vmem:[#allocation33_spill] sm:$0xff] %v5578_v41  ;;  %v102_v30 = vld [vmem:[%s9730_s2 + $0x2c0] sm:$0xff]  ;;  %v103_v56 = vld [vmem:[%s9730_s2 + $0x2c8] sm:$0xff]  ;;  %vm366_vm4 = vcmp.gt.s32.totalorder %v190_v28, 0 }
  0x78   :  { %v827_v2 = vpack.c.bf16 %v737_v58, %v736_v10  ;;  %v194_v10 = vld [vmem:[%s9729_s1 + $0x1a0] sm:$0xff]  ;;  %v784_v55 = vsel %vm9941_vm3, %v136_v15, %v4596_v18  ;;  %v785_v58 = vsel %vm9941_vm3, %v137_v9, %v4596_v18  ;;  %v5606_v15 = vsel %vm358_vm13, %v186_v36, 0  ;;  %v135_v29 = vld [vmem:[%s9730_s2 + $0x3c8] sm:$0xff] }
  0x79   :  { %9991 = vst [vmem:[#allocation34_spill] sm:$0xff] %v5606_v15  ;;  %v843_v9 = vpack.c.bf16 %v769_v27, %v768_v13  ;;  %4056 = vmatmul.msk.bf16.gmra.mxu0 %vm5539_vm14, %v9977_v40  ;;  %v734_v54 = vsel %vm9941_vm3, %v86_v17, %v4596_v18  ;;  %v735_v13 = vsel %vm9941_vm3, %v87_v33, %v4596_v18  ;;  %v119_v27 = vld [vmem:[%s9730_s2 + $0x348] sm:$0xff]  ;;  %vm374_vm2 = vcmp.gt.s32.totalorder %v194_v10, 0  ;;  %v134_v33 = vld [vmem:[%s9730_s2 + $0x3c0] sm:$0xff] }
  0x7a   :  { %1397 = vmatpush.bf16.msrb.mxu0 %v827_v2  ;;  %v189_v2 = vld [vmem:[%s9729_s1 + $0x178] sm:$0xff]  ;;  %4072 = vmatmul.msk.bf16.gmra.mxu1 %vm5561_vm15, %v9977_v40  ;;  %v750_v17 = vsel %vm9941_vm3, %v102_v30, %v4596_v18  ;;  %v751_v30 = vsel %vm9941_vm3, %v103_v56, %v4596_v18  ;;  %v5685_v36 = vsel %vm374_vm2, %v194_v10, 0  ;;  %vm975_vm6 = vcmp.eq.s32.totalorder %v5655_v45, %v5050_v47 }
  0x7b   :  { %1446 = vmatpush.bf16.msrb.mxu1 %v835_v4  ;;  %v851_v4 = vpack.c.bf16 %v785_v58, %v784_v55  ;;  %v826_v55 = vpack.c.bf16 %v735_v13, %v734_v54  ;;  %4088 = vmatmul.msk.bf16.gmra.mxu2 %vm5601_vm0, %v9977_v40  ;;  %v5658_v58 = vadd.s32 104, %v5044_v44  ;;  %v766_v54 = vsel %vm9941_vm3, %v118_v34, %v4596_v18 }
  0x7c   :  { %2131 = vperm.xlu0 %4355, %v5525_v19   ;;  %2119 = vperm.xlu2 %4354, %v5578_v41   ;;  %vm364_vm5 = vcmp.gt.s32.totalorder %v189_v2, 0  ;;  %v834_v13 = vpack.c.bf16 %v751_v30, %v750_v17  ;;  %v767_v19 = vsel %vm9941_vm3, %v119_v27, %v4596_v18  ;;  %v782_v34 = vsel %vm9941_vm3, %v134_v33, %v4596_v18  ;;  %v117_v33 = vld [vmem:[%s9730_s2 + $0x338] sm:$0xff] }
  0x7d   :  { %2116 = vperm.xlu1 %4353, %v5606_v15   ;;  %4104 = vmatmul.msk.bf16.gmra.mxu3 %vm5623_vm1, %v9977_v40  ;;  %v842_v56 = vpack.c.bf16 %v767_v19, %v766_v54  ;;  %v84_v15 = vld [vmem:[%s9730_s2 + $0x230] sm:$0xff]  ;;  %9994 = vst [vmem:[#allocation35_spill] sm:$0xff] %v5685_v36  ;;  %v5688_v27 = vsel %vm366_vm4, %v190_v28, 0  ;;  %v783_v19 = vsel %vm9941_vm3, %v135_v29, %v4596_v18  ;;  %v5700_v17 = vsel %vm364_vm5, %v189_v2, 0  ;;  %v197_v30 = vld [vmem:[%s9729_s1 + $0x1b8] sm:$0xff] }
  0x7e   :  { %1495 = vmatpush.bf16.msrb.mxu2 %v843_v9  ;;  %1544 = vmatpush.bf16.msrb.mxu3 %v851_v4  ;;  %v85_v9 = vld [vmem:[%s9730_s2 + $0x238] sm:$0xff]  ;;  %9995 = vst [vmem:[#allocation36_spill] sm:$0xff] %v5688_v27  ;;  %v100_v4 = vld [vmem:[%s9730_s2 + $0x2b0] sm:$0xff]  ;;  %vm983_vm7 = vcmp.eq.s32.totalorder %v5658_v58, %v5050_v47  ;;  %v850_v10 = vpack.c.bf16 %v783_v19, %v782_v34  ;;  %vm380_vm11 = vcmp.gt.s32.totalorder %v197_v30, 0 }
  0x7f   :  { %1398 = vmatpush.bf16.msrb.mxu0 %v826_v55  ;;  %1447 = vmatpush.bf16.msrb.mxu1 %v834_v13  ;;  %v101_v55 = vld [vmem:[%s9730_s2 + $0x2b8] sm:$0xff]  ;;  %9996 = vst [vmem:[#allocation37_spill] sm:$0xff] %v5700_v17  ;;  %v116_v28 = vld [vmem:[%s9730_s2 + $0x330] sm:$0xff]  ;;  %vm976_vm8 = vcmp.eq.s32.totalorder %v5655_v45, %v5053_v48  ;;  %vm984_vm9 = vcmp.eq.s32.totalorder %v5658_v58, %v5053_v48  ;;  %vm5764_vm10 = vmpackc.low %vm983_vm7, %vm975_vm6 }
  0x80   :  { %v132_v2 = vld [vmem:[%s9730_s2 + $0x3b0] sm:$0xff]  ;;  %v193_v54 = vld [vmem:[%s9729_s1 + $0x198] sm:$0xff]  ;;  %v732_v29 = vsel %vm9941_vm3, %v84_v15, %v4596_v18  ;;  %v733_v13 = vsel %vm9941_vm3, %v85_v9, %v4596_v18  ;;  %v748_v15 = vsel %vm9941_vm3, %v100_v4, %v4596_v18  ;;  %v749_v9 = vsel %vm9941_vm3, %v101_v55, %v4596_v18  ;;  %v82_v4 = vld [vmem:[%s9730_s2 + $0x220] sm:$0xff] }
  0x81   :  { %v133_v34 = vld [vmem:[%s9730_s2 + $0x3b8] sm:$0xff]  ;;  %v192_v19 = vld [vmem:[%s9729_s1 + $0x190] sm:$0xff]  ;;  %v833_v41 = vpack.c.bf16 %v749_v9, %v748_v15  ;;  %vm372_vm12 = vcmp.gt.s32.totalorder %v193_v54, 0  ;;  %vm977_vm13 = vcmp.eq.s32.totalorder %v5655_v45, %v5059_v50  ;;  %vm5794_vm15 = vmpackc.low %vm984_vm9, %vm976_vm8  ;;  %vm985_vm0 = vcmp.eq.s32.totalorder %v5658_v58, %v5059_v50 }
  0x82   :  { %1496 = vmatpush.bf16.msrb.mxu2 %v842_v56  ;;  %1545 = vmatpush.bf16.msrb.mxu3 %v850_v10  ;;  %v825_v56 = vpack.c.bf16 %v733_v13, %v732_v29  ;;  %v765_v10 = vsel %vm9941_vm3, %v117_v33, %v4596_v18  ;;  %v780_v29 = vsel %vm9941_vm3, %v132_v2, %v4596_v18  ;;  %v83_v2 = vld [vmem:[%s9730_s2 + $0x228] sm:$0xff]  ;;  %v98_v13 = vld [vmem:[%s9730_s2 + $0x2a0] sm:$0xff]  ;;  %vm370_vm14 = vcmp.gt.s32.totalorder %v192_v19, 0  ;;  %vm5861_vm4 = vmpackc.low %vm985_vm0, %vm977_vm13 }
  0x83   :  { %v781_v33 = vsel %vm9941_vm3, %v133_v34, %v4596_v18  ;;  %1448 = vmatpush.bf16.msrb.mxu1 %v833_v41  ;;  %v114_v34 = vld [vmem:[%s9730_s2 + $0x320] sm:$0xff]  ;;  %vm978_vm1 = vcmp.eq.s32.totalorder %v5655_v45, %v5062_v0  ;;  %vm986_vm2 = vcmp.eq.s32.totalorder %v5658_v58, %v5062_v0  ;;  %v730_v9 = vsel %vm9941_vm3, %v82_v4, %v4596_v18  ;;  %v129_v41 = vld [vmem:[%s9730_s2 + $0x398] sm:$0xff] }
  0x84   :  { %2140 = vperm.xlu0 %4355, %v5685_v36   ;;  %2128 = vperm.xlu2 %4354, %v5688_v27   ;;  %v764_v36 = vsel %vm9941_vm3, %v116_v28, %v4596_v18  ;;  %v849_v15 = vpack.c.bf16 %v781_v33, %v780_v29  ;;  %v131_v29 = vld [vmem:[%s9730_s2 + $0x3a8] sm:$0xff]  ;;  %v5814_v33 = vsel %vm380_vm11, %v197_v30, 0  ;;  %v731_v4 = vsel %vm9941_vm3, %v83_v2, %v4596_v18  ;;  %v80_v30 = vld [vmem:[%s9730_s2 + $0x210] sm:$0xff]  ;;  %vm5886_vm5 = vmpackc.low %vm986_vm2, %vm978_vm1 }
  0x85   :  { %2125 = vperm.xlu1 %4353, %v5700_v17   ;;  %1399 = vmatpush.bf16.msrb.mxu0 %v825_v56  ;;  %v841_v28 = vpack.c.bf16 %v765_v10, %v764_v36  ;;  %v99_v36 = vld [vmem:[%s9730_s2 + $0x2a8] sm:$0xff]  ;;  %v130_v10 = vld [vmem:[%s9730_s2 + $0x3a0] sm:$0xff]  ;;  %10001 = vst [vmem:[#allocation38_spill] sm:$0xff] %v5814_v33  ;;  %v5817_v17 = vsel %vm372_vm12, %v193_v54, 0  ;;  %v746_v27 = vsel %vm9941_vm3, %v98_v13, %v4596_v18  ;;  %v81_v54 = vld [vmem:[%s9730_s2 + $0x218] sm:$0xff]  ;;  %v5835_v59 = vsel %vm370_vm14, %v192_v19, 0 }
  0x86   :  { %v115_v56 = vld [vmem:[%s9730_s2 + $0x328] sm:$0xff]  ;;  %10002 = vst [vmem:[#allocation39_spill] sm:$0xff] %v5817_v17  ;;  %1546 = vmatpush.bf16.msrb.mxu3 %v849_v15  ;;  %v196_v15 = vld [vmem:[%s9729_s1 + $0x1b0] sm:$0xff]  ;;  %v747_v2 = vsel %vm9941_vm3, %v99_v36, %v4596_v18  ;;  %v762_v13 = vsel %vm9941_vm3, %v114_v34, %v4596_v18  ;;  %v824_v34 = vpack.c.bf16 %v731_v4, %v730_v9 }
  0x87   :  { %1497 = vmatpush.bf16.msrb.mxu2 %v841_v28  ;;  %v200_v28 = vld [vmem:[%s9729_s1 + $0x1d0] sm:$0xff]  ;;  %10003 = vst [vmem:[#allocation40_spill] sm:$0xff] %v5835_v59  ;;  %v763_v63 = vsel %vm9941_vm3, %v115_v56, %v4596_v18  ;;  %v832_v56 = vpack.c.bf16 %v747_v2, %v746_v27  ;;  %v778_v51 = vsel %vm9941_vm3, %v130_v10, %v4596_v18  ;;  %vm378_vm7 = vcmp.gt.s32.totalorder %v196_v15, 0  ;;  %v95_v36 = vld [vmem:[%s9730_s2 + $0x288] sm:$0xff] }
  0x88   :  { %v96_v19 = vld [vmem:[%s9730_s2 + $0x290] sm:$0xff]  ;;  %v779_v57 = vsel %vm9941_vm3, %v131_v29, %v4596_v18  ;;  %vm386_vm6 = vcmp.gt.s32.totalorder %v200_v28, 0  ;;  %v840_v9 = vpack.c.bf16 %v763_v63, %v762_v13  ;;  %v728_v10 = vsel %vm9941_vm3, %v80_v30, %v4596_v18  ;;  %v195_v63 = vld [vmem:[%s9729_s1 + $0x1a8] sm:$0xff] }
  0x89   :  { %4058 = vmatmul.msk.bf16.gmra.mxu0 %vm5764_vm10, %v9977_v40  ;;  %v729_v55 = vsel %vm9941_vm3, %v81_v54, %v4596_v18  ;;  %v128_v29 = vld [vmem:[%s9730_s2 + $0x390] sm:$0xff]  ;;  %v848_v4 = vpack.c.bf16 %v779_v57, %v778_v51  ;;  %v744_v30 = vsel %vm9941_vm3, %v96_v19, %v4596_v18  ;;  %v745_v54 = vsel %vm9941_vm3, %v97_v20, %v4596_v18  ;;  %v78_v20 = vld [vmem:[%s9730_s2 + $0x200] sm:$0xff] }
  0x8a   :  { %4074 = vmatmul.msk.bf16.gmra.mxu1 %vm5794_vm15, %v9977_v40  ;;  %v760_v51 = vsel %vm9941_vm3, %v112_v11, %v4596_v18  ;;  %v761_v57 = vsel %vm9941_vm3, %v113_v12, %v4596_v18  ;;  %v5933_v2 = vsel %vm386_vm6, %v200_v28, 0  ;;  %1400 = vmatpush.bf16.msrb.mxu0 %v824_v34  ;;  %v823_v13 = vpack.c.bf16 %v729_v55, %v728_v10  ;;  %v79_v12 = vld [vmem:[%s9730_s2 + $0x208] sm:$0xff]  ;;  %v94_v19 = vld [vmem:[%s9730_s2 + $0x280] sm:$0xff] }
  0x8b   :  { %4090 = vmatmul.msk.bf16.gmra.mxu2 %vm5861_vm4, %v9977_v40  ;;  %10008 = vst [vmem:[#allocation41_spill] sm:$0xff] %v5933_v2  ;;  %v776_v11 = vsel %vm9941_vm3, %v128_v29, %v4596_v18  ;;  %v5948_v28 = vsel %vm378_vm7, %v196_v15, 0  ;;  %vm376_vm8 = vcmp.gt.s32.totalorder %v195_v63, 0  ;;  %1449 = vmatpush.bf16.msrb.mxu1 %v832_v56  ;;  %v831_v34 = vpack.c.bf16 %v745_v54, %v744_v30  ;;  %v110_v10 = vld [vmem:[%s9730_s2 + $0x300] sm:$0xff]  ;;  %v127_v54 = vld [vmem:[%s9730_s2 + $0x388] sm:$0xff] }
  0x8c   :  { %2149 = vperm.xlu0 %4355, %v5814_v33   ;;  %2137 = vperm.xlu2 %4354, %v5817_v17   ;;  %10009 = vst [vmem:[#allocation42_spill] sm:$0xff] %v5948_v28  ;;  %v777_v27 = vsel %vm9941_vm3, %v129_v41, %v4596_v18  ;;  %v5957_v55 = vadd.s32 112, %v5044_v44  ;;  %v5960_v29 = vadd.s32 120, %v5044_v44  ;;  %v839_v15 = vpack.c.bf16 %v761_v57, %v760_v51  ;;  %v126_v30 = vld [vmem:[%s9730_s2 + $0x380] sm:$0xff]  ;;  %v203_v33 = vld [vmem:[%s9729_s1 + $0x1e8] sm:$0xff] }
  0x8d   :  { %2134 = vperm.xlu1 %4353, %v5835_v59   ;;  %4106 = vmatmul.msk.bf16.gmra.mxu3 %vm5886_vm5, %v9977_v40  ;;  %v726_v56 = vsel %vm9941_vm3, %v78_v20, %v4596_v18  ;;  %v847_v41 = vpack.c.bf16 %v777_v27, %v776_v11  ;;  %v742_v51 = vsel %vm9941_vm3, %v94_v19, %v4596_v18  ;;  %v5984_v20 = vsel %vm376_vm8, %v195_v63, 0  ;;  %v199_v19 = vld [vmem:[%s9729_s1 + $0x1c8] sm:$0xff] }
  0x8e   :  { %1498 = vmatpush.bf16.msrb.mxu2 %v840_v9  ;;  %1547 = vmatpush.bf16.msrb.mxu3 %v848_v4  ;;  %v111_v9 = vld [vmem:[%s9730_s2 + $0x308] sm:$0xff]  ;;  %v727_v4 = vsel %vm9941_vm3, %v79_v12, %v4596_v18  ;;  %v743_v57 = vsel %vm9941_vm3, %v95_v36, %v4596_v18  ;;  %10010 = vst [vmem:[#allocation43_spill] sm:$0xff] %v5984_v20  ;;  %vm392_vm11 = vcmp.gt.s32.totalorder %v203_v33, 0  ;;  %vm384_vm14 = vcmp.gt.s32.totalorder %v199_v19, 0 }
  0x8f   :  { %1401 = vmatpush.bf16.msrb.mxu0 %v823_v13  ;;  %v822_v11 = vpack.c.bf16 %v727_v4, %v726_v56  ;;  %v830_v27 = vpack.c.bf16 %v743_v57, %v742_v51  ;;  %v758_v12 = vsel %vm9941_vm3, %v110_v10, %v4596_v18  ;;  %1450 = vmatpush.bf16.msrb.mxu1 %v831_v34  ;;  %v198_v10 = vld [vmem:[%s9729_s1 + $0x1c0] sm:$0xff]  ;;  %v6060_v4 = vperm.slane %v5041_v42, 5  ;;  %v209_v51 = vld [vmem:[%s9729_s1 + $0x218] sm:$0xff]  ;;  %v6065_v57 = vpop.permute.xlu1 %1984 }
  0x90   :  { %v759_v63 = vsel %vm9941_vm3, %v111_v9, %v4596_v18  ;;  %v774_v13 = vsel %vm9941_vm3, %v126_v30, %v4596_v18  ;;  %v775_v36 = vsel %vm9941_vm3, %v127_v54, %v4596_v18  ;;  %vm991_vm9 = vcmp.eq.s32.totalorder %v5957_v55, %v5050_v47  ;;  %10018 = vst [vmem:[#allocation51_spill] sm:$0xff] %v6065_v57 }
  0x91   :  { %v838_v34 = vpack.c.bf16 %v759_v63, %v758_v12  ;;  %vm999_vm10 = vcmp.eq.s32.totalorder %v5960_v29, %v5050_v47  ;;  %v846_v56 = vpack.c.bf16 %v775_v36, %v774_v13  ;;  %vm992_vm12 = vcmp.eq.s32.totalorder %v5957_v55, %v5053_v48 }
  0x92   :  { %1499 = vmatpush.bf16.msrb.mxu2 %v839_v15  ;;  %1548 = vmatpush.bf16.msrb.mxu3 %v847_v41  ;;  %vm1000_vm13 = vcmp.eq.s32.totalorder %v5960_v29, %v5053_v48  ;;  %vm993_vm15 = vcmp.eq.s32.totalorder %v5957_v55, %v5059_v50  ;;  %vm1001_vm0 = vcmp.eq.s32.totalorder %v5960_v29, %v5059_v50  ;;  %vm382_vm1 = vcmp.gt.s32.totalorder %v198_v10, 0  ;;  %vm4059_vm2 = vmpackc.low %vm999_vm10, %vm991_vm9  ;;  %v206_v50 = vld [vmem:[%s9729_s1 + $0x200] sm:$0xff]  ;;  %v6048_v15 = vpop.permute.xlu2 %1987 }
  0x93   :  { %1402 = vmatpush.bf16.msrb.mxu0 %v822_v11  ;;  %1451 = vmatpush.bf16.msrb.mxu1 %v830_v27  ;;  %vm994_vm4 = vcmp.eq.s32.totalorder %v5957_v55, %v5062_v0  ;;  %vm1002_vm5 = vcmp.eq.s32.totalorder %v5960_v29, %v5062_v0  ;;  %v6026_v18 = vsel %vm392_vm11, %v203_v33, 0  ;;  %vm4075_vm6 = vmpackc.low %vm1000_vm13, %vm992_vm12  ;;  %v6028_v47 = vsel %vm384_vm14, %v199_v19, 0  ;;  %v202_v0 = vld [vmem:[%s9729_s1 + $0x1e0] sm:$0xff]  ;;  %v201_v33 = vld [vmem:[%s9729_s1 + $0x1d8] sm:$0xff]  ;;  %10014 = vst [vmem:[#allocation47_spill] sm:$0xff] %v6048_v15 }
  0x94   :  { %2158 = vperm.xlu0 %4355, %v5933_v2   ;;  %2146 = vperm.xlu2 %4354, %v5948_v28   ;;  %10011 = vst [vmem:[#allocation44_spill] sm:$0xff] %v6026_v18  ;;  %vm4091_vm7 = vmpackc.low %vm1001_vm0, %vm993_vm15  ;;  %v6030_v48 = vsel %vm382_vm1, %v198_v10, 0  ;;  %vm398_vm9 = vcmp.gt.s32.totalorder %v206_v50, 0  ;;  %vm390_vm10 = vcmp.gt.s32.totalorder %v202_v0, 0  ;;  %vm388_vm11 = vcmp.gt.s32.totalorder %v201_v33, 0  ;;  %v205_v27 = vld [vmem:[%s9729_s1 + $0x1f8] sm:$0xff] }
  0x95   :  { %2143 = vperm.xlu1 %4353, %v5984_v20   ;;  %10012 = vst [vmem:[#allocation45_spill] sm:$0xff] %v6028_v47  ;;  %vm4107_vm8 = vmpackc.low %vm1002_vm5, %vm994_vm4  ;;  %v6050_v9 = vsel %vm398_vm9, %v206_v50, 0  ;;  %v6052_v30 = vsel %vm390_vm10, %v202_v0, 0  ;;  %v6055_v54 = vperm.slane %v5041_v42, 4  ;;  %v6057_v41 = vsel %vm388_vm11, %v201_v33, 0  ;;  %v204_v19 = vld [vmem:[%s9729_s1 + $0x1f0] sm:$0xff] }
  0x96   :  { %1500 = vmatpush.bf16.msrb.mxu2 %v838_v34  ;;  %1549 = vmatpush.bf16.msrb.mxu3 %v846_v56  ;;  %10013 = vst [vmem:[#allocation46_spill] sm:$0xff] %v6030_v48  ;;  %v6069_v11 = vperm.slane %v5041_v42, 6  ;;  %v6076_v12 = vperm.slane %v5041_v42, 7  ;;  %vm404_vm14 = vcmp.gt.s32.totalorder %v209_v51, 0  ;;  %vm884_vm15 = vcmp.eq.s32.totalorder %v5044_v44, %v6060_v4  ;;  %v212_v50 = vld [vmem:[%s9729_s1 + $0x230] sm:$0xff]  ;;  %v207_v0 = vld [vmem:[%s9729_s1 + $0x208] sm:$0xff] }
  0x97   :  { %10015 = vst [vmem:[#allocation48_spill] sm:$0xff] %v6050_v9  ;;  %vm883_vm12 = vcmp.eq.s32.totalorder %v5044_v44, %v6055_v54  ;;  %vm891_vm13 = vcmp.eq.s32.totalorder %v5056_v49, %v6055_v54  ;;  %vm892_vm0 = vcmp.eq.s32.totalorder %v5056_v49, %v6060_v4  ;;  %vm396_vm1 = vcmp.gt.s32.totalorder %v205_v27, 0  ;;  %v6119_v33 = vpop.permute.xlu1 %1993 }
  0x98   :  { %10016 = vst [vmem:[#allocation49_spill] sm:$0xff] %v6052_v30  ;;  %vm893_vm4 = vcmp.eq.s32.totalorder %v5056_v49, %v6069_v11  ;;  %vm394_vm5 = vcmp.gt.s32.totalorder %v204_v19, 0  ;;  %v6098_v63 = vsel %vm404_vm14, %v209_v51, 0  ;;  %vm4125_vm9 = vmpackc.low %vm892_vm0, %vm884_vm15  ;;  %v6102_v10 = vsel %vm396_vm1, %v205_v27, 0 }
  0x99   :  { %4060 = vmatmul.msk.bf16.gmra.mxu0 %vm4059_vm2, %v9977_v40  ;;  %10017 = vst [vmem:[#allocation50_spill] sm:$0xff] %v6057_v41  ;;  %vm885_vm2 = vcmp.eq.s32.totalorder %v5044_v44, %v6069_v11  ;;  %v6104_v56 = vsel %vm394_vm5, %v204_v19, 0  ;;  %vm400_vm14 = vcmp.gt.s32.totalorder %v207_v0, 0  ;;  %vm899_vm15 = vcmp.eq.s32.totalorder %v5119_v61, %v6055_v54 }
  0x9a   :  { %4076 = vmatmul.msk.bf16.gmra.mxu1 %vm4075_vm6, %v9977_v40  ;;  %vm4109_vm6 = vmpackc.low %vm891_vm13, %vm883_vm12  ;;  %10019 = vst [vmem:[#allocation52_spill] sm:$0xff] %v6098_v63  ;;  %v6100_v13 = vpop.permute.xlu2 %1996  ;;  %vm410_vm12 = vcmp.gt.s32.totalorder %v212_v50, 0  ;;  %vm907_vm0 = vcmp.eq.s32.totalorder %v5122_v62, %v6055_v54 }
  0x9b   :  { %4092 = vmatmul.msk.bf16.gmra.mxu2 %vm4091_vm7, %v9977_v40  ;;  %vm886_vm7 = vcmp.eq.s32.totalorder %v5044_v44, %v6076_v12  ;;  %10020 = vst [vmem:[#allocation53_spill] sm:$0xff] %v6100_v13  ;;  %vm4141_vm10 = vmpackc.low %vm893_vm4, %vm885_vm2  ;;  %v6124_v19 = vsel %vm410_vm12, %v212_v50, 0  ;;  %vm900_vm2 = vcmp.eq.s32.totalorder %v5119_v61, %v6060_v4  ;;  %vm908_vm4 = vcmp.eq.s32.totalorder %v5122_v62, %v6060_v4 }
  0x9c   :  { %2167 = vperm.xlu0 %4355, %v6026_v18   ;;  %2155 = vperm.xlu2 %4354, %v6028_v47   ;;  %10021 = vst [vmem:[#allocation54_spill] sm:$0xff] %v6102_v10  ;;  %v6128_v18 = vsel %vm400_vm14, %v207_v0, 0  ;;  %vm4127_vm12 = vmpackc.low %vm908_vm4, %vm900_vm2  ;;  %vm915_vm2 = vcmp.eq.s32.totalorder %v5181_v23, %v6055_v54  ;;  %vm923_vm4 = vcmp.eq.s32.totalorder %v5184_v26, %v6055_v54 }
  0x9d   :  { %2152 = vperm.xlu1 %4353, %v6030_v48   ;;  %4108 = vmatmul.msk.bf16.gmra.mxu3 %vm4107_vm8, %v9977_v40  ;;  %vm894_vm8 = vcmp.eq.s32.totalorder %v5056_v49, %v6076_v12  ;;  %10022 = vst [vmem:[#allocation55_spill] sm:$0xff] %v6104_v56  ;;  %v208_v49 = vld [vmem:[%s9729_s1 + $0x210] sm:$0xff] }
  0x9e   :  { %vm4157_vm11 = vmpackc.low %vm894_vm8, %vm886_vm7  ;;  %10023 = vst [vmem:[#allocation56_spill] sm:$0xff] %v6119_v33  ;;  %vm402_vm13 = vcmp.gt.s32.totalorder %v208_v49, 0  ;;  %vm909_vm7 = vcmp.eq.s32.totalorder %v5122_v62, %v6069_v11 }
  0x9f   :  { %10024 = vst [vmem:[#allocation57_spill] sm:$0xff] %v6124_v19  ;;  %v6154_v50 = vpop.permute.xlu1 %1999 }
  0xa0   :  { %10026 = vst [vmem:[#allocation59_spill] sm:$0xff] %v6128_v18 }
  0xa1   :  { %10028 = vst [vmem:[#allocation61_spill] sm:$0xff] %v6154_v50 }
  0xa2   :  { %v6133_v48 = vpop.permute.xlu2 %2002 }
  0xa3   :  { %10027 = vst [vmem:[#allocation60_spill] sm:$0xff] %v6133_v48 }
  0xa4   :  { %2176 = vperm.xlu0 %4355, %v6050_v9   ;;  %2164 = vperm.xlu2 %4354, %v6052_v30   ;;  %v6126_v9 = vsel %vm402_vm13, %v208_v49, 0 }
  0xa5   :  { %2161 = vperm.xlu1 %4353, %v6057_v41   ;;  %10025 = vst [vmem:[#allocation58_spill] sm:$0xff] %v6126_v9 }
  0xa6   :  { %v1208_v42 = vpop.f32.mrf.mxu0 }
  0xa7   :  { %v1257_v36 = vpop.f32.mrf.mxu1  ;;  %v6214_v30 = vpop.permute.xlu1 %2008 }
  0xa8   :  { %v1258_v34 = vadd.f32 %v1257_v36, %v1208_v42  ;;  %10037 = vst [vmem:[#allocation70_spill] sm:$0xff] %v6214_v30 }
  0xa9   :  { %4110 = vmatmul.msk.bf16.vlgmr.msrb.gmra.mxu0 %vm4109_vm6, %v9977_v40  ;;  %vm901_vm6 = vcmp.eq.s32.totalorder %v5119_v61, %v6069_v11 }
  0xaa   :  { %4126 = vmatmul.msk.bf16.vlgmr.msrb.gmra.mxu1 %vm4125_vm9, %v9977_v40  ;;  %vm4111_vm9 = vmpackc.low %vm907_vm0, %vm899_vm15 }
  0xab   :  { %4142 = vmatmul.msk.bf16.vlgmr.msrb.gmra.mxu2 %vm4141_vm10, %v9977_v40  ;;  %vm902_vm10 = vcmp.eq.s32.totalorder %v5119_v61, %v6076_v12  ;;  %vm4143_vm13 = vmpackc.low %vm909_vm7, %vm901_vm6  ;;  %vm916_vm6 = vcmp.eq.s32.totalorder %v5181_v23, %v6060_v4  ;;  %vm924_vm7 = vcmp.eq.s32.totalorder %v5184_v26, %v6060_v4 }
  0xac   :  { %2185 = vperm.xlu0 %4355, %v6098_v63   ;;  %2173 = vperm.xlu2 %4354, %v6102_v10  }
  0xad   :  { %2170 = vperm.xlu1 %4353, %v6104_v56   ;;  %4158 = vmatmul.msk.bf16.vlgmr.msrb.gmra.mxu3 %vm4157_vm11, %v9977_v40  ;;  %v215_v56 = vld [vmem:[%s9729_s1 + $0x248] sm:$0xff]  ;;  %vm910_vm11 = vcmp.eq.s32.totalorder %v5122_v62, %v6076_v12  ;;  %v214_v62 = vld [vmem:[%s9729_s1 + $0x240] sm:$0xff] }
  0xae   :  { %v1306_v51 = vpop.f32.mrf.mxu2  ;;  %v1210_v27 = vpop.f32.mrf.mxu0  ;;  %vm416_vm1 = vcmp.gt.s32.totalorder %v215_v56, 0  ;;  %vm4159_vm14 = vmpackc.low %vm910_vm11, %vm902_vm10  ;;  %vm414_vm0 = vcmp.gt.s32.totalorder %v214_v62, 0  ;;  %vm925_vm10 = vcmp.eq.s32.totalorder %v5184_v26, %v6069_v11 }
  0xaf   :  { %v1307_v42 = vadd.f32 %v1306_v51, %v1258_v34  ;;  %v1259_v63 = vpop.f32.mrf.mxu1  ;;  %v211_v34 = vld [vmem:[%s9729_s1 + $0x228] sm:$0xff]  ;;  %v6164_v51 = vsel %vm416_vm1, %v215_v56, 0 }
  0xb0   :  { %v1355_v36 = vpop.f32.mrf.mxu3  ;;  %v1260_v41 = vadd.f32 %v1259_v63, %v1210_v27  ;;  %v210_v63 = vld [vmem:[%s9729_s1 + $0x220] sm:$0xff]  ;;  %vm408_vm5 = vcmp.gt.s32.totalorder %v211_v34, 0  ;;  %10029 = vst [vmem:[#allocation62_spill] sm:$0xff] %v6164_v51 }
  0xb1   :  { %v6135_v10 = vadd.f32 %v1355_v36, %v1307_v42  ;;  %vm406_vm8 = vcmp.gt.s32.totalorder %v210_v63, 0 }
  0xb2   :  { %v6178_v56 = vsel %vm406_vm8, %v210_v63, 0  ;;  %v6200_v63 = vpop.permute.xlu2 %2011 }
  0xb3   :  { %10031 = vst [vmem:[#allocation64_spill] sm:$0xff] %v6178_v56 }
  0xb4   :  { %2194 = vperm.xlu0 %4355, %v6124_v19   ;;  %2182 = vperm.xlu2 %4354, %v6126_v9   ;;  %v6173_v19 = vsel %vm408_vm5, %v211_v34, 0  ;;  %v213_v34 = vld [vmem:[%s9729_s1 + $0x238] sm:$0xff]  ;;  %10033 = vst [vmem:[#allocation66_spill] sm:$0xff] %v6200_v63 }
  0xb5   :  { %2179 = vperm.xlu1 %4353, %v6128_v18   ;;  %10030 = vst [vmem:[#allocation63_spill] sm:$0xff] %v6173_v19  ;;  %vm412_vm1 = vcmp.gt.s32.totalorder %v213_v34, 0 }
  0xb6   :  { %v1308_v49 = vpop.f32.mrf.mxu2  ;;  %v1213_v0 = vpop.f32.mrf.mxu0  ;;  %v6209_v20 = vsel %vm412_vm1, %v213_v34, 0 }
  0xb7   :  { %v1309_v27 = vadd.f32 %v1308_v49, %v1260_v41  ;;  %v1262_v36 = vpop.f32.mrf.mxu1  ;;  %v218_v41 = vld [vmem:[%s9729_s1 + $0x260] sm:$0xff]  ;;  %v6183_v49 = vpop.permute.xlu0 %1990  ;;  %10036 = vst [vmem:[#allocation69_spill] sm:$0xff] %v6209_v20 }
  0xb8   :  { %v1357_v42 = vpop.f32.mrf.mxu3  ;;  %v1263_v18 = vadd.f32 %v1262_v36, %v1213_v0  ;;  %10032 = vst [vmem:[#allocation65_spill] sm:$0xff] %v6183_v49  ;;  %vm422_vm15 = vcmp.gt.s32.totalorder %v218_v41, 0 }
  0xb9   :  { %v6185_v9 = vadd.f32 %v1357_v42, %v1309_v27  ;;  %4112 = vmatmul.msk.bf16.gmra.mxu0 %vm4111_vm9, %v9977_v40  ;;  %v6205_v27 = vsel %vm422_vm15, %v218_v41, 0  ;;  %vm917_vm9 = vcmp.eq.s32.totalorder %v5181_v23, %v6069_v11  ;;  %vm4129_vm15 = vmpackc.low %vm924_vm7, %vm916_vm6  ;;  %vm931_vm6 = vcmp.eq.s32.totalorder %v5243_v46, %v6055_v54 }
  0xba   :  { %4128 = vmatmul.msk.bf16.gmra.mxu1 %vm4127_vm12, %v9977_v40  ;;  %10034 = vst [vmem:[#allocation67_spill] sm:$0xff] %v6205_v27  ;;  %vm4113_vm12 = vmpackc.low %vm923_vm4, %vm915_vm2  ;;  %vm939_vm7 = vcmp.eq.s32.totalorder %v5246_v52, %v6055_v54 }
  0xbb   :  { %4144 = vmatmul.msk.bf16.gmra.mxu2 %vm4143_vm13, %v9977_v40  ;;  %vm918_vm13 = vcmp.eq.s32.totalorder %v5181_v23, %v6076_v12  ;;  %v219_v23 = vld [vmem:[%s9729_s1 + $0x268] sm:$0xff] }
  0xbc   :  { %2203 = vperm.xlu0 %4355, %v6164_v51   ;;  %2191 = vperm.xlu2 %4354, %v6173_v19   ;;  %v6207_v19 = vsel %vm414_vm0, %v214_v62, 0  ;;  %v6237_v62 = vpop.permute.xlu2 %2020  ;;  %vm4145_vm0 = vmpackc.low %vm925_vm10, %vm917_vm9  ;;  %vm932_vm9 = vcmp.eq.s32.totalorder %v5243_v46, %v6060_v4  ;;  %vm940_vm10 = vcmp.eq.s32.totalorder %v5246_v52, %v6060_v4 }
  0xbd   :  { %2188 = vperm.xlu1 %4353, %v6178_v56   ;;  %4160 = vmatmul.msk.bf16.gmra.mxu3 %vm4159_vm14, %v9977_v40  ;;  %10035 = vst [vmem:[#allocation68_spill] sm:$0xff] %v6207_v19  ;;  %v221_v56 = vld [vmem:[%s9729_s1 + $0x278] sm:$0xff]  ;;  %vm926_vm14 = vcmp.eq.s32.totalorder %v5184_v26, %v6076_v12  ;;  %v220_v26 = vld [vmem:[%s9729_s1 + $0x270] sm:$0xff] }
  0xbe   :  { %v1311_v61 = vpop.f32.mrf.mxu2  ;;  %v1215_v0 = vpop.f32.mrf.mxu0  ;;  %vm428_vm5 = vcmp.gt.s32.totalorder %v221_v56, 0  ;;  %10039 = vst [vmem:[#allocation72_spill] sm:$0xff] %v6237_v62  ;;  %vm4161_vm1 = vmpackc.low %vm926_vm14, %vm918_vm13  ;;  %vm426_vm4 = vcmp.gt.s32.totalorder %v220_v26, 0  ;;  %vm941_vm13 = vcmp.eq.s32.totalorder %v5246_v52, %v6069_v11 }
  0xbf   :  { %v1312_v42 = vadd.f32 %v1311_v61, %v1263_v18  ;;  %v1264_v51 = vpop.f32.mrf.mxu1  ;;  %v217_v18 = vld [vmem:[%s9729_s1 + $0x258] sm:$0xff]  ;;  %v6226_v41 = vpop.permute.xlu0 %2005  ;;  %v6287_v62 = vsel %vm426_vm4, %v220_v26, 0 }
  0xc0   :  { %v1360_v36 = vpop.f32.mrf.mxu3  ;;  %v1265_v2 = vadd.f32 %v1264_v51, %v1215_v0  ;;  %v216_v51 = vld [vmem:[%s9729_s1 + $0x250] sm:$0xff]  ;;  %10038 = vst [vmem:[#allocation71_spill] sm:$0xff] %v6226_v41  ;;  %vm420_vm8 = vcmp.gt.s32.totalorder %v217_v18, 0  ;;  %v6247_v0 = vsel %vm428_vm5, %v221_v56, 0  ;;  %vm424_vm5 = vcmp.gt.s32.totalorder %v219_v23, 0 }
  0xc1   :  { %v6216_v59 = vadd.f32 %v1360_v36, %v1312_v42  ;;  %vm418_vm11 = vcmp.gt.s32.totalorder %v216_v51, 0  ;;  %10040 = vst [vmem:[#allocation73_spill] sm:$0xff] %v6247_v0  ;;  %v6289_v47 = vsel %vm424_vm5, %v219_v23, 0 }
  0xc2   :  { %v6261_v56 = vsel %vm418_vm11, %v216_v51, 0  ;;  %10046 = vst [vmem:[#allocation79_spill] sm:$0xff] %v6287_v62 }
  0xc3   :  { %10042 = vst [vmem:[#allocation75_spill] sm:$0xff] %v6261_v56 }
  0xc4   :  { %2212 = vperm.xlu0 %4355, %v6205_v27   ;;  %2200 = vperm.xlu2 %4354, %v6207_v19   ;;  %10047 = vst [vmem:[#allocation80_spill] sm:$0xff] %v6289_v47  ;;  %v6294_v30 = vpop.permute.xlu2 %2029 }
  0xc5   :  { %2197 = vperm.xlu1 %4353, %v6209_v20   ;;  %v6256_v20 = vsel %vm420_vm8, %v217_v18, 0  ;;  %10048 = vst [vmem:[#allocation81_spill] sm:$0xff] %v6294_v30 }
  0xc6   :  { %v1313_v34 = vpop.f32.mrf.mxu2  ;;  %v1218_v61 = vpop.f32.mrf.mxu0  ;;  %10041 = vst [vmem:[#allocation74_spill] sm:$0xff] %v6256_v20 }
  0xc7   :  { %v1314_v42 = vadd.f32 %v1313_v34, %v1265_v2  ;;  %v1267_v27 = vpop.f32.mrf.mxu1  ;;  %v224_v2 = vld [vmem:[%s9729_s1 + $0x290] sm:$0xff]  ;;  %v6283_v18 = vpop.permute.xlu0 %2014 }
  0xc8   :  { %v1362_v36 = vpop.f32.mrf.mxu3  ;;  %v1268_v19 = vadd.f32 %v1267_v27, %v1218_v61  ;;  %v6278_v27 = vpop.permute.xlu1 %2017  ;;  %vm434_vm2 = vcmp.gt.s32.totalorder %v224_v2, 0  ;;  %10044 = vst [vmem:[#allocation77_spill] sm:$0xff] %v6283_v18 }
  0xc9   :  { %v6266_v34 = vadd.f32 %v1362_v36, %v1314_v42  ;;  %4114 = vmatmul.msk.bf16.gmra.mxu0 %vm4113_vm12, %v9977_v40  ;;  %10043 = vst [vmem:[#allocation76_spill] sm:$0xff] %v6278_v27  ;;  %v6285_v42 = vsel %vm434_vm2, %v224_v2, 0  ;;  %vm933_vm12 = vcmp.eq.s32.totalorder %v5243_v46, %v6069_v11  ;;  %vm4131_vm2 = vmpackc.low %vm940_vm10, %vm932_vm9  ;;  %vm947_vm9 = vcmp.eq.s32.totalorder %v5305_v37, %v6055_v54 }
  0xca   :  { %4130 = vmatmul.msk.bf16.gmra.mxu1 %vm4129_vm15, %v9977_v40  ;;  %10045 = vst [vmem:[#allocation78_spill] sm:$0xff] %v6285_v42  ;;  %vm4115_vm15 = vmpackc.low %vm939_vm7, %vm931_vm6  ;;  %vm955_vm10 = vcmp.eq.s32.totalorder %v5308_v38, %v6055_v54 }
  0xcb   :  { %4146 = vmatmul.msk.bf16.gmra.mxu2 %vm4145_vm0, %v9977_v40  ;;  %vm934_vm0 = vcmp.eq.s32.totalorder %v5243_v46, %v6076_v12  ;;  %vm4147_vm4 = vmpackc.low %vm941_vm13, %vm933_vm12  ;;  %vm948_vm12 = vcmp.eq.s32.totalorder %v5305_v37, %v6060_v4  ;;  %vm956_vm13 = vcmp.eq.s32.totalorder %v5308_v38, %v6060_v4 }
  0xcc   :  { %2221 = vperm.xlu0 %4355, %v6247_v0   ;;  %2209 = vperm.xlu2 %4354, %v6256_v20  }
  0xcd   :  { %2206 = vperm.xlu1 %4353, %v6261_v56   ;;  %4162 = vmatmul.msk.bf16.gmra.mxu3 %vm4161_vm1, %v9977_v40  ;;  %v227_v56 = vld [vmem:[%s9729_s1 + $0x2a8] sm:$0xff]  ;;  %vm942_vm1 = vcmp.eq.s32.totalorder %v5246_v52, %v6076_v12  ;;  %v226_v52 = vld [vmem:[%s9729_s1 + $0x2a0] sm:$0xff] }
  0xce   :  { %v1316_v51 = vpop.f32.mrf.mxu2  ;;  %v1220_v61 = vpop.f32.mrf.mxu0  ;;  %vm440_vm8 = vcmp.gt.s32.totalorder %v227_v56, 0  ;;  %vm4163_vm5 = vmpackc.low %vm942_vm1, %vm934_vm0  ;;  %vm438_vm7 = vcmp.gt.s32.totalorder %v226_v52, 0  ;;  %vm957_vm0 = vcmp.eq.s32.totalorder %v5308_v38, %v6069_v11 }
  0xcf   :  { %v1317_v36 = vadd.f32 %v1316_v51, %v1268_v19  ;;  %v1269_v20 = vpop.f32.mrf.mxu1  ;;  %v223_v19 = vld [vmem:[%s9729_s1 + $0x288] sm:$0xff]  ;;  %v6325_v23 = vsel %vm440_vm8, %v227_v56, 0 }
  0xd0   :  { %v1365_v0 = vpop.f32.mrf.mxu3  ;;  %v1270_v27 = vadd.f32 %v1269_v20, %v1220_v61  ;;  %v222_v20 = vld [vmem:[%s9729_s1 + $0x280] sm:$0xff]  ;;  %vm432_vm11 = vcmp.gt.s32.totalorder %v223_v19, 0  ;;  %10050 = vst [vmem:[#allocation83_spill] sm:$0xff] %v6325_v23 }
  0xd1   :  { %v6296_v18 = vadd.f32 %v1365_v0, %v1317_v36  ;;  %v6315_v0 = vpop.permute.xlu1 %2026  ;;  %vm430_vm14 = vcmp.gt.s32.totalorder %v222_v20, 0 }
  0xd2   :  { %10049 = vst [vmem:[#allocation82_spill] sm:$0xff] %v6315_v0  ;;  %v6339_v56 = vsel %vm430_vm14, %v222_v20, 0  ;;  %v6361_v20 = vpop.permute.xlu2 %2038 }
  0xd3   :  { %10052 = vst [vmem:[#allocation85_spill] sm:$0xff] %v6339_v56 }
  0xd4   :  { %2230 = vperm.xlu0 %4355, %v6285_v42   ;;  %2218 = vperm.xlu2 %4354, %v6287_v62   ;;  %v6334_v42 = vsel %vm432_vm11, %v223_v19, 0  ;;  %v225_v19 = vld [vmem:[%s9729_s1 + $0x298] sm:$0xff]  ;;  %10054 = vst [vmem:[#allocation87_spill] sm:$0xff] %v6361_v20 }
  0xd5   :  { %2215 = vperm.xlu1 %4353, %v6289_v47   ;;  %10051 = vst [vmem:[#allocation84_spill] sm:$0xff] %v6334_v42  ;;  %vm436_vm8 = vcmp.gt.s32.totalorder %v225_v19, 0 }
  0xd6   :  { %v1318_v2 = vpop.f32.mrf.mxu2  ;;  %v1223_v26 = vpop.f32.mrf.mxu0  ;;  %v6370_v20 = vsel %vm436_vm8, %v225_v19, 0 }
  0xd7   :  { %v1319_v51 = vadd.f32 %v1318_v2, %v1270_v27  ;;  %v1272_v36 = vpop.f32.mrf.mxu1  ;;  %v230_v27 = vld [vmem:[%s9729_s1 + $0x2c0] sm:$0xff]  ;;  %v6344_v2 = vpop.permute.xlu0 %2023  ;;  %10057 = vst [vmem:[#allocation90_spill] sm:$0xff] %v6370_v20 }
  0xd8   :  { %v1367_v61 = vpop.f32.mrf.mxu3  ;;  %v1273_v47 = vadd.f32 %v1272_v36, %v1223_v26  ;;  %10053 = vst [vmem:[#allocation86_spill] sm:$0xff] %v6344_v2  ;;  %vm446_vm6 = vcmp.gt.s32.totalorder %v230_v27, 0 }
  0xd9   :  { %v6346_v62 = vadd.f32 %v1367_v61, %v1319_v51  ;;  %4116 = vmatmul.msk.bf16.gmra.mxu0 %vm4115_vm15, %v9977_v40  ;;  %v6366_v51 = vsel %vm446_vm6, %v230_v27, 0  ;;  %v6375_v30 = vpop.permute.xlu1 %2035  ;;  %vm949_vm15 = vcmp.eq.s32.totalorder %v5305_v37, %v6069_v11  ;;  %vm4133_vm6 = vmpackc.low %vm956_vm13, %vm948_vm12  ;;  %vm971_vm12 = vcmp.eq.s32.totalorder %v5383_v1, %v6055_v54 }
  0xda   :  { %4132 = vmatmul.msk.bf16.gmra.mxu1 %vm4131_vm2, %v9977_v40  ;;  %10055 = vst [vmem:[#allocation88_spill] sm:$0xff] %v6366_v51  ;;  %vm4117_vm2 = vmpackc.low %vm955_vm10, %vm947_vm9  ;;  %vm964_vm13 = vcmp.eq.s32.totalorder %v5372_v14, %v6060_v4 }
  0xdb   :  { %4148 = vmatmul.msk.bf16.gmra.mxu2 %vm4147_vm4, %v9977_v40  ;;  %10058 = vst [vmem:[#allocation91_spill] sm:$0xff] %v6375_v30  ;;  %vm950_vm4 = vcmp.eq.s32.totalorder %v5305_v37, %v6076_v12  ;;  %v231_v37 = vld [vmem:[%s9729_s1 + $0x2c8] sm:$0xff] }
  0xdc   :  { %2239 = vperm.xlu0 %4355, %v6325_v23   ;;  %2227 = vperm.xlu2 %4354, %v6334_v42   ;;  %v6368_v42 = vsel %vm438_vm7, %v226_v52, 0  ;;  %v6398_v52 = vpop.permute.xlu2 %2047  ;;  %vm4149_vm7 = vmpackc.low %vm957_vm0, %vm949_vm15  ;;  %vm448_vm10 = vcmp.gt.s32.totalorder %v231_v37, 0  ;;  %vm965_vm15 = vcmp.eq.s32.totalorder %v5372_v14, %v6069_v11  ;;  %vm973_vm0 = vcmp.eq.s32.totalorder %v5383_v1, %v6069_v11 }
  0xdd   :  { %2224 = vperm.xlu1 %4353, %v6339_v56   ;;  %4164 = vmatmul.msk.bf16.gmra.mxu3 %vm4163_vm5, %v9977_v40  ;;  %10056 = vst [vmem:[#allocation89_spill] sm:$0xff] %v6368_v42  ;;  %v233_v56 = vld [vmem:[%s9729_s1 + $0x2d8] sm:$0xff]  ;;  %vm958_vm5 = vcmp.eq.s32.totalorder %v5308_v38, %v6076_v12  ;;  %v232_v38 = vld [vmem:[%s9729_s1 + $0x2d0] sm:$0xff] }
  0xde   :  { %v1321_v46 = vpop.f32.mrf.mxu2  ;;  %v1225_v26 = vpop.f32.mrf.mxu0  ;;  %vm452_vm11 = vcmp.gt.s32.totalorder %v233_v56, 0  ;;  %10060 = vst [vmem:[#allocation93_spill] sm:$0xff] %v6398_v52  ;;  %vm4165_vm8 = vmpackc.low %vm958_vm5, %vm950_vm4  ;;  %vm450_vm9 = vcmp.gt.s32.totalorder %v232_v38, 0  ;;  %vm966_vm4 = vcmp.eq.s32.totalorder %v5372_v14, %v6076_v12  ;;  %vm974_vm5 = vcmp.eq.s32.totalorder %v5383_v1, %v6076_v12 }
  0xdf   :  { %v1322_v61 = vadd.f32 %v1321_v46, %v1273_v47  ;;  %v1274_v23 = vpop.f32.mrf.mxu1  ;;  %v229_v47 = vld [vmem:[%s9729_s1 + $0x2b8] sm:$0xff]  ;;  %v6387_v27 = vpop.permute.xlu0 %2032 }
  0xe0   :  { %v1370_v36 = vpop.f32.mrf.mxu3  ;;  %v1275_v0 = vadd.f32 %v1274_v23, %v1225_v26  ;;  %v228_v23 = vld [vmem:[%s9729_s1 + $0x2b0] sm:$0xff]  ;;  %10059 = vst [vmem:[#allocation92_spill] sm:$0xff] %v6387_v27  ;;  %vm444_vm14 = vcmp.gt.s32.totalorder %v229_v47, 0  ;;  %v6408_v26 = vsel %vm452_vm11, %v233_v56, 0  ;;  %vm963_vm11 = vcmp.eq.s32.totalorder %v5372_v14, %v6055_v54 }
  0xe1   :  { %v6377_v2 = vadd.f32 %v1370_v36, %v1322_v61  ;;  %vm442_vm1 = vcmp.gt.s32.totalorder %v228_v23, 0  ;;  %10061 = vst [vmem:[#allocation94_spill] sm:$0xff] %v6408_v26  ;;  %v6417_v52 = vsel %vm444_vm14, %v229_v47, 0  ;;  %vm972_vm14 = vcmp.eq.s32.totalorder %v5383_v1, %v6060_v4 }
  0xe2   :  { %10062 = vst [vmem:[#allocation95_spill] sm:$0xff] %v6417_v52  ;;  %v6422_v56 = vsel %vm442_vm1, %v228_v23, 0 }
  0xe3   :  { %10063 = vst [vmem:[#allocation96_spill] sm:$0xff] %v6422_v56 }
  0xe4   :  { %2248 = vperm.xlu0 %4355, %v6366_v51   ;;  %2236 = vperm.xlu2 %4354, %v6368_v42  }
  0xe5   :  { %2233 = vperm.xlu1 %4353, %v6370_v20  }
  0xe6   :  { %v1323_v19 = vpop.f32.mrf.mxu2  ;;  %v1228_v46 = vpop.f32.mrf.mxu0 }
  0xe7   :  { %v1324_v61 = vadd.f32 %v1323_v19, %v1275_v0  ;;  %v1277_v51 = vpop.f32.mrf.mxu1  ;;  %v6441_v47 = vpop.permute.xlu0 %2041 }
  0xe8   :  { %v1372_v36 = vpop.f32.mrf.mxu3  ;;  %v1278_v20 = vadd.f32 %v1277_v51, %v1228_v46  ;;  %v6436_v51 = vpop.permute.xlu1 %2044  ;;  %10065 = vst [vmem:[#allocation98_spill] sm:$0xff] %v6441_v47  ;;  %v234_v47 = vld [vmem:[%s9729_s1 + $0x2e0] sm:$0xff] }
  0xe9   :  { %v6424_v0 = vadd.f32 %v1372_v36, %v1324_v61  ;;  %4118 = vmatmul.msk.bf16.gmra.mxu0 %vm4117_vm2, %v9977_v40  ;;  %10064 = vst [vmem:[#allocation97_spill] sm:$0xff] %v6436_v51  ;;  %v6449_v51 = vsel %vm448_vm10, %v231_v37, 0  ;;  %vm454_vm1 = vcmp.gt.s32.totalorder %v234_v47, 0  ;;  %vm4119_vm2 = vmpackc.low %vm971_vm12, %vm963_vm11  ;;  %vm987_vm10 = vcmp.eq.s32.totalorder %v5658_v58, %v6055_v54 }
  0xea   :  { %4134 = vmatmul.msk.bf16.gmra.mxu1 %vm4133_vm6, %v9977_v40  ;;  %10067 = vst [vmem:[#allocation100_spill] sm:$0xff] %v6449_v51  ;;  %vm4135_vm6 = vmpackc.low %vm972_vm14, %vm964_vm13  ;;  %vm980_vm11 = vcmp.eq.s32.totalorder %v5655_v45, %v6060_v4  ;;  %vm988_vm12 = vcmp.eq.s32.totalorder %v5658_v58, %v6060_v4  ;;  %vm981_vm13 = vcmp.eq.s32.totalorder %v5655_v45, %v6069_v11 }
  0xeb   :  { %4150 = vmatmul.msk.bf16.gmra.mxu2 %vm4149_vm7, %v9977_v40  ;;  %vm4151_vm7 = vmpackc.low %vm973_vm0, %vm965_vm15  ;;  %vm989_vm14 = vcmp.eq.s32.totalorder %v5658_v58, %v6069_v11  ;;  %vm982_vm0 = vcmp.eq.s32.totalorder %v5655_v45, %v6076_v12 }
  0xec   :  { %2257 = vperm.xlu0 %4355, %v6408_v26   ;;  %2245 = vperm.xlu2 %4354, %v6417_v52   ;;  %v6447_v26 = vsel %vm450_vm9, %v232_v38, 0  ;;  %v6451_v52 = vpop.permute.xlu2 %2056  ;;  %vm979_vm9 = vcmp.eq.s32.totalorder %v5655_v45, %v6055_v54 }
  0xed   :  { %2242 = vperm.xlu1 %4353, %v6422_v56   ;;  %4166 = vmatmul.msk.bf16.gmra.mxu3 %vm4165_vm8, %v9977_v40  ;;  %10066 = vst [vmem:[#allocation99_spill] sm:$0xff] %v6447_v26  ;;  %vm4167_vm8 = vmpackc.low %vm974_vm5, %vm966_vm4 }
  0xee   :  { %v1326_v23 = vpop.f32.mrf.mxu2  ;;  %v6443_v19 = vpop.f32.mrf.mxu0  ;;  %10068 = vst [vmem:[#allocation101_spill] sm:$0xff] %v6451_v52  ;;  %v6482_v52 = vsel %vm454_vm1, %v234_v47, 0  ;;  %vm4121_vm15 = vmpackc.low %vm987_vm10, %vm979_vm9  ;;  %vm990_vm1 = vcmp.eq.s32.totalorder %v5658_v58, %v6076_v12  ;;  %vm1004_vm9 = vcmp.eq.s32.totalorder %v5960_v29, %v6060_v4  ;;  %vm997_vm10 = vcmp.eq.s32.totalorder %v5957_v55, %v6069_v11 }
  0xef   :  { %v1327_v46 = vadd.f32 %v1326_v23, %v1278_v20  ;;  %v6445_v36 = vpop.f32.mrf.mxu1  ;;  %10070 = vst [vmem:[#allocation103_spill] sm:$0xff] %v6482_v52  ;;  %vm4153_vm4 = vmpackc.low %vm989_vm14, %vm981_vm13  ;;  %vm998_vm13 = vcmp.eq.s32.totalorder %v5957_v55, %v6076_v12  ;;  %vm1006_vm14 = vcmp.eq.s32.totalorder %v5960_v29, %v6076_v12 }
  0xf0   :  { %v1375_v61 = vpop.f32.mrf.mxu3  ;;  %v6468_v20 = vpop.permute.xlu1 %2053  ;;  %vm4169_vm5 = vmpackc.low %vm990_vm1, %vm982_vm0 }
  0xf1   :  { %v6453_v56 = vadd.f32 %v1375_v61, %v1327_v46  ;;  %10069 = vst [vmem:[#allocation102_spill] sm:$0xff] %v6468_v20  ;;  %v6484_v20 = vpop.permute.xlu0 %2050  ;;  %vm4171_vm1 = vmpackc.low %vm1006_vm14, %vm998_vm13 }
  0xf2   :  { %10071 = vst [vmem:[#allocation104_spill] sm:$0xff] %v6484_v20 }
  0xf4   :  { %2254 = vperm.xlu2 %4354, %v6447_v26  }
  0xf5   :  { %2251 = vperm.xlu1 %4353, %v6449_v51   ;;  %v6488_v51 = vpop.permute.xlu2 %2065 }
  0xf6   :  { %v6474_v38 = vpop.f32.mrf.mxu2  ;;  %v1233_v37 = vpop.f32.mrf.mxu0  ;;  %10072 = vst [vmem:[#allocation105_spill] sm:$0xff] %v6488_v51 }
  0xf7   :  { %v1282_v46 = vpop.f32.mrf.mxu1 }
  0xf8   :  { %v6480_v23 = vpop.f32.mrf.mxu3  ;;  %v1283_v61 = vadd.f32 %v1282_v46, %v1233_v37  ;;  %v6497_v20 = vpop.permute.xlu1 %2062 }
  0xf9   :  { %4120 = vmatmul.msk.bf16.gmra.mxu0 %vm4119_vm2, %v9977_v40  ;;  %10073 = vst [vmem:[#allocation106_spill] sm:$0xff] %v6497_v20  ;;  %v6501_v42 = vpop.permute.xlu0 %2059  ;;  %vm4137_vm2 = vmpackc.low %vm988_vm12, %vm980_vm11  ;;  %vm1005_vm11 = vcmp.eq.s32.totalorder %v5960_v29, %v6069_v11 }
  0xfa   :  { %4136 = vmatmul.msk.bf16.gmra.mxu1 %vm4135_vm6, %v9977_v40  ;;  %10074 = vst [vmem:[#allocation107_spill] sm:$0xff] %v6501_v42  ;;  %vm995_vm6 = vcmp.eq.s32.totalorder %v5957_v55, %v6055_v54  ;;  %vm4155_vm0 = vmpackc.low %vm1005_vm11, %vm997_vm10 }
  0xfb   :  { %4152 = vmatmul.msk.bf16.gmra.mxu2 %vm4151_vm7, %v9977_v40  ;;  %vm1003_vm7 = vcmp.eq.s32.totalorder %v5960_v29, %v6055_v54 }
  0xfc   :  { %vm4123_vm12 = vmpackc.low %vm1003_vm7, %vm995_vm6 }
  0xfd   :  { %2260 = vperm.xlu1 %4353, %v6482_v52   ;;  %4168 = vmatmul.msk.bf16.gmra.mxu3 %vm4167_vm8, %v9977_v40  ;;  %vm996_vm8 = vcmp.eq.s32.totalorder %v5957_v55, %v6060_v4 }
  0xfe   :  { %v1331_v1 = vpop.f32.mrf.mxu2  ;;  %v6493_v14 = vpop.f32.mrf.mxu0 }
  0xff   :  { %v1332_v47 = vadd.f32 %v1331_v1, %v1283_v61  ;;  %v6495_v46 = vpop.f32.mrf.mxu1  ;;  %v6511_v61 = vpop.permute.xlu2 %2074 }
 0x100   :  { %v1380_v37 = vpop.f32.mrf.mxu3  ;;  %10075 = vst [vmem:[#allocation108_spill] sm:$0xff] %v6511_v61  ;;  %v6527_v51 = vpop.permute.xlu1 %2071 }
 0x101   :  { %v6499_v26 = vadd.f32 %v1380_v37, %v1332_v47  ;;  %10076 = vst [vmem:[#allocation109_spill] sm:$0xff] %v6527_v51  ;;  %v6531_v45 = vpop.permute.xlu0 %2068 }
 0x102   :  { %10077 = vst [vmem:[#allocation110_spill] sm:$0xff] %v6531_v45 }
 0x106   :  { %v6517_v1 = vpop.f32.mrf.mxu2  ;;  %v1238_v47 = vpop.f32.mrf.mxu0 }
 0x107   :  { %v1287_v20 = vpop.f32.mrf.mxu1 }
 0x108   :  { %v6523_v37 = vpop.f32.mrf.mxu3  ;;  %v1288_v61 = vadd.f32 %v1287_v20, %v1238_v47  ;;  %v6537_v47 = vpop.permute.xlu2 %2083 }
 0x109   :  { %4122 = vmatmul.msk.bf16.gmra.mxu0 %vm4121_vm15, %v9977_v40  ;;  %10078 = vst [vmem:[#allocation111_spill] sm:$0xff] %v6537_v47  ;;  %vm4139_vm15 = vmpackc.low %vm1004_vm9, %vm996_vm8 }
 0x10a   :  { %4138 = vmatmul.msk.bf16.gmra.mxu1 %vm4137_vm2, %v9977_v40 }
 0x10b   :  { %4154 = vmatmul.msk.bf16.gmra.mxu2 %vm4153_vm4, %v9977_v40 }
 0x10d   :  { %4170 = vmatmul.msk.bf16.gmra.mxu3 %vm4169_vm5, %v9977_v40 }
 0x10e   :  { %v1336_v58 = vpop.f32.mrf.mxu2  ;;  %v6533_v42 = vpop.f32.mrf.mxu0 }
 0x10f   :  { %v1337_v52 = vadd.f32 %v1336_v58, %v1288_v61  ;;  %v6535_v20 = vpop.f32.mrf.mxu1  ;;  %v4525_v61 = vmov 3   ;;  %v6549_v58 = vpop.permute.xlu1 %2080 }
 0x110   :  { %v1385_v30 = vpop.f32.mrf.mxu3  ;;  %4356 = vset.pattern.permute.xlu0 %v4525_v61  ;;  %4357 = vset.pattern.permute.xlu1 %v4525_v61  ;;  %10079 = vst [vmem:[#allocation112_spill] sm:$0xff] %v6549_v58  ;;  %v6573_v12 = vpop.permute.xlu2 %2092 }
 0x111   :  { %v6539_v27 = vadd.f32 %v1385_v30, %v1337_v52  ;;  %4358 = vset.pattern.permute.xlu2 %v4525_v61  ;;  %v6569_v61 = vpop.permute.xlu0 %2077  ;;  %10081 = vst [vmem:[#allocation114_spill] sm:$0xff] %v6573_v12 }
 0x112   :  { %10080 = vst [vmem:[#allocation113_spill] sm:$0xff] %v6569_v61 }
 0x116   :  { %v6555_v30 = vpop.f32.mrf.mxu2  ;;  %v1243_v54 = vpop.f32.mrf.mxu0 }
 0x117   :  { %v1292_v51 = vpop.f32.mrf.mxu1 }
 0x118   :  { %v6561_v52 = vpop.f32.mrf.mxu3  ;;  %v1293_v11 = vadd.f32 %v1292_v51, %v1243_v54  ;;  %v6581_v54 = vpop.permute.xlu1 %2089 }
 0x119   :  { %4124 = vmatmul.msk.bf16.gmra.mxu0 %vm4123_vm12, %v9977_v40  ;;  %10082 = vst [vmem:[#allocation115_spill] sm:$0xff] %v6581_v54  ;;  %v6585_v63 = vpop.permute.xlu0 %2086  ;;  %v6587_v28 = vpop.permute.xlu2 %2101 }
 0x11a   :  { %4140 = vmatmul.msk.bf16.gmra.mxu1 %vm4139_vm15, %v9977_v40  ;;  %10083 = vst [vmem:[#allocation116_spill] sm:$0xff] %v6585_v63 }
 0x11b   :  { %4156 = vmatmul.msk.bf16.gmra.mxu2 %vm4155_vm0, %v9977_v40  ;;  %10084 = vst [vmem:[#allocation117_spill] sm:$0xff] %v6587_v28 }
 0x11d   :  { %4172 = vmatmul.msk.bf16.gmra.mxu3 %vm4171_vm1, %v9977_v40 }
 0x11e   :  { %v1341_v55 = vpop.f32.mrf.mxu2  ;;  %v6577_v45 = vpop.f32.mrf.mxu0 }
 0x11f   :  { %v1342_v29 = vadd.f32 %v1341_v55, %v1293_v11  ;;  %v6579_v51 = vpop.f32.mrf.mxu1 }
 0x120   :  { %v1390_v4 = vpop.f32.mrf.mxu3  ;;  %v6594_v11 = vpop.permute.xlu1 %2098 }
 0x121   :  { %v6583_v61 = vadd.f32 %v1390_v4, %v1342_v29  ;;  %10085 = vst [vmem:[#allocation118_spill] sm:$0xff] %v6594_v11  ;;  %v6596_v55 = vpop.permute.xlu0 %2095  ;;  %v6598_v49 = vpop.permute.xlu2 %2110 }
 0x122   :  { %10086 = vst [vmem:[#allocation119_spill] sm:$0xff] %v6596_v55 }
 0x123   :  { %10087 = vst [vmem:[#allocation120_spill] sm:$0xff] %v6598_v49 }
 0x126   :  { %v6589_v17 = vpop.f32.mrf.mxu2  ;;  %v1404_v41 = vpop.f32.mrf.mxu0 }
 0x127   :  { %v1453_v12 = vpop.f32.mrf.mxu1  ;;  %v1405_v50 = vadd.f32 %v1404_v41, %v6135_v10 }
 0x128   :  { %v6591_v48 = vpop.f32.mrf.mxu3  ;;  %v6604_v47 = vpop.permute.xlu1 %2107 }
 0x129   :  { %v1454_v13 = vadd.f32 %v1453_v12, %v1405_v50  ;;  %10089 = vst [vmem:[#allocation122_spill] sm:$0xff] %v6604_v47 }
 0x12e   :  { %v1502_v54 = vpop.f32.mrf.mxu2  ;;  %v1406_v29 = vpop.f32.mrf.mxu0 }
 0x12f   :  { %v1503_v4 = vadd.f32 %v1502_v54, %v1454_v13  ;;  %v1455_v63 = vpop.f32.mrf.mxu1  ;;  %v1407_v40 = vadd.f32 %v1406_v29, %v6185_v9  ;;  %v6606_v13 = vpop.permute.xlu0 %2104 }
 0x130   :  { %v1551_v33 = vpop.f32.mrf.mxu3  ;;  %10090 = vst [vmem:[#allocation123_spill] sm:$0xff] %v6606_v13 }
 0x131   :  { %v6600_v28 = vadd.f32 %v1551_v33, %v1503_v4  ;;  %v1456_v10 = vadd.f32 %v1455_v63, %v1407_v40  ;;  %v6611_v4 = vpop.permute.xlu2 %2119 }
 0x132   :  { %10092 = vst [vmem:[#allocation125_spill] sm:$0xff] %v6611_v4 }
 0x133   :  { %10088 = vst [vmem:[#allocation121_spill] sm:$0xff] %v6600_v28  ;;  %v1623_v58 = vmax.f32 %v6600_v28, 1.0 }
 0x135   :  { %1641 = vperm.xlu0 %4356, %v1623_v58  }
 0x136   :  { %v1504_v41 = vpop.f32.mrf.mxu2  ;;  %v1409_v11 = vpop.f32.mrf.mxu0 }
 0x137   :  { %v1505_v50 = vadd.f32 %v1504_v41, %v1456_v10  ;;  %v1458_v55 = vpop.f32.mrf.mxu1  ;;  %v1410_v33 = vadd.f32 %v1409_v11, %v6216_v59  ;;  %v6614_v10 = vpop.permute.xlu1 %2116 }
 0x138   :  { %v1553_v12 = vpop.f32.mrf.mxu3  ;;  %10093 = vst [vmem:[#allocation126_spill] sm:$0xff] %v6614_v10 }
 0x139   :  { %v6608_v54 = vadd.f32 %v1553_v12, %v1505_v50  ;;  %v1459_v29 = vadd.f32 %v1458_v55, %v1410_v33  ;;  %v6619_v12 = vpop.permute.xlu0 %2113  ;;  %v6622_v11 = vpop.permute.xlu2 %2128 }
 0x13a   :  { %10095 = vst [vmem:[#allocation128_spill] sm:$0xff] %v6619_v12 }
 0x13b   :  { %10091 = vst [vmem:[#allocation124_spill] sm:$0xff] %v6608_v54  ;;  %v1624_v9 = vmax.f32 %v6608_v54, 1.0 }
 0x13c   :  { %10096 = vst [vmem:[#allocation129_spill] sm:$0xff] %v6622_v11 }
 0x13d   :  { %1646 = vperm.xlu0 %4356, %v1624_v9  }
 0x13e   :  { %v1507_v49 = vpop.f32.mrf.mxu2  ;;  %v1411_v40 = vpop.f32.mrf.mxu0 }
 0x13f   :  { %v1508_v63 = vadd.f32 %v1507_v49, %v1459_v29  ;;  %v1460_v47 = vpop.f32.mrf.mxu1  ;;  %v1412_v50 = vadd.f32 %v1411_v40, %v6266_v34 }
 0x140   :  { %v1556_v58 = vpop.f32.mrf.mxu3 }
 0x141   :  { %v6616_v41 = vadd.f32 %v1556_v58, %v1508_v63  ;;  %v1461_v4 = vadd.f32 %v1460_v47, %v1412_v50  ;;  %v6627_v58 = vpop.permute.xlu1 %2125  ;;  %v6630_v40 = vpop.permute.xlu0 %2122 }
 0x142   :  { %10098 = vst [vmem:[#allocation131_spill] sm:$0xff] %v6627_v58 }
 0x143   :  { %10094 = vst [vmem:[#allocation127_spill] sm:$0xff] %v6616_v41  ;;  %v1625_v59 = vmax.f32 %v6616_v41, 1.0 }
 0x144   :  { %10099 = vst [vmem:[#allocation132_spill] sm:$0xff] %v6630_v40 }
 0x145   :  { %1651 = vperm.xlu1 %4357, %v1625_v59  }
 0x146   :  { %v1509_v55 = vpop.f32.mrf.mxu2  ;;  %v1414_v33 = vpop.f32.mrf.mxu0 }
 0x147   :  { %v1510_v9 = vadd.f32 %v1509_v55, %v1461_v4  ;;  %v1463_v29 = vpop.f32.mrf.mxu1  ;;  %v1415_v63 = vadd.f32 %v1414_v33, %v6296_v18  ;;  %v6632_v4 = vpop.permute.xlu2 %2137 }
 0x148   :  { %v1558_v49 = vpop.f32.mrf.mxu3  ;;  %10100 = vst [vmem:[#allocation133_spill] sm:$0xff] %v6632_v4 }
 0x149   :  { %v6624_v13 = vadd.f32 %v1558_v49, %v1510_v9  ;;  %v1464_v10 = vadd.f32 %v1463_v29, %v1415_v63  ;;  %v6638_v33 = vpop.permute.xlu1 %2134 }
 0x14a   :  { %10102 = vst [vmem:[#allocation135_spill] sm:$0xff] %v6638_v33 }
 0x14b   :  { %10097 = vst [vmem:[#allocation130_spill] sm:$0xff] %v6624_v13  ;;  %v1626_v34 = vmax.f32 %v6624_v13, 1.0 }
 0x14d   :  { %1656 = vperm.xlu1 %4357, %v1626_v34  }
 0x14e   :  { %v1512_v11 = vpop.f32.mrf.mxu2  ;;  %v1416_v47 = vpop.f32.mrf.mxu0 }
 0x14f   :  { %v1513_v50 = vadd.f32 %v1512_v11, %v1464_v10  ;;  %v1465_v12 = vpop.f32.mrf.mxu1  ;;  %v1417_v9 = vadd.f32 %v1416_v47, %v6346_v62  ;;  %v6640_v10 = vpop.permute.xlu0 %2131 }
 0x150   :  { %v1561_v59 = vpop.f32.mrf.mxu3  ;;  %10103 = vst [vmem:[#allocation136_spill] sm:$0xff] %v6640_v10  ;;  %v250_v10 = vld [vmem:[%s9729_s1 + $0x360] sm:$0xff] }
 0x151   :  { %v6634_v55 = vadd.f32 %v1561_v59, %v1513_v50  ;;  %v1466_v49 = vadd.f32 %v1465_v12, %v1417_v9  ;;  %v6645_v59 = vpop.permute.xlu2 %2146 }
 0x152   :  { %10105 = vst [vmem:[#allocation138_spill] sm:$0xff] %v6645_v59 }
 0x153   :  { %10101 = vst [vmem:[#allocation134_spill] sm:$0xff] %v6634_v55  ;;  %v1627_v18 = vmax.f32 %v6634_v55, 1.0 }
 0x155   :  { %1661 = vperm.xlu2 %4358, %v1627_v18  }
 0x156   :  { %v1514_v58 = vpop.f32.mrf.mxu2  ;;  %v1419_v29 = vpop.f32.mrf.mxu0 }
 0x157   :  { %v1515_v63 = vadd.f32 %v1514_v58, %v1466_v49  ;;  %v1468_v40 = vpop.f32.mrf.mxu1  ;;  %v1420_v50 = vadd.f32 %v1419_v29, %v6377_v2  ;;  %v6648_v58 = vpop.permute.xlu1 %2143 }
 0x158   :  { %v1563_v34 = vpop.f32.mrf.mxu3  ;;  %10106 = vst [vmem:[#allocation139_spill] sm:$0xff] %v6648_v58  ;;  %v1280_v58 = vadd.f32 %v6445_v36, %v6443_v19 }
 0x159   :  { %v6642_v11 = vadd.f32 %v1563_v34, %v1515_v63  ;;  %v1469_v47 = vadd.f32 %v1468_v40, %v1420_v50  ;;  %v6653_v34 = vpop.permute.xlu0 %2140  ;;  %v6656_v29 = vpop.permute.xlu2 %2155 }
 0x15a   :  { %10108 = vst [vmem:[#allocation141_spill] sm:$0xff] %v6653_v34 }
 0x15b   :  { %10104 = vst [vmem:[#allocation137_spill] sm:$0xff] %v6642_v11  ;;  %v1628_v62 = vmax.f32 %v6642_v11, 1.0 }
 0x15c   :  { %10109 = vst [vmem:[#allocation142_spill] sm:$0xff] %v6656_v29 }
 0x15d   :  { %1666 = vperm.xlu2 %4358, %v1628_v62  }
 0x15e   :  { %v1517_v4 = vpop.f32.mrf.mxu2  ;;  %v1421_v12 = vpop.f32.mrf.mxu0 }
 0x15f   :  { %v1518_v9 = vadd.f32 %v1517_v4, %v1469_v47  ;;  %v1470_v33 = vpop.f32.mrf.mxu1  ;;  %v1422_v63 = vadd.f32 %v1421_v12, %v6424_v0  ;;  %v1329_v12 = vadd.f32 %v6474_v38, %v1280_v58 }
 0x160   :  { %v1566_v18 = vpop.f32.mrf.mxu3 }
 0x161   :  { %v6650_v49 = vadd.f32 %v1566_v18, %v1518_v9  ;;  %v1471_v59 = vadd.f32 %v1470_v33, %v1422_v63  ;;  %v6664_v18 = vpop.permute.xlu1 %2152  ;;  %v6667_v33 = vpop.permute.xlu0 %2149 }
 0x162   :  { %10111 = vst [vmem:[#allocation144_spill] sm:$0xff] %v6664_v18 }
 0x163   :  { %10107 = vst [vmem:[#allocation140_spill] sm:$0xff] %v6650_v49  ;;  %v1629_v2 = vmax.f32 %v6650_v49, 1.0 }
 0x164   :  { %10112 = vst [vmem:[#allocation145_spill] sm:$0xff] %v6667_v33 }
 0x165   :  { %1671 = vperm.xlu0 %4356, %v1629_v2  }
 0x166   :  { %v1519_v40 = vpop.f32.mrf.mxu2  ;;  %v1424_v50 = vpop.f32.mrf.mxu0 }
 0x167   :  { %v1520_v62 = vadd.f32 %v1519_v40, %v1471_v59  ;;  %v1473_v47 = vpop.f32.mrf.mxu1  ;;  %v1425_v0 = vadd.f32 %v1424_v50, %v6453_v56  ;;  %v1378_v40 = vadd.f32 %v6480_v23, %v1329_v12  ;;  %v1285_v23 = vadd.f32 %v6495_v46, %v6493_v14 }
 0x168   :  { %v1568_v4 = vpop.f32.mrf.mxu3 }
 0x169   :  { %v6660_v9 = vadd.f32 %v1568_v4, %v1520_v62  ;;  %v1474_v63 = vadd.f32 %v1473_v47, %v1425_v0  ;;  %v6670_v62 = vpop.permute.xlu2 %2164  ;;  %v6675_v50 = vpop.permute.xlu1 %2161 }
 0x16a   :  { %10113 = vst [vmem:[#allocation146_spill] sm:$0xff] %v6670_v62  ;;  %v6679_v12 = vpop.permute.xlu0 %2158  ;;  %v241_v62 = vld [vmem:[%s9729_s1 + $0x318] sm:$0xff] }
 0x16b   :  { %10110 = vst [vmem:[#allocation143_spill] sm:$0xff] %v6660_v9  ;;  %v1630_v29 = vmax.f32 %v6660_v9, 1.0  ;;  %vm468_vm9 = vcmp.gt.s32.totalorder %v241_v62, 0 }
 0x16c   :  { %10115 = vst [vmem:[#allocation148_spill] sm:$0xff] %v6675_v50  ;;  %v6801_v50 = vsel %vm468_vm9, %v241_v62, 0  ;;  %v242_v62 = vld [vmem:[%s9729_s1 + $0x320] sm:$0xff] }
 0x16d   :  { %1676 = vperm.xlu1 %4357, %v1630_v29   ;;  %10116 = vst [vmem:[#allocation149_spill] sm:$0xff] %v6679_v12  ;;  %v246_v12 = vld [vmem:[%s9729_s1 + $0x340] sm:$0xff]  ;;  %vm470_vm14 = vcmp.gt.s32.totalorder %v242_v62, 0 }
 0x16e   :  { %v1522_v59 = vpop.f32.mrf.mxu2  ;;  %v1426_v2 = vpop.f32.mrf.mxu0  ;;  %vm478_vm10 = vcmp.gt.s32.totalorder %v246_v12, 0  ;;  %10145 = vst [vmem:[#allocation177_spill] sm:$0xff] %v6801_v50 }
 0x16f   :  { %v1523_v34 = vadd.f32 %v1522_v59, %v1474_v63  ;;  %v1475_v36 = vpop.f32.mrf.mxu1  ;;  %v1427_v38 = vadd.f32 %v1426_v2, %v1378_v40  ;;  %v1334_v59 = vadd.f32 %v6517_v1, %v1285_v23 }
 0x170   :  { %v1571_v19 = vpop.f32.mrf.mxu3 }
 0x171   :  { %v6672_v56 = vadd.f32 %v1571_v19, %v1523_v34  ;;  %v1476_v4 = vadd.f32 %v1475_v36, %v1427_v38  ;;  %v6685_v2 = vpop.permute.xlu2 %2173 }
 0x172   :  { %10118 = vst [vmem:[#allocation151_spill] sm:$0xff] %v6685_v2 }
 0x173   :  { %10114 = vst [vmem:[#allocation147_spill] sm:$0xff] %v6672_v56  ;;  %v1631_v58 = vmax.f32 %v6672_v56, 1.0 }
 0x175   :  { %1681 = vperm.xlu2 %4358, %v1631_v58   ;;  %v1383_v58 = vadd.f32 %v6523_v37, %v1334_v59 }
 0x176   :  { %v1524_v47 = vpop.f32.mrf.mxu2  ;;  %v1429_v29 = vpop.f32.mrf.mxu0 }
 0x177   :  { %v1525_v0 = vadd.f32 %v1524_v47, %v1476_v4  ;;  %v1478_v33 = vpop.f32.mrf.mxu1  ;;  %v1430_v34 = vadd.f32 %v1429_v29, %v6499_v26  ;;  %v6689_v47 = vpop.permute.xlu1 %2170 }
 0x178   :  { %v1573_v18 = vpop.f32.mrf.mxu3  ;;  %10119 = vst [vmem:[#allocation152_spill] sm:$0xff] %v6689_v47  ;;  %v6693_v29 = vpop.permute.xlu0 %2167 }
 0x179   :  { %v6681_v63 = vadd.f32 %v1573_v18, %v1525_v0  ;;  %v1479_v19 = vadd.f32 %v1478_v33, %v1430_v34  ;;  %10120 = vst [vmem:[#allocation153_spill] sm:$0xff] %v6693_v29  ;;  %v6696_v0 = vpop.permute.xlu2 %2182 }
 0x17a   :  { %10121 = vst [vmem:[#allocation154_spill] sm:$0xff] %v6696_v0 }
 0x17b   :  { %10117 = vst [vmem:[#allocation150_spill] sm:$0xff] %v6681_v63  ;;  %v1632_v40 = vmax.f32 %v6681_v63, 1.0 }
 0x17d   :  { %1686 = vperm.xlu0 %4356, %v1632_v40  }
 0x17e   :  { %v1527_v36 = vpop.f32.mrf.mxu2  ;;  %v1431_v38 = vpop.f32.mrf.mxu0 }
 0x17f   :  { %v1528_v4 = vadd.f32 %v1527_v36, %v1479_v19  ;;  %v1480_v46 = vpop.f32.mrf.mxu1  ;;  %v1432_v26 = vadd.f32 %v1431_v38, %v1383_v58  ;;  %v1290_v19 = vadd.f32 %v6535_v20, %v6533_v42 }
 0x180   :  { %v1576_v14 = vpop.f32.mrf.mxu3 }
 0x181   :  { %v6691_v18 = vadd.f32 %v1576_v14, %v1528_v4  ;;  %v1481_v33 = vadd.f32 %v1480_v46, %v1432_v26  ;;  %v1339_v58 = vadd.f32 %v6555_v30, %v1290_v19  ;;  %v6704_v4 = vpop.permute.xlu1 %2179  ;;  %v6707_v46 = vpop.permute.xlu0 %2176 }
 0x182   :  { %10123 = vst [vmem:[#allocation156_spill] sm:$0xff] %v6704_v4  ;;  %v6710_v2 = vpop.permute.xlu2 %2191 }
 0x183   :  { %v1633_v1 = vmax.f32 %v6691_v18, 1.0  ;;  %10124 = vst [vmem:[#allocation157_spill] sm:$0xff] %v6707_v46 }
 0x184   :  { %10125 = vst [vmem:[#allocation158_spill] sm:$0xff] %v6710_v2 }
 0x185   :  { %1691 = vperm.xlu1 %4357, %v1633_v1  }
 0x186   :  { %v1529_v23 = vpop.f32.mrf.mxu2  ;;  %v1434_v34 = vpop.f32.mrf.mxu0 }
 0x187   :  { %v1530_v40 = vadd.f32 %v1529_v23, %v1481_v33  ;;  %v1483_v59 = vpop.f32.mrf.mxu1  ;;  %v1435_v38 = vadd.f32 %v1434_v34, %v6539_v27  ;;  %v1388_v23 = vadd.f32 %v6561_v52, %v1339_v58  ;;  %v1295_v52 = vadd.f32 %v6579_v51, %v6577_v45 }
 0x188   :  { %v1578_v37 = vpop.f32.mrf.mxu3 }
 0x189   :  { %v6700_v36 = vadd.f32 %v1578_v37, %v1530_v40  ;;  %v1484_v26 = vadd.f32 %v1483_v59, %v1435_v38  ;;  %v6715_v37 = vpop.permute.xlu1 %2188  ;;  %v6719_v58 = vpop.permute.xlu0 %2185 }
 0x18a   :  { %10126 = vst [vmem:[#allocation159_spill] sm:$0xff] %v6715_v37 }
 0x18b   :  { %10122 = vst [vmem:[#allocation155_spill] sm:$0xff] %v6700_v36  ;;  %v1634_v14 = vmax.f32 %v6700_v36, 1.0 }
 0x18c   :  { %10127 = vst [vmem:[#allocation160_spill] sm:$0xff] %v6719_v58 }
 0x18d   :  { %1696 = vperm.xlu2 %4358, %v1634_v14  }
 0x18e   :  { %v1532_v1 = vpop.f32.mrf.mxu2  ;;  %v1436_v33 = vpop.f32.mrf.mxu0 }
 0x18f   :  { %v1533_v42 = vadd.f32 %v1532_v1, %v1484_v26  ;;  %v1485_v40 = vpop.f32.mrf.mxu1  ;;  %v1437_v30 = vadd.f32 %v1436_v33, %v1388_v23  ;;  %v6721_v26 = vpop.permute.xlu2 %2200 }
 0x190   :  { %v1581_v20 = vpop.f32.mrf.mxu3  ;;  %10128 = vst [vmem:[#allocation161_spill] sm:$0xff] %v6721_v26 }
 0x191   :  { %v6712_v27 = vadd.f32 %v1581_v20, %v1533_v42  ;;  %v1486_v19 = vadd.f32 %v1485_v40, %v1437_v30  ;;  %v1344_v42 = vadd.f32 %v6589_v17, %v1295_v52  ;;  %v237_v30 = vld [vmem:[%s9729_s1 + $0x2f8] sm:$0xff] }
 0x192   :  { %vm460_vm2 = vcmp.gt.s32.totalorder %v237_v30, 0 }
 0x193   :  { %v1635_v34 = vmax.f32 %v6712_v27, 1.0 }
 0x195   :  { %1701 = vperm.xlu0 %4356, %v1635_v34   ;;  %v1393_v34 = vadd.f32 %v6591_v48, %v1344_v42  ;;  %v10133_v48 = vmov 0   ;;  %v235_v42 = vld [vmem:[%s9729_s1 + $0x2e8] sm:$0xff] }
 0x196   :  { %v1534_v59 = vpop.f32.mrf.mxu2  ;;  %v1439_v38 = vpop.f32.mrf.mxu0  ;;  %vm456_vm4 = vcmp.gt.s32.totalorder %v235_v42, 0 }
 0x197   :  { %v1535_v14 = vadd.f32 %v1534_v59, %v1486_v19  ;;  %v1440_v33 = vadd.f32 %v1439_v38, %v6583_v61  ;;  %v1488_v23 = vpop.f32.mrf.mxu1  ;;  %v6732_v19 = vpop.permute.xlu1 %2197 }
 0x198   :  { %v1583_v47 = vpop.f32.mrf.mxu3  ;;  %10129 = vst [vmem:[#allocation162_spill] sm:$0xff] %v6732_v19  ;;  %v6736_v38 = vpop.permute.xlu0 %2194 }
 0x199   :  { %v6723_v1 = vadd.f32 %v1583_v47, %v1535_v14  ;;  %v1489_v40 = vadd.f32 %v1488_v23, %v1440_v33  ;;  %10130 = vst [vmem:[#allocation163_spill] sm:$0xff] %v6736_v38  ;;  %v6738_v14 = vpop.permute.xlu2 %2209  ;;  %v6741_v33 = vsel %vm460_vm2, %v237_v30, 0  ;;  %vm486_vm2 = vcmp.gt.s32.totalorder %v250_v10, 0 }
 0x19a   :  { %10131 = vst [vmem:[#allocation164_spill] sm:$0xff] %v6738_v14 }
 0x19b   :  { %v1636_v20 = vmax.f32 %v6723_v1, 1.0  ;;  %10132 = vst [vmem:[#allocation165_spill] sm:$0xff] %v6741_v33 }
 0x19d   :  { %1706 = vperm.xlu1 %4357, %v1636_v20  }
 0x19e   :  { %v1537_v45 = vpop.f32.mrf.mxu2  ;;  %v1441_v51 = vpop.f32.mrf.mxu0 }
 0x19f   :  { %v1538_v47 = vadd.f32 %v1537_v45, %v1489_v40  ;;  %v1442_v17 = vadd.f32 %v1441_v51, %v1393_v34  ;;  %v1490_v23 = vpop.f32.mrf.mxu1  ;;  %v240_v40 = vld [vmem:[%s9729_s1 + $0x310] sm:$0xff]  ;;  %v6751_v30 = vpop.permute.xlu1 %2206 }
 0x1a0   :  { %v1586_v59 = vpop.f32.mrf.mxu3  ;;  %vm466_vm5 = vcmp.gt.s32.totalorder %v240_v40, 0  ;;  %10134 = vst [vmem:[#allocation166_spill] sm:$0xff] %v6751_v30 }
 0x1a1   :  { %v6734_v61 = vadd.f32 %v1586_v59, %v1538_v47  ;;  %v1491_v20 = vadd.f32 %v1490_v23, %v1442_v17  ;;  %v6756_v17 = vsel %vm456_vm4, %v235_v42, 0  ;;  %v6760_v23 = vpop.permute.xlu0 %2203  ;;  %v6762_v29 = vpop.permute.xlu2 %2218  ;;  %v236_v42 = vld [vmem:[%s9729_s1 + $0x2f0] sm:$0xff] }
 0x1a2   :  { %10135 = vst [vmem:[#allocation167_spill] sm:$0xff] %v6756_v17  ;;  %vm458_vm8 = vcmp.gt.s32.totalorder %v236_v42, 0 }
 0x1a3   :  { %v1637_v52 = vmax.f32 %v6734_v61, 1.0  ;;  %10137 = vst [vmem:[#allocation169_spill] sm:$0xff] %v6760_v23 }
 0x1a4   :  { %10138 = vst [vmem:[#allocation170_spill] sm:$0xff] %v6762_v29  ;;  %v262_v29 = vld [vmem:[%s9729_s1 + $0x3c0] sm:$0xff] }
 0x1a5   :  { %1711 = vperm.xlu2 %4358, %v1637_v52   ;;  %4361 = vset.pattern.permute.xlu1 %v10133_v48  ;;  %v6758_v52 = vsel %vm466_vm5, %v240_v40, 0 }
 0x1a6   :  { %v1539_v45 = vpop.f32.mrf.mxu2  ;;  %2269 = vperm.xlu1 %4361, %v6741_v33   ;;  %10136 = vst [vmem:[#allocation168_spill] sm:$0xff] %v6758_v52 }
 0x1a7   :  { %v1540_v51 = vadd.f32 %v1539_v45, %v1491_v20  ;;  %v238_v20 = vld [vmem:[%s9729_s1 + $0x300] sm:$0xff]  ;;  %v243_v45 = vld [vmem:[%s9729_s1 + $0x328] sm:$0xff]  ;;  %v6776_v40 = vpop.permute.xlu1 %2215 }
 0x1a8   :  { %v1588_v34 = vpop.f32.mrf.mxu3  ;;  %vm462_vm6 = vcmp.gt.s32.totalorder %v238_v20, 0  ;;  %vm472_vm7 = vcmp.gt.s32.totalorder %v243_v45, 0  ;;  %10139 = vst [vmem:[#allocation171_spill] sm:$0xff] %v6776_v40  ;;  %v268_v40 = vld [vmem:[%s9729_s1 + $0x3f0] sm:$0xff] }
 0x1a9   :  { %v6753_v47 = vadd.f32 %v1588_v34, %v1540_v51  ;;  %v6778_v51 = vsel %vm462_vm6, %v238_v20, 0  ;;  %v6780_v34 = vsel %vm472_vm7, %v243_v45, 0  ;;  %v239_v20 = vld [vmem:[%s9729_s1 + $0x308] sm:$0xff]  ;;  %v6796_v45 = vpop.permute.xlu0 %2212 }
 0x1aa   :  { %10140 = vst [vmem:[#allocation172_spill] sm:$0xff] %v6778_v51  ;;  %vm464_vm11 = vcmp.gt.s32.totalorder %v239_v20, 0 }
 0x1ab   :  { %v1638_v59 = vmax.f32 %v6753_v47, 1.0  ;;  %10141 = vst [vmem:[#allocation173_spill] sm:$0xff] %v6780_v34  ;;  %v6805_v33 = vsel %vm464_vm11, %v239_v20, 0 }
 0x1ac   :  { %10143 = vst [vmem:[#allocation175_spill] sm:$0xff] %v6796_v45 }
 0x1ad   :  { %4359 = vset.pattern.permute.xlu2 %v10133_v48  ;;  %1716 = vperm.xlu0 %4356, %v1638_v59   ;;  %v6782_v59 = vsel %vm458_vm8, %v236_v42, 0  ;;  %v6798_v42 = vpop.permute.xlu2 %2227  ;;  %10147 = vst [vmem:[#allocation179_spill] sm:$0xff] %v6805_v33 }
 0x1ae   :  { %2263 = vperm.xlu2 %4359, %v6756_v17   ;;  %2278 = vperm.xlu1 %4361, %v6758_v52   ;;  %10142 = vst [vmem:[#allocation174_spill] sm:$0xff] %v6782_v59  ;;  %v6803_v52 = vsel %vm478_vm10, %v246_v12, 0  ;;  %v249_v17 = vld [vmem:[%s9729_s1 + $0x358] sm:$0xff] }
 0x1af   :  { %10144 = vst [vmem:[#allocation176_spill] sm:$0xff] %v6798_v42  ;;  %vm484_vm13 = vcmp.gt.s32.totalorder %v249_v17, 0 }
 0x1b0   :  { %10146 = vst [vmem:[#allocation178_spill] sm:$0xff] %v6803_v52  ;;  %v6827_v42 = vsel %vm484_vm13, %v249_v17, 0 }
 0x1b1   :  { %v6821_v12 = vpop.permute.xlu0 %2221  ;;  %10152 = vst [vmem:[#allocation184_spill] sm:$0xff] %v6827_v42 }
 0x1b2   :  { %10149 = vst [vmem:[#allocation181_spill] sm:$0xff] %v6821_v12 }
 0x1b5   :  { %4360 = vset.pattern.permute.xlu0 %v10133_v48  ;;  %v6823_v20 = vpop.permute.xlu2 %2236 }
 0x1b6   :  { %2272 = vperm.xlu2 %4359, %v6778_v51   ;;  %2287 = vperm.xlu1 %4361, %v6780_v34   ;;  %v6807_v34 = vpop.permute.xlu1 %2224  ;;  %v244_v51 = vld [vmem:[%s9729_s1 + $0x330] sm:$0xff]  ;;  %10150 = vst [vmem:[#allocation182_spill] sm:$0xff] %v6823_v20 }
 0x1b7   :  { %2266 = vperm.xlu0 %4360, %v6782_v59   ;;  %10148 = vst [vmem:[#allocation180_spill] sm:$0xff] %v6807_v34  ;;  %vm474_vm12 = vcmp.gt.s32.totalorder %v244_v51, 0 }
 0x1b8   :  { %v6825_v59 = vsel %vm474_vm12, %v244_v51, 0  ;;  %v245_v51 = vld [vmem:[%s9729_s1 + $0x338] sm:$0xff] }
 0x1b9   :  { %10151 = vst [vmem:[#allocation183_spill] sm:$0xff] %v6825_v59  ;;  %vm476_vm1 = vcmp.gt.s32.totalorder %v245_v51, 0 }
 0x1bd   :  { %v6847_v20 = vpop.permute.xlu2 %2245 }
 0x1be   :  { %2281 = vperm.xlu2 %4359, %v6801_v50   ;;  %2296 = vperm.xlu1 %4361, %v6803_v52   ;;  %v6829_v50 = vsel %vm470_vm14, %v242_v62, 0  ;;  %v247_v52 = vld [vmem:[%s9729_s1 + $0x348] sm:$0xff]  ;;  %v6842_v17 = vpop.permute.xlu1 %2233  ;;  %v6845_v62 = vpop.permute.xlu0 %2230  ;;  %10156 = vst [vmem:[#allocation188_spill] sm:$0xff] %v6847_v20 }
 0x1bf   :  { %2275 = vperm.xlu0 %4360, %v6805_v33   ;;  %10153 = vst [vmem:[#allocation185_spill] sm:$0xff] %v6829_v50  ;;  %v252_v33 = vld [vmem:[%s9729_s1 + $0x370] sm:$0xff]  ;;  %vm480_vm15 = vcmp.gt.s32.totalorder %v247_v52, 0 }
 0x1c0   :  { %10154 = vst [vmem:[#allocation186_spill] sm:$0xff] %v6842_v17  ;;  %vm490_vm0 = vcmp.gt.s32.totalorder %v252_v33, 0  ;;  %v6849_v34 = vsel %vm480_vm15, %v247_v52, 0  ;;  %v248_v52 = vld [vmem:[%s9729_s1 + $0x350] sm:$0xff]  ;;  %v253_v17 = vld [vmem:[%s9729_s1 + $0x378] sm:$0xff]  ;;  %vm510_vm15 = vcmp.gt.s32.totalorder %v262_v29, 0 }
 0x1c1   :  { %10155 = vst [vmem:[#allocation187_spill] sm:$0xff] %v6845_v62  ;;  %vm482_vm5 = vcmp.gt.s32.totalorder %v248_v52, 0  ;;  %vm492_vm6 = vcmp.gt.s32.totalorder %v253_v17, 0 }
 0x1c2   :  { %10157 = vst [vmem:[#allocation189_spill] sm:$0xff] %v6849_v34  ;;  %v6873_v62 = vsel %vm482_vm5, %v248_v52, 0  ;;  %v6893_v52 = vsel %vm492_vm6, %v253_v17, 0  ;;  %vm529_vm6 = vcmp.ne.s32.totalorder %v4658_v43, 0 }
 0x1c3   :  { %10163 = vst [vmem:[#allocation195_spill] sm:$0xff] %v6873_v62 }
 0x1c4   :  { %10167 = vst [vmem:[#allocation199_spill] sm:$0xff] %v6893_v52 }
 0x1c6   :  { %2290 = vperm.xlu2 %4359, %v6825_v59   ;;  %2305 = vperm.xlu1 %4361, %v6827_v42   ;;  %v6851_v59 = vsel %vm490_vm0, %v252_v33, 0  ;;  %v6853_v42 = vsel %vm476_vm1, %v245_v51, 0  ;;  %v6867_v33 = vpop.permute.xlu1 %2242  ;;  %v6869_v51 = vsel %vm486_vm2, %v250_v10, 0  ;;  %v251_v10 = vld [vmem:[%s9729_s1 + $0x368] sm:$0xff]  ;;  %vm526_vm2 = vcmp.ne.s32.totalorder %v4565_v8, 0  ;;  %v266_v8 = vld [vmem:[%s9729_s1 + $0x3e0] sm:$0xff] }
 0x1c7   :  { %2284 = vperm.xlu0 %4360, %v6829_v50   ;;  %10158 = vst [vmem:[#allocation190_spill] sm:$0xff] %v6851_v59  ;;  %v255_v50 = vld [vmem:[%s9729_s1 + $0x388] sm:$0xff]  ;;  %vm488_vm8 = vcmp.gt.s32.totalorder %v251_v10, 0 }
 0x1c8   :  { %10159 = vst [vmem:[#allocation191_spill] sm:$0xff] %v6853_v42  ;;  %vm496_vm4 = vcmp.gt.s32.totalorder %v255_v50, 0 }
 0x1c9   :  { %10160 = vst [vmem:[#allocation192_spill] sm:$0xff] %v6867_v33  ;;  %v6871_v20 = vsel %vm496_vm4, %v255_v50, 0  ;;  %v6897_v33 = vsel %vm488_vm8, %v251_v10, 0  ;;  %vm518_vm8 = vcmp.gt.s32.totalorder %v266_v8, 0 }
 0x1ca   :  { %10161 = vst [vmem:[#allocation193_spill] sm:$0xff] %v6869_v51 }
 0x1cb   :  { %10162 = vst [vmem:[#allocation194_spill] sm:$0xff] %v6871_v20 }
 0x1cc   :  { %10169 = vst [vmem:[#allocation201_spill] sm:$0xff] %v6897_v33 }
 0x1ce   :  { %2299 = vperm.xlu2 %4359, %v6849_v34   ;;  %2314 = vperm.xlu1 %4361, %v6851_v59   ;;  %v6875_v34 = vpop.permute.xlu0 %2239  ;;  %v6877_v59 = vpop.permute.xlu2 %2254 }
 0x1cf   :  { %2293 = vperm.xlu0 %4360, %v6853_v42   ;;  %10164 = vst [vmem:[#allocation196_spill] sm:$0xff] %v6875_v34  ;;  %v258_v42 = vld [vmem:[%s9729_s1 + $0x3a0] sm:$0xff]  ;;  %v6891_v50 = vpop.permute.xlu1 %2251 }
 0x1d0   :  { %10165 = vst [vmem:[#allocation197_spill] sm:$0xff] %v6877_v59  ;;  %vm502_vm7 = vcmp.gt.s32.totalorder %v258_v42, 0 }
 0x1d1   :  { %10166 = vst [vmem:[#allocation198_spill] sm:$0xff] %v6891_v50  ;;  %v6895_v59 = vsel %vm502_vm7, %v258_v42, 0  ;;  %v254_v42 = vld [vmem:[%s9729_s1 + $0x380] sm:$0xff]  ;;  %vm522_vm7 = vcmp.gt.s32.totalorder %v268_v40, 0 }
 0x1d2   :  { %10168 = vst [vmem:[#allocation200_spill] sm:$0xff] %v6895_v59  ;;  %vm494_vm11 = vcmp.gt.s32.totalorder %v254_v42, 0  ;;  %v7005_v14 = vsel %vm522_vm7, %v268_v40, 0  ;;  %vm544_vm7 = vcmp.ne.s32.totalorder %v5116_v60, 0 }
 0x1d3   :  { %v6919_v34 = vsel %vm494_vm11, %v254_v42, 0  ;;  %10187 = vst [vmem:[#allocation219_spill] sm:$0xff] %v7005_v14 }
 0x1d4   :  { %10173 = vst [vmem:[#allocation205_spill] sm:$0xff] %v6919_v34 }
 0x1d6   :  { %2308 = vperm.xlu2 %4359, %v6869_v51   ;;  %2323 = vperm.xlu1 %4361, %v6871_v20   ;;  %v6899_v51 = vpop.permute.xlu2 %1661  ;;  %v256_v20 = vld [vmem:[%s9729_s1 + $0x390] sm:$0xff]  ;;  %v6912_v17 = vpop.permute.xlu0 %2248 }
 0x1d7   :  { %2302 = vperm.xlu0 %4360, %v6873_v62   ;;  %v261_v62 = vld [vmem:[%s9729_s1 + $0x3b8] sm:$0xff]  ;;  %10170 = vst [vmem:[#allocation202_spill] sm:$0xff] %v6912_v17  ;;  %vm498_vm9 = vcmp.gt.s32.totalorder %v256_v20, 0  ;;  %v264_v17 = vld [vmem:[%s9729_s1 + $0x3d0] sm:$0xff] }
 0x1d8   :  { %vm508_vm10 = vcmp.gt.s32.totalorder %v261_v62, 0  ;;  %v6915_v10 = vsel %vm498_vm9, %v256_v20, 0  ;;  %v257_v20 = vld [vmem:[%s9729_s1 + $0x398] sm:$0xff]  ;;  %vm514_vm13 = vcmp.gt.s32.totalorder %v264_v17, 0  ;;  %vm527_vm9 = vcmp.ne.s32.totalorder %v4563_v7, 0 }
 0x1d9   :  { %10171 = vst [vmem:[#allocation203_spill] sm:$0xff] %v6915_v10  ;;  %v6917_v50 = vsel %vm508_vm10, %v261_v62, 0  ;;  %vm500_vm14 = vcmp.gt.s32.totalorder %v257_v20, 0  ;;  %vm532_vm10 = vcmp.ne.s32.totalorder %v4771_v31, 0 }
 0x1da   :  { %10172 = vst [vmem:[#allocation204_spill] sm:$0xff] %v6917_v50 }
 0x1de   :  { %2317 = vperm.xlu2 %4359, %v6893_v52   ;;  %2332 = vperm.xlu1 %4361, %v6895_v59   ;;  %v6921_v52 = vpop.permute.xlu1 %2260  ;;  %v259_v59 = vld [vmem:[%s9729_s1 + $0x3a8] sm:$0xff]  ;;  %v6934_v62 = vpop.permute.xlu2 %1666 }
 0x1df   :  { %2311 = vperm.xlu0 %4360, %v6897_v33   ;;  %10174 = vst [vmem:[#allocation206_spill] sm:$0xff] %v6921_v52  ;;  %vm504_vm12 = vcmp.gt.s32.totalorder %v259_v59, 0  ;;  %v6937_v42 = vpop.permute.xlu0 %2257  ;;  %v6941_v33 = vsel %vm514_vm13, %v264_v17, 0  ;;  %vm535_vm13 = vcmp.ne.s32.totalorder %v4880_v21, 0  ;;  %v1790_v21 = vand.u32 2147483648, %v6899_v51 }
 0x1e0   :  { %10175 = vst [vmem:[#allocation207_spill] sm:$0xff] %v6937_v42  ;;  %v6939_v52 = vsel %vm504_vm12, %v259_v59, 0  ;;  %v260_v59 = vld [vmem:[%s9729_s1 + $0x3b0] sm:$0xff]  ;;  %v6963_v42 = vsel %vm510_vm15, %v262_v29, 0  ;;  %vm530_vm12 = vcmp.ne.s32.totalorder %v4647_v39, 0  ;;  %vm533_vm15 = vcmp.ne.s32.totalorder %v4638_v35, 0 }
 0x1e1   :  { %10176 = vst [vmem:[#allocation208_spill] sm:$0xff] %v6939_v52  ;;  %vm506_vm1 = vcmp.gt.s32.totalorder %v260_v59, 0  ;;  %v3148_v37 = vsel %vm530_vm12, 1, %v10133_v48  ;;  %v3153_v0 = vsel %vm535_vm13, 1, %v10133_v48 }
 0x1e2   :  { %10177 = vst [vmem:[#allocation209_spill] sm:$0xff] %v6941_v33 }
 0x1e3   :  { %10180 = vst [vmem:[#allocation212_spill] sm:$0xff] %v6963_v42 }
 0x1e6   :  { %2326 = vperm.xlu2 %4359, %v6915_v10   ;;  %2341 = vperm.xlu1 %4361, %v6917_v50   ;;  %v6943_v10 = vsel %vm500_vm14, %v257_v20, 0  ;;  %v6945_v50 = vpop.permute.xlu1 %1651  ;;  %v6958_v17 = vpop.permute.xlu2 %1681  ;;  %vm528_vm14 = vcmp.ne.s32.totalorder %v4561_v6, 0 }
 0x1e7   :  { %2320 = vperm.xlu0 %4360, %v6919_v34   ;;  %10178 = vst [vmem:[#allocation210_spill] sm:$0xff] %v6943_v10  ;;  %v267_v34 = vld [vmem:[%s9729_s1 + $0x3e8] sm:$0xff]  ;;  %v6961_v20 = vpop.permute.xlu0 %1641  ;;  %v3146_v46 = vsel %vm528_vm14, 1, %v10133_v48 }
 0x1e8   :  { %vm520_vm0 = vcmp.gt.s32.totalorder %v267_v34, 0  ;;  %10179 = vst [vmem:[#allocation211_spill] sm:$0xff] %v6961_v20  ;;  %4362 = vrcp.f32 %v6961_v20 }
 0x1e9   :  { %v6965_v12 = vsel %vm520_vm0, %v267_v34, 0  ;;  %4364 = vrcp.f32 %v6899_v51  ;;  %vm531_vm0 = vcmp.ne.s32.totalorder %v4773_v32, 0 }
 0x1ea   :  { %10181 = vst [vmem:[#allocation213_spill] sm:$0xff] %v6965_v12  ;;  %4366 = vrcp.f32 %v6934_v62 }
 0x1ee   :  { %2335 = vperm.xlu2 %4359, %v6939_v52   ;;  %2350 = vperm.xlu1 %4361, %v6941_v33   ;;  %v6967_v52 = vsel %vm506_vm1, %v260_v59, 0  ;;  %v265_v33 = vld [vmem:[%s9729_s1 + $0x3d8] sm:$0xff]  ;;  %v6977_v45 = vpop.permute.xlu1 %1656  ;;  %v6979_v29 = vpop.permute.xlu2 %1696  ;;  %vm538_vm1 = vcmp.ne.s32.totalorder %v4995_v16, 0 }
 0x1ef   :  { %2329 = vperm.xlu0 %4360, %v6943_v10   ;;  %10182 = vst [vmem:[#allocation214_spill] sm:$0xff] %v6967_v52  ;;  %v263_v10 = vld [vmem:[%s9729_s1 + $0x3c8] sm:$0xff]  ;;  %vm516_vm4 = vcmp.gt.s32.totalorder %v265_v33, 0  ;;  %v6983_v34 = vpop.permute.xlu0 %1646  ;;  %v7032_v31 = vpop.eup %4362  ;;  %v1893_v56 = vand.u32 2147483647, %v6979_v29 }
 0x1f0   :  { %10183 = vst [vmem:[#allocation215_spill] sm:$0xff] %v6977_v45  ;;  %vm512_vm5 = vcmp.gt.s32.totalorder %v263_v10, 0  ;;  %v6985_v59 = vsel %vm516_vm4, %v265_v33, 0  ;;  %4368 = vrcp.f32 %v6983_v34  ;;  %vm541_vm4 = vcmp.ne.s32.totalorder %v5085_v53, 0 }
 0x1f1   :  { %10184 = vst [vmem:[#allocation216_spill] sm:$0xff] %v6983_v34  ;;  %4370 = vrcp.f32 %v6958_v17 }
 0x1f2   :  { %10185 = vst [vmem:[#allocation217_spill] sm:$0xff] %v6985_v59  ;;  %4372 = vrcp.f32 %v6945_v50 }
 0x1f3   :  { %10191 = vst [vmem:[#allocation223_spill] sm:$0xff] %v7032_v31  ;;  %4374 = vrcp.f32 %v6977_v45 }
 0x1f6   :  { %2344 = vperm.xlu2 %4359, %v6963_v42   ;;  %2359 = vperm.xlu1 %4361, %v6965_v12   ;;  %v3144_v12 = vsel %vm526_vm2, 1, %v10133_v48  ;;  %v6988_v42 = vsel %vm512_vm5, %v263_v10, 0  ;;  %vm536_vm2 = vcmp.ne.s32.totalorder %v4754_v24, 0  ;;  %vm534_vm5 = vcmp.ne.s32.totalorder %v4882_v22, 0 }
 0x1f7   :  { %2338 = vperm.xlu0 %4360, %v6967_v52   ;;  %10186 = vst [vmem:[#allocation218_spill] sm:$0xff] %v6988_v42  ;;  %v6997_v52 = vpop.permute.xlu1 %1676  ;;  %v7003_v10 = vpop.permute.xlu0 %1671 }
 0x1fe   :  { %2353 = vperm.xlu2 %4359, %v6985_v59   ;;  %3273 = vperm.xlu1 %4361, %v3144_v12   ;;  %v3147_v12 = vsel %vm529_vm6, 1, %v10133_v48  ;;  %v7008_v59 = vsel %vm518_vm8, %v266_v8, 0  ;;  %vm539_vm6 = vcmp.ne.s32.totalorder %v4851_v3, 0  ;;  %vm537_vm8 = vcmp.ne.s32.totalorder %v5009_v25, 0 }
 0x1ff   :  { %2347 = vperm.xlu0 %4360, %v6988_v42   ;;  %v7000_v33 = vpop.permute.xlu2 %1711  ;;  %10188 = vst [vmem:[#allocation220_spill] sm:$0xff] %v7008_v59  ;;  %v269_v42 = vld [vmem:[%s9729_s1 + $0x3f8] sm:$0xff]  ;;  %v7015_v43 = vpop.permute.xlu1 %1691 }
 0x200   :  { %vm524_vm11 = vcmp.gt.s32.totalorder %v269_v42, 0  ;;  %v7026_v8 = vpop.permute.xlu0 %1686  ;;  %4376 = vrcp.f32 %v7000_v33  ;;  %vm1934_vm12 = vweird.f32 %v7000_v33  ;;  %vm1874_vm13 = vweird.f32 %v7015_v43 }
 0x201   :  { %v7030_v7 = vsel %vm524_vm11, %v269_v42, 0  ;;  %4378 = vrcp.f32 %v6979_v29 }
 0x202   :  { %10190 = vst [vmem:[#allocation222_spill] sm:$0xff] %v7030_v7  ;;  %4380 = vrcp.f32 %v7003_v10 }
 0x203   :  { %4382 = vrcp.f32 %v6997_v52 }
 0x206   :  { %2362 = vperm.xlu2 %4359, %v7005_v14   ;;  %3282 = vperm.xlu1 %4361, %v3147_v12   ;;  %v3145_v12 = vsel %vm527_vm9, 1, %v10133_v48  ;;  %v7035_v14 = vpop.eup %4364 }
 0x207   :  { %2356 = vperm.xlu0 %4360, %v7008_v59   ;;  %v3150_v59 = vsel %vm532_vm10, 1, %v10133_v48 }
 0x208   :  { %v7021_v40 = vpop.permute.xlu2 %2263  ;;  %v7068_v2 = vpop.permute.xlu0 %1701 }
 0x209   :  { %10189 = vst [vmem:[#allocation221_spill] sm:$0xff] %v7021_v40  ;;  %v7038_v40 = vpop.eup %4366 }
 0x20a   :  { %v7044_v42 = vpop.eup %4368  ;;  %v1795_v23 = vmul.f32 %v7038_v40, %v6934_v62 }
 0x20c   :  { %v1796_v54 = vsub.f32 1.0, %v1795_v23 }
 0x20e   :  { %3276 = vperm.xlu2 %4359, %v3145_v12   ;;  %3291 = vperm.xlu1 %4361, %v3150_v59   ;;  %v7051_v12 = vpop.eup %4370  ;;  %v1720_v59 = vmul.f32 %v7032_v31, %v6961_v20  ;;  %v1938_v20 = vand.u32 2147483647, %v7000_v33 }
 0x20f   :  { %2365 = vperm.xlu0 %4360, %v7030_v7   ;;  %v7042_v30 = vpop.permute.xlu1 %1706  ;;  %v1780_v7 = vmul.f32 %v7035_v14, %v6899_v51  ;;  %v7064_v38 = vpop.eup %4372  ;;  %v1840_v19 = vmul.f32 %v7051_v12, %v6958_v17 }
 0x210   :  { %v7049_v26 = vpop.permute.xlu2 %2272  ;;  %v7076_v58 = vpop.eup %4374  ;;  %4384 = vrcp.f32 %v7042_v30  ;;  %v1721_v4 = vsub.f32 1.0, %v1720_v59  ;;  %v1750_v41 = vmul.f32 %v7064_v38, %v6945_v50  ;;  %v1805_v59 = vand.u32 2147483648, %v6934_v62 }
 0x211   :  { %10192 = vst [vmem:[#allocation224_spill] sm:$0xff] %v7049_v26  ;;  %v1735_v26 = vmul.f32 %v7044_v42, %v6983_v34  ;;  %v7086_v39 = vpop.eup %4376  ;;  %v1781_v28 = vsub.f32 1.0, %v1780_v7  ;;  %4386 = vrcp.f32 %v7026_v8  ;;  %v1765_v44 = vmul.f32 %v7076_v58, %v6977_v45 }
 0x212   :  { %10193 = vst [vmem:[#allocation225_spill] sm:$0xff] %v7076_v58  ;;  %v7090_v57 = vpop.eup %4378  ;;  %4388 = vrcp.f32 %v7068_v2  ;;  %v1930_v15 = vmul.f32 %v7086_v39, %v7000_v33  ;;  %v1751_v49 = vsub.f32 1.0, %v1750_v41  ;;  %vm1935_vm9 = vweird.f32 %v7086_v39 }
 0x213   :  { %v7096_v6 = vpop.eup %4380  ;;  %4390 = vrcp.f32 %v7015_v43  ;;  %v1736_v23 = vsub.f32 1.0, %v1735_v26  ;;  %v1782_v11 = vmul.f32 %v7035_v14, %v1781_v28  ;;  %v7119_v26 = vor.u32 1.1754944e-38, %v1790_v21  ;;  %vm7229_vm14 = vmor %vm1934_vm12, %vm1935_vm9 }
 0x214   :  { %v7112_v55 = vpop.eup %4382  ;;  %v1810_v9 = vmul.f32 %v7096_v6, %v7003_v10  ;;  %v1766_v28 = vsub.f32 1.0, %v1765_v44  ;;  %v3151_v21 = vsel %vm533_vm15, 1, %v10133_v48  ;;  %v3149_v44 = vsel %vm531_vm0, 1, %v10133_v48 }
 0x215   :  { %10197 = vst [vmem:[#allocation229_spill] sm:$0xff] %v7119_v26  ;;  %v3156_v26 = vsel %vm538_vm1, 1, %v10133_v48  ;;  %v7142_v41 = vmul.f32 %v7044_v42, %v1736_v23  ;;  %v7152_v35 = vadd.f32 %v7035_v14, %v1782_v11  ;;  %v1825_v16 = vmul.f32 %v7112_v55, %v6997_v52 }
 0x216   :  { %3285 = vperm.xlu2 %4359, %v3148_v37   ;;  %3300 = vperm.xlu1 %4361, %v3153_v0   ;;  %v1841_v0 = vsub.f32 1.0, %v1840_v19  ;;  %v1885_v19 = vmul.f32 %v7090_v57, %v6979_v29  ;;  %v7123_v37 = vpop.eup %4384  ;;  %v7162_v32 = vmul.f32 %v7064_v38, %v1751_v49  ;;  %v7168_v11 = vmul.f32 %v7076_v58, %v1766_v28 }
 0x217   :  { %3279 = vperm.xlu0 %4360, %v3146_v46   ;;  %v7116_v46 = vmul.f32 %v7032_v31, %v1721_v4  ;;  %v7129_v45 = vpop.eup %4386  ;;  %v7131_v4 = vor.u32 1.1754944e-38, %v1805_v59  ;;  %10199 = vst [vmem:[#allocation231_spill] sm:$0xff] %v7142_v41  ;;  %v1915_v23 = vmul.f32 %v7123_v37, %v7042_v30  ;;  %vm1890_vm10 = vweird.f32 %v7090_v57 }
 0x218   :  { %v7108_v7 = vpop.permute.xlu2 %2281  ;;  %v7110_v13 = vpop.permute.xlu1 %2269  ;;  %10200 = vst [vmem:[#allocation232_spill] sm:$0xff] %v7152_v35  ;;  %v1855_v41 = vmul.f32 %v7129_v45, %v7026_v8  ;;  %v1826_v35 = vsub.f32 1.0, %v1825_v16  ;;  %v3154_v16 = vsel %vm536_vm2, 1, %v10133_v48  ;;  %vm7233_vm15 = vcmp.eq.f32.partialorder %v1938_v20, 8.507059e+37 }
 0x219   :  { %10194 = vst [vmem:[#allocation226_spill] sm:$0xff] %v7108_v7  ;;  %v1797_v7 = vmul.f32 %v7038_v40, %v1796_v54  ;;  %v7139_v54 = vpop.eup %4388  ;;  %vm1889_vm0 = vweird.f32 %v6979_v29  ;;  %vm1919_vm9 = vweird.f32 %v7042_v30  ;;  %vm1920_vm12 = vweird.f32 %v7123_v37 }
 0x21a   :  { %10195 = vst [vmem:[#allocation227_spill] sm:$0xff] %v7110_v13  ;;  %v1842_v13 = vmul.f32 %v7051_v12, %v1841_v0  ;;  %v7148_v59 = vpop.eup %4390  ;;  %v1811_v0 = vsub.f32 1.0, %v1810_v9  ;;  %vm1905_vm1 = vweird.f32 %v7139_v54  ;;  %v1923_v3 = vand.u32 2147483647, %v7042_v30 }
 0x21b   :  { %10196 = vst [vmem:[#allocation228_spill] sm:$0xff] %v7116_v46  ;;  %v1931_v46 = vsub.f32 1.0, %v1930_v15  ;;  %v7159_v15 = vadd.f32 %v7038_v40, %v1797_v7  ;;  %v1900_v7 = vmul.f32 %v7139_v54, %v7068_v2  ;;  %vm1875_vm11 = vweird.f32 %v7148_v59 }
 0x21c   :  { %10198 = vst [vmem:[#allocation230_spill] sm:$0xff] %v7131_v4  ;;  %v1886_v4 = vsub.f32 1.0, %v1885_v19  ;;  %v7177_v9 = vadd.f32 %v7051_v12, %v1842_v13  ;;  %v1916_v13 = vsub.f32 1.0, %v1915_v23  ;;  %v1925_v22 = vand.u32 2147483648, %v7042_v30 }
 0x21d   :  { %10201 = vst [vmem:[#allocation233_spill] sm:$0xff] %v7159_v15  ;;  %v7191_v15 = vmul.f32 %v7096_v6, %v1811_v0  ;;  %v1901_v63 = vsub.f32 1.0, %v1900_v7  ;;  %v7210_v7 = vmul.f32 %v7112_v55, %v1826_v35  ;;  %v10215_v35 = vld [vmem:[#allocation5_spill] sm:$0xff]  ;;  %v1910_v34 = vand.u32 2147483648, %v7068_v2 }
 0x21e   :  { %10202 = vst [vmem:[#allocation234_spill] sm:$0xff] %v7162_v32  ;;  %3294 = vperm.xlu2 %4359, %v3151_v21   ;;  %3309 = vperm.xlu1 %4361, %v3156_v26   ;;  %v1870_v26 = vmul.f32 %v7148_v59, %v7015_v43  ;;  %v1932_v21 = vmul.f32 %v7086_v39, %v1931_v46  ;;  %v1856_v46 = vsub.f32 1.0, %v1855_v41  ;;  %v3152_v41 = vsel %vm534_vm5, 1, %v10133_v48 }
 0x21f   :  { %10203 = vst [vmem:[#allocation235_spill] sm:$0xff] %v7168_v11  ;;  %3288 = vperm.xlu0 %4360, %v3149_v44   ;;  %v7174_v49 = vpop.permute.xlu0 %1716  ;;  %v1887_v32 = vmul.f32 %v7090_v57, %v1886_v4  ;;  %v3159_v4 = vsel %vm541_vm4, 1, %v10133_v48  ;;  %v1917_v53 = vmul.f32 %v7123_v37, %v1916_v13  ;;  %v10213_v44 = vld [vmem:[#allocation9_spill] sm:$0xff]  ;;  %vm1860_vm5 = vweird.f32 %v7129_v45 }
 0x220   :  { %4392 = vrcp.f32 %v7174_v49  ;;  %v7183_v28 = vpop.permute.xlu2 %2290  ;;  %v7185_v19 = vpop.permute.xlu1 %2278  ;;  %v1871_v23 = vsub.f32 1.0, %v1870_v26  ;;  %v7203_v0 = vadd.f32 %v7086_v39, %v1932_v21  ;;  %v7221_v21 = vmul.f32 %v7129_v45, %v1856_v46 }
 0x221   :  { %10204 = vst [vmem:[#allocation236_spill] sm:$0xff] %v7183_v28  ;;  %v1940_v28 = vand.u32 2147483648, %v7000_v33  ;;  %v7213_v24 = vadd.f32 %v7090_v57, %v1887_v32  ;;  %v1902_v46 = vmul.f32 %v7139_v54, %v1901_v63  ;;  %v3157_v63 = vsel %vm539_vm6, 1, %v10133_v48 }
 0x222   :  { %10205 = vst [vmem:[#allocation237_spill] sm:$0xff] %v7185_v19  ;;  %vm1904_vm4 = vweird.f32 %v7068_v2  ;;  %vm1830_vm3 = vweird.f32 %v7112_v55  ;;  %vm7291_vm2 = vcmp.eq.f32.partialorder %v1893_v56, 8.507059e+37  ;;  %v1908_v30 = vand.u32 2147483647, %v7068_v2 }
 0x223   :  { %v1941_v13 = vor.u32 1.1754944e-38, %v1940_v28  ;;  %vm7297_vm6 = vmor %vm1904_vm4, %vm1905_vm1  ;;  %v1880_v56 = vand.u32 2147483648, %v7015_v43  ;;  %v1926_v11 = vor.u32 1.1754944e-38, %v1925_v22  ;;  %vm1815_vm1 = vweird.f32 %v7096_v6 }
 0x224   :  { %vm1829_vm4 = vweird.f32 %v6997_v52  ;;  %v1911_v32 = vor.u32 1.1754944e-38, %v1910_v34 }
 0x226   :  { %v7217_v26 = vpop.eup %4392  ;;  %3303 = vperm.xlu2 %4359, %v3154_v16   ;;  %3318 = vperm.xlu1 %4361, %v3159_v4   ;;  %v1872_v16 = vmul.f32 %v7148_v59, %v1871_v23  ;;  %v1937_v4 = vsel %vm7229_vm14, %v7086_v39, %v7203_v0  ;;  %v1918_v23 = vadd.f32 %v7123_v37, %v1917_v53  ;;  %v3162_v53 = vsel %vm544_vm7, 1, %v10133_v48  ;;  %vm7283_vm7 = vmor %vm1919_vm9, %vm1920_vm12 }
 0x227   :  { %v1945_v33 = vmul.f32 %v7217_v26, %v7174_v49  ;;  %3297 = vperm.xlu0 %4360, %v3152_v41   ;;  %v10212_v41 = vld [vmem:[#allocation2_spill] sm:$0xff]  ;;  %vm1950_vm14 = vweird.f32 %v7217_v26  ;;  %vm1949_vm9 = vweird.f32 %v7174_v49  ;;  %v1942_v58 = vsel %vm7233_vm15, %v1941_v13, %v1937_v4  ;;  %vm7326_vm15 = vmor %vm1874_vm13, %vm1875_vm11 }
 0x228   :  { %v7247_v20 = vpop.permute.xlu2 %2299  ;;  %v7249_v28 = vpop.permute.xlu1 %2287  ;;  %v1873_v19 = vadd.f32 %v7148_v59, %v1872_v16  ;;  %v1922_v25 = vsel %vm7283_vm7, %v7123_v37, %v1918_v23  ;;  %vm1924_vm12 = vcmp.eq.f32.partialorder %v1923_v3, 8.507059e+37  ;;  %vm7341_vm11 = vmor %vm1889_vm0, %vm1890_vm10  ;;  %vm1909_vm13 = vcmp.eq.f32.partialorder %v1908_v30, 8.507059e+37 }
 0x229   :  { %10210 = vst [vmem:[#allocation238_spill] sm:$0xff] %v7247_v20  ;;  %v1946_v39 = vsub.f32 1.0, %v1945_v33  ;;  %v7260_v0 = vpop.permute.xlu0 %2266  ;;  %v1955_v20 = vand.u32 2147483648, %v7174_v49  ;;  %v1903_v33 = vadd.f32 %v7139_v54, %v1902_v46  ;;  %v3155_v46 = vsel %vm537_vm8, 1, %v10133_v48  ;;  %vm1951_vm8 = vmor %vm1949_vm9, %vm1950_vm14 }
 0x22a   :  { %10211 = vst [vmem:[#allocation239_spill] sm:$0xff] %v7249_v28  ;;  %v1953_v28 = vand.u32 2147483647, %v7174_v49  ;;  %v7320_v49 = vadd.f32 %v7129_v45, %v7221_v21  ;;  %v1927_v4 = vsel %vm1924_vm12, %v1926_v11, %v1922_v25  ;;  %vm1800_vm9 = vweird.f32 %v7038_v40 }
 0x22b   :  { %10214 = vst [vmem:[#allocation2_spill] sm:$0xff] %v7260_v0  ;;  %v1947_v0 = vmul.f32 %v7217_v26, %v1946_v39  ;;  %v1956_v36 = vor.u32 1.1754944e-38, %v1955_v20  ;;  %v1907_v37 = vsel %vm7297_vm6, %v7139_v54, %v1903_v33  ;;  %v10224_v54 = vld [vmem:[#allocation4_spill] sm:$0xff]  ;;  %v1943_v34 = vmul.f32 %v1942_v58, %v6734_v61 }
 0x22c   :  { %vm1954_vm7 = vcmp.eq.f32.partialorder %v1953_v28, 8.507059e+37  ;;  %v10225_v20 = vld [vmem:[#allocation12_spill] sm:$0xff]  ;;  %v1877_v28 = vsel %vm7326_vm15, %v7148_v59, %v1873_v19  ;;  %v1863_v23 = vand.u32 2147483647, %v7026_v8  ;;  %v1881_v3 = vor.u32 1.1754944e-38, %v1880_v56 }
 0x22d   :  { %v1948_v31 = vadd.f32 %v7217_v26, %v1947_v0  ;;  %v1865_v0 = vand.u32 2147483648, %v7026_v8  ;;  %vm10229_vm10 = vcmp.lt.s32.totalorder %v4559_v5, 3  ;;  %v1912_v61 = vsel %vm1909_vm13, %v1911_v32, %v1907_v37  ;;  %v10328_v58 = vld [vmem:[#allocation156_spill] sm:$0xff] }
 0x22e   :  { %3312 = vperm.xlu2 %4359, %v3157_v63   ;;  %3327 = vperm.xlu1 %4361, %v3162_v53   ;;  %v10228_v63 = vld [vmem:[#allocation7_spill] sm:$0xff]  ;;  %vm7359_vm0 = vmpackc.low %vm10229_vm10, %vm10229_vm10  ;;  %v1928_v19 = vmul.f32 %v1927_v4, %v6723_v1  ;;  %v1892_v53 = vsel %vm7341_vm11, %v7090_v57, %v7213_v24  ;;  %v10233_v33 = vand.u32 2147483648, %v6979_v29  ;;  %vm10234_vm13 = vweird.f32 %v7026_v8  ;;  %v10333_v29 = vld [vmem:[#allocation157_spill] sm:$0xff] }
 0x22f   :  { %v1952_v2 = vsel %vm1951_vm8, %v7217_v26, %v1948_v31  ;;  %3306 = vperm.xlu0 %4360, %v3155_v46   ;;  %vm7378_vm10 = vmor %vm10234_vm13, %vm1860_vm5  ;;  %vm10237_vm12 = vcmp.ne.s32.totalorder %v10212_v41, 0  ;;  %vm10238_vm11 = vcmp.ne.s32.totalorder %v10213_v44, 0  ;;  %vm10239_vm8 = vweird.f32 %v7051_v12 }
 0x230   :  { %v1957_v31 = vsel %vm1954_vm7, %v1956_v36, %v1952_v2  ;;  %v7330_v26 = vpop.permute.xlu2 %2308  ;;  %v7332_v13 = vpop.permute.xlu1 %2296  ;;  %vm1799_vm7 = vweird.f32 %v6934_v62  ;;  %v1896_v60 = vor.u32 1.1754944e-38, %v10233_v33  ;;  %v3160_v1 = vsel %vm10237_vm12, 1, %v10133_v48  ;;  %v10265_v33 = vld [vmem:[#allocation216_spill] sm:$0xff] }
 0x231   :  { %v7345_v36 = vpop.permute.xlu0 %2275  ;;  %v1958_v11 = vmul.f32 %v1957_v31, %v6753_v47  ;;  %v10232_v47 = vand.u32 2147483647, %v7015_v43  ;;  %v3165_v57 = vsel %vm10238_vm11, 1, %v10133_v48  ;;  %vm10240_vm6 = vweird.f32 %v6958_v17  ;;  %v10253_v31 = vld [vmem:[#allocation6_spill] sm:$0xff] }
 0x232   :  { %vm7392_vm14 = vmor %vm10240_vm6, %vm10239_vm8  ;;  %v1828_v8 = vadd.f32 %v7112_v55, %v7210_v7  ;;  %vm10243_vm5 = vcmp.ne.s32.totalorder %v10215_v35, 0  ;;  %v1913_v41 = vmul.f32 %v1912_v61, %v6712_v27  ;;  %v1862_v46 = vsel %vm7378_vm10, %v7129_v45, %v7320_v49  ;;  %v10260_v61 = vld [vmem:[#allocation235_spill] sm:$0xff] }
 0x233   :  { %vm1879_vm15 = vcmp.eq.f32.partialorder %v10232_v47, 8.507059e+37  ;;  %v4174_v59 = vpack.c.bf16 %v1958_v11, %v1943_v34  ;;  %v3158_v44 = vsel %vm10243_vm5, 1, %v10133_v48  ;;  %vm1755_vm6 = vweird.f32 %v7064_v38  ;;  %v10261_v47 = vld [vmem:[#allocation225_spill] sm:$0xff] }
 0x234   :  { %v1882_v24 = vsel %vm1879_vm15, %v1881_v3, %v1877_v28  ;;  %v1835_v7 = vand.u32 2147483648, %v6997_v52  ;;  %v1866_v39 = vor.u32 1.1754944e-38, %v1865_v0  ;;  %v1897_v35 = vsel %vm7291_vm2, %v1896_v60, %v1892_v53  ;;  %vm7445_vm15 = vmor %vm1829_vm4, %vm1830_vm3  ;;  %v10258_v28 = vld [vmem:[#allocation155_spill] sm:$0xff]  ;;  %v10259_v3 = vld [vmem:[#allocation10_spill] sm:$0xff] }
 0x235   :  { %4175 = vmatpush.bf16.msk.msra.mxu0 %vm7359_vm0, %v4174_v59  ;;  %4325 = vmatpush.bf16.msk.msra.mxu1 %vm7359_vm0, %v4174_v59  ;;  %v1847_v27 = vsel %vm7392_vm14, %v7051_v12, %v7177_v9  ;;  %v10244_v45 = vand.u32 2147483647, %v6934_v62  ;;  %v1813_v25 = vadd.f32 %v7096_v6, %v7191_v15  ;;  %vm1864_vm12 = vcmp.eq.f32.partialorder %v1863_v23, 8.507059e+37  ;;  %v10264_v53 = vld [vmem:[#allocation223_spill] sm:$0xff] }
 0x236   :  { %4326 = vmatpush.bf16.msk.msra.mxu2 %vm7359_vm0, %v4174_v59  ;;  %4327 = vmatpush.bf16.msk.msra.mxu3 %vm7359_vm0, %v4174_v59  ;;  %v4177_v56 = vpack.c.bf16 %v1928_v19, %v1913_v41  ;;  %v1883_v16 = vmul.f32 %v1882_v24, %v6691_v18  ;;  %vm1754_vm2 = vweird.f32 %v6945_v50  ;;  %v10247_v2 = vand.u32 2147483647, %v6958_v17  ;;  %v10285_v12 = vld [vmem:[#allocation143_spill] sm:$0xff] }
 0x237   :  { %vm7424_vm8 = vcmp.eq.f32.partialorder %v10244_v45, 8.507059e+37  ;;  %3321 = vperm.xlu2 %4359, %v3160_v1   ;;  %3336 = vperm.xlu1 %4361, %v3165_v57   ;;  %v10250_v9 = vand.u32 2147483648, %v6958_v17  ;;  %v1820_v49 = vand.u32 2147483648, %v7003_v10  ;;  %v1867_v32 = vsel %vm1864_vm12, %v1866_v39, %v1862_v46  ;;  %v10254_v17 = vld [vmem:[#allocation15_spill] sm:$0xff]  ;;  %v10267_v1 = vld [vmem:[#allocation150_spill] sm:$0xff] }
 0x238   :  { %vm7434_vm14 = vcmp.eq.f32.partialorder %v10247_v2, 8.507059e+37  ;;  %3315 = vperm.xlu0 %4360, %v3158_v44   ;;  %v7449_v18 = vpop.permute.xlu2 %2317  ;;  %v7451_v22 = vpop.permute.xlu1 %2305  ;;  %v10255_v4 = vand.u32 2147483647, %v6899_v51  ;;  %vm1740_vm3 = vweird.f32 %v7044_v42  ;;  %vm1814_vm4 = vweird.f32 %v7003_v10  ;;  %v10272_v46 = vld [vmem:[#allocation211_spill] sm:$0xff] }
 0x239   :  { %v1851_v37 = vor.u32 1.1754944e-38, %v10250_v9  ;;  %v1818_v34 = vand.u32 2147483647, %v7003_v10  ;;  %v7464_v11 = vpop.permute.xlu0 %2284  ;;  %4178 = vmatpush.bf16.msk.msra.mxu0 %vm7359_vm0, %v4177_v56  ;;  %4328 = vmatpush.bf16.msk.msra.mxu1 %vm7359_vm0, %v4177_v56  ;;  %v1898_v23 = vmul.f32 %v1897_v35, %v10258_v28  ;;  %v1832_v0 = vsel %vm7445_vm15, %v7112_v55, %v1828_v8  ;;  %vm7482_vm10 = vmor %vm1814_vm4, %vm1815_vm1  ;;  %v10280_v39 = vld [vmem:[#allocation215_spill] sm:$0xff] }
 0x23a   :  { %vm7457_vm11 = vcmp.eq.f32.partialorder %v10255_v4, 8.507059e+37  ;;  %v7477_v59 = vadd.f32 %v10261_v47, %v10260_v61  ;;  %vm1770_vm12 = vweird.f32 %v10261_v47  ;;  %v1836_v19 = vor.u32 1.1754944e-38, %v1835_v7  ;;  %4329 = vmatpush.bf16.msk.msra.mxu2 %vm7359_vm0, %v4177_v56  ;;  %4330 = vmatpush.bf16.msk.msra.mxu3 %vm7359_vm0, %v4177_v56  ;;  %vm7504_vm4 = vmor %vm1799_vm7, %vm1800_vm9  ;;  %v10279_v7 = vld [vmem:[#allocation233_spill] sm:$0xff]  ;;  %v10287_v4 = vld [vmem:[#allocation230_spill] sm:$0xff] }
 0x23b   :  { %v1852_v55 = vsel %vm7434_vm14, %v1851_v37, %v1847_v27  ;;  %v10266_v60 = vand.u32 2147483647, %v6997_v52  ;;  %v4180_v43 = vpack.c.bf16 %v1898_v23, %v1883_v16  ;;  %v1868_v57 = vmul.f32 %v1867_v32, %v10267_v1  ;;  %v10286_v37 = vld [vmem:[#allocation231_spill] sm:$0xff]  ;;  %v10290_v61 = vld [vmem:[#allocation140_spill] sm:$0xff]  ;;  %v10295_v1 = vld [vmem:[#allocation137_spill] sm:$0xff] }
 0x23c   :  { %v1817_v24 = vsel %vm7482_vm10, %v7096_v6, %v1813_v25  ;;  %v1821_v8 = vor.u32 1.1754944e-38, %v1820_v49  ;;  %vm10270_vm14 = vcmp.ne.s32.totalorder %v10224_v54, 0  ;;  %vm10271_vm15 = vcmp.ne.s32.totalorder %v10225_v20, 0  ;;  %v10278_v54 = vld [vmem:[#allocation147_spill] sm:$0xff]  ;;  %v10282_v25 = vld [vmem:[#allocation234_spill] sm:$0xff]  ;;  %v10319_v23 = vld [vmem:[#allocation121_spill] sm:$0xff] }
 0x23d   :  { %vm1834_vm1 = vcmp.eq.f32.partialorder %v10266_v60, 8.507059e+37  ;;  %v3163_v52 = vsel %vm10270_vm14, 1, %v10133_v48  ;;  %v3168_v44 = vsel %vm10271_vm15, 1, %v10133_v48  ;;  %vm1724_vm10 = vweird.f32 %v10272_v46  ;;  %4181 = vmatpush.bf16.msk.msra.mxu0 %vm7359_vm0, %v4180_v43  ;;  %4331 = vmatpush.bf16.msk.msra.mxu1 %vm7359_vm0, %v4180_v43 }
 0x23e   :  { %v1837_v41 = vsel %vm1834_vm1, %v1836_v19, %v1832_v0  ;;  %vm10273_vm13 = vweird.f32 %v7035_v14  ;;  %vm10274_vm5 = vweird.f32 %v6899_v51  ;;  %vm1819_vm7 = vcmp.eq.f32.partialorder %v1818_v34, 8.507059e+37  ;;  %4332 = vmatpush.bf16.msk.msra.mxu2 %vm7359_vm0, %v4180_v43  ;;  %4333 = vmatpush.bf16.msk.msra.mxu3 %vm7359_vm0, %v4180_v43 }
 0x23f   :  { %vm7519_vm9 = vmor %vm10274_vm5, %vm10273_vm13  ;;  %vm10277_vm15 = vcmp.ne.s32.totalorder %v10228_v63, 0  ;;  %v1853_v20 = vmul.f32 %v1852_v55, %v10278_v54  ;;  %v1802_v51 = vsel %vm7504_vm4, %v7038_v40, %v10279_v7  ;;  %vm1769_vm13 = vweird.f32 %v10280_v39  ;;  %v10281_v63 = vld [vmem:[#allocation232_spill] sm:$0xff]  ;;  %3330 = vperm.xlu2 %4359, %v3163_v52   ;;  %3345 = vperm.xlu1 %4361, %v3168_v44   ;;  %v10294_v55 = vld [vmem:[#allocation229_spill] sm:$0xff] }
 0x240   :  { %v3161_v6 = vsel %vm10277_vm15, 1, %v10133_v48  ;;  %v1775_v35 = vand.u32 2147483648, %v10280_v39  ;;  %v1822_v27 = vsel %vm1819_vm7, %v1821_v8, %v1817_v24  ;;  %v1787_v45 = vsel %vm7519_vm9, %v7035_v14, %v10281_v63  ;;  %vm7549_vm5 = vmor %vm1769_vm13, %vm1770_vm12  ;;  %v7558_v15 = vpop.permute.xlu2 %2326  ;;  %v2315_v32 = vpop.permute.xlu1 %2314 }
 0x241   :  { %v1753_v56 = vadd.f32 %v7064_v38, %v10282_v25  ;;  %v1773_v16 = vand.u32 2147483647, %v10280_v39  ;;  %v4183_v2 = vpack.c.bf16 %v1868_v57, %v1853_v20  ;;  %v1838_v9 = vmul.f32 %v1837_v41, %v10285_v12  ;;  %3324 = vperm.xlu0 %4360, %v3161_v6   ;;  %vm7571_vm12 = vmor %vm1754_vm2, %vm1755_vm6  ;;  %v7579_v30 = vpop.permute.xlu0 %2293  ;;  %v10302_v41 = vld [vmem:[#allocation134_spill] sm:$0xff]  ;;  %v10310_v25 = vld [vmem:[#allocation8_spill] sm:$0xff] }
 0x242   :  { %v1738_v49 = vadd.f32 %v7044_v42, %v10286_v37  ;;  %v1760_v14 = vand.u32 2147483648, %v6945_v50  ;;  %v1807_v34 = vsel %vm7424_vm8, %v10287_v4, %v1802_v51  ;;  %v1772_v28 = vsel %vm7549_vm5, %v10261_v47, %v7477_v59  ;;  %v10291_v59 = vld [vmem:[#allocation228_spill] sm:$0xff]  ;;  %v10307_v20 = vld [vmem:[#allocation130_spill] sm:$0xff]  ;;  %v10314_v12 = vld [vmem:[#allocation13_spill] sm:$0xff] }
 0x243   :  { %v1758_v0 = vand.u32 2147483647, %v6945_v50  ;;  %vm2478_vm1 = vcmp.eq.s32.totalorder %v4559_v5, %v7449_v18  ;;  %vm2477_vm8 = vcmp.eq.s32.totalorder %v4559_v5, %v2315_v32  ;;  %4184 = vmatpush.bf16.msk.msra.mxu0 %vm7359_vm0, %v4183_v2  ;;  %4334 = vmatpush.bf16.msk.msra.mxu1 %vm7359_vm0, %v4183_v2  ;;  %v1823_v47 = vmul.f32 %v1822_v27, %v10290_v61  ;;  %v10316_v37 = vld [vmem:[#allocation124_spill] sm:$0xff]  ;;  %v10317_v4 = vld [vmem:[#allocation47_spill] sm:$0xff] }
 0x244   :  { %v1723_v10 = vadd.f32 %v10264_v53, %v10291_v59  ;;  %v1745_v50 = vand.u32 2147483648, %v10265_v33  ;;  %v1776_v19 = vor.u32 1.1754944e-38, %v1775_v35  ;;  %vm7589_vm6 = vmpackc.low %vm2478_vm1, %vm2477_vm8  ;;  %4335 = vmatpush.bf16.msk.msra.mxu2 %vm7359_vm0, %v4183_v2  ;;  %4336 = vmatpush.bf16.msk.msra.mxu3 %vm7359_vm0, %v4183_v2  ;;  %v1792_v60 = vsel %vm7457_vm11, %v10294_v55, %v1787_v45  ;;  %v10309_v45 = vld [vmem:[#allocation3_spill] sm:$0xff]  ;;  %v10368_v59 = vld [vmem:[#allocation25_spill] sm:$0xff] }
 0x245   :  { %vm1774_vm2 = vcmp.eq.f32.partialorder %v1773_v16, 8.507059e+37  ;;  %v4186_v43 = vpack.c.bf16 %v1838_v9, %v1823_v47  ;;  %v1808_v57 = vmul.f32 %v1807_v34, %v10295_v1  ;;  %v1757_v24 = vsel %vm7571_vm12, %v7064_v38, %v1753_v56  ;;  %v10311_v56 = vld [vmem:[#allocation18_spill] sm:$0xff]  ;;  %v10318_v34 = vld [vmem:[#allocation51_spill] sm:$0xff]  ;;  %v10321_v47 = vld [vmem:[#allocation112_spill] sm:$0xff] }
 0x246   :  { %vm10296_vm4 = vweird.f32 %v10265_v33  ;;  %v1761_v8 = vor.u32 1.1754944e-38, %v1760_v14  ;;  %vm10299_vm11 = vcmp.ne.s32.totalorder %v10253_v31, 0  ;;  %vm10300_vm9 = vcmp.ne.s32.totalorder %v10254_v17, 0  ;;  %v10320_v61 = vld [vmem:[#allocation111_spill] sm:$0xff]  ;;  %v10339_v17 = vld [vmem:[#allocation24_spill] sm:$0xff]  ;;  %v10373_v1 = vld [vmem:[#allocation114_spill] sm:$0xff] }
 0x247   :  { %vm7608_vm14 = vmor %vm10296_vm4, %vm1740_vm3  ;;  %v3166_v21 = vsel %vm10299_vm11, 1, %v10133_v48  ;;  %v3171_v52 = vsel %vm10300_vm9, 1, %v10133_v48  ;;  %v1777_v44 = vsel %vm1774_vm2, %v1776_v19, %v1772_v28  ;;  %vm1759_vm7 = vcmp.eq.f32.partialorder %v1758_v0, 8.507059e+37  ;;  %4187 = vmatpush.bf16.msk.msra.mxu0 %vm7359_vm0, %v4186_v43  ;;  %4337 = vmatpush.bf16.msk.msra.mxu1 %vm7359_vm0, %v4186_v43 }
 0x248   :  { %vm10301_vm3 = vcmp.ne.s32.totalorder %v10259_v3, 0  ;;  %v1793_v62 = vmul.f32 %v1792_v60, %v10302_v41  ;;  %v1742_v31 = vsel %vm7608_vm14, %v7044_v42, %v1738_v49  ;;  %vm10303_vm15 = vweird.f32 %v10264_v53  ;;  %4338 = vmatpush.bf16.msk.msra.mxu2 %vm7359_vm0, %v4186_v43  ;;  %4339 = vmatpush.bf16.msk.msra.mxu3 %vm7359_vm0, %v4186_v43  ;;  %v2336_v27 = vpop.permute.xlu2 %2335  ;;  %v7649_v63 = vpop.permute.xlu1 %2323  ;;  %v10329_v43 = vld [vmem:[#allocation21_spill] sm:$0xff] }
 0x249   :  { %v3164_v38 = vsel %vm10301_vm3, 1, %v10133_v48  ;;  %vm7633_vm13 = vmor %vm1724_vm10, %vm10303_vm15  ;;  %v1746_v6 = vor.u32 1.1754944e-38, %v1745_v50  ;;  %v1762_v3 = vsel %vm1759_vm7, %v1761_v8, %v1757_v24  ;;  %v10306_v54 = vand.u32 2147483647, %v10265_v33  ;;  %3339 = vperm.xlu2 %4359, %v3166_v21   ;;  %3354 = vperm.xlu1 %4361, %v3171_v52   ;;  %v7656_v16 = vpop.permute.xlu0 %2302  ;;  %v10325_v50 = vld [vmem:[#allocation11_spill] sm:$0xff]  ;;  %v10332_v24 = vld [vmem:[#allocation16_spill] sm:$0xff] }
 0x24a   :  { %v4189_v42 = vpack.c.bf16 %v1808_v57, %v1793_v62  ;;  %v1778_v7 = vmul.f32 %v1777_v44, %v10307_v20  ;;  %v1727_v51 = vsel %vm7633_vm13, %v10264_v53, %v1723_v10  ;;  %v10308_v39 = vand.u32 2147483648, %v10272_v46  ;;  %3333 = vperm.xlu0 %4360, %v3164_v38   ;;  %v10313_v53 = vld [vmem:[#allocation127_spill] sm:$0xff]  ;;  %v10344_v20 = vld [vmem:[#allocation56_spill] sm:$0xff] }
 0x24b   :  { %vm1744_vm5 = vcmp.eq.f32.partialorder %v10306_v54, 8.507059e+37  ;;  %vm1591_vm10 = vcmp.ne.s32.totalorder %v10309_v45, 0  ;;  %vm551_vm12 = vcmp.ne.s32.totalorder %v10310_v25, 0  ;;  %vm556_vm1 = vcmp.ne.s32.totalorder %v10311_v56, 0  ;;  %v10351_v25 = vld [vmem:[#allocation27_spill] sm:$0xff] }
 0x24c   :  { %v1731_v35 = vor.u32 1.1754944e-38, %v10308_v39  ;;  %v1747_v33 = vsel %vm1744_vm5, %v1746_v6, %v1742_v31  ;;  %v10312_v40 = vand.u32 2147483647, %v10272_v46  ;;  %4190 = vmatpush.bf16.msk.msra.mxu0 %vm7359_vm0, %v4189_v42  ;;  %4340 = vmatpush.bf16.msk.msra.mxu1 %vm7359_vm0, %v4189_v42  ;;  %v1763_v2 = vmul.f32 %v1762_v3, %v10313_v53  ;;  %v10338_v31 = vld [vmem:[#allocation14_spill] sm:$0xff]  ;;  %v10340_v3 = vld [vmem:[#allocation19_spill] sm:$0xff]  ;;  %v10345_v39 = vld [vmem:[#allocation116_spill] sm:$0xff] }
 0x24d   :  { %vm549_vm2 = vcmp.ne.s32.totalorder %v10314_v12, 0  ;;  %4341 = vmatpush.bf16.msk.msra.mxu2 %vm7359_vm0, %v4189_v42  ;;  %4342 = vmatpush.bf16.msk.msra.mxu3 %vm7359_vm0, %v4189_v42  ;;  %vm10315_vm4 = vcmp.lt.s32.totalorder %v4559_v5, 3  ;;  %v1748_v49 = vmul.f32 %v1747_v33, %v10316_v37  ;;  %v3169_v14 = vsel %vm551_vm12, 1, %v10133_v48  ;;  %v10343_v42 = vld [vmem:[#allocation65_spill] sm:$0xff]  ;;  %v10391_v56 = vld [vmem:[#allocation71_spill] sm:$0xff]  ;;  %v10393_v12 = vld [vmem:[#allocation118_spill] sm:$0xff] }
 0x24e   :  { %vm1729_vm8 = vcmp.eq.f32.partialorder %v10312_v40, 8.507059e+37  ;;  %v4192_v9 = vpack.c.bf16 %v1778_v7, %v1763_v2  ;;  %vm1607_vm14 = vmand %vm1591_vm10, %vm10315_vm4  ;;  %v3174_v32 = vsel %vm556_vm1, 1, %v10133_v48  ;;  %vm2368_vm11 = vcmp.eq.s32.totalorder %v4559_v5, %v10317_v4  ;;  %v10350_v33 = vld [vmem:[#allocation17_spill] sm:$0xff]  ;;  %v10354_v40 = vld [vmem:[#allocation154_spill] sm:$0xff] }
 0x24f   :  { %v1732_v46 = vsel %vm1729_vm8, %v1731_v35, %v1727_v51  ;;  %vm2367_vm9 = vcmp.eq.s32.totalorder %v4559_v5, %v10318_v34  ;;  %v3167_v28 = vsel %vm549_vm2, 1, %v10133_v48  ;;  %vm2400_vm7 = vcmp.eq.s32.totalorder %v4559_v5, %v10320_v61  ;;  %vm10322_vm15 = vmmov %vm10315_vm4  ;;  %v10346_v35 = vld [vmem:[#allocation115_spill] sm:$0xff]  ;;  %v10367_v61 = vld [vmem:[#allocation30_spill] sm:$0xff] }
 0x250   :  { %4193 = vmatpush.bf16.msk.msra.mxu0 %vm7359_vm0, %v4192_v9  ;;  %4343 = vmatpush.bf16.msk.msra.mxu1 %vm7359_vm0, %v4192_v9  ;;  %v1733_v0 = vmul.f32 %v1732_v46, %v10319_v23  ;;  %vm2399_vm3 = vcmp.eq.s32.totalorder %v4559_v5, %v10321_v47  ;;  %vm7693_vm13 = vmpackc.low %vm10322_vm15, %vm1607_vm14  ;;  %vm554_vm5 = vcmp.ne.s32.totalorder %v10325_v50, 0  ;;  %v7707_v55 = vpop.permute.xlu2 %2344  ;;  %v2333_v60 = vpop.permute.xlu1 %2332  ;;  %vm559_vm12 = vcmp.ne.s32.totalorder %v10329_v43, 0  ;;  %v10357_v46 = vld [vmem:[#allocation226_spill] sm:$0xff] }
 0x251   :  { %4344 = vmatpush.bf16.msk.msra.mxu2 %vm7359_vm0, %v4192_v9  ;;  %4345 = vmatpush.bf16.msk.msra.mxu3 %vm7359_vm0, %v4192_v9  ;;  %vm7701_vm10 = vmpackc.low %vm2368_vm11, %vm2367_vm9  ;;  %vm2432_vm0 = vcmp.eq.s32.totalorder %v4559_v5, %v10328_v58  ;;  %vm2464_vm8 = vcmp.eq.s32.totalorder %v4559_v5, %v7345_v36  ;;  %vm2484_vm2 = vcmp.eq.s32.totalorder %v4559_v5, %v2336_v27  ;;  %v7721_v57 = vpop.permute.xlu0 %2311  ;;  %vm552_vm14 = vcmp.ne.s32.totalorder %v10332_v24, 0  ;;  %v10336_v36 = vld [vmem:[#allocation224_spill] sm:$0xff]  ;;  %v10358_v9 = vld [vmem:[#allocation237_spill] sm:$0xff] }
 0x252   :  { %3348 = vperm.xlu2 %4359, %v3169_v14   ;;  %3363 = vperm.xlu1 %4361, %v3174_v32   ;;  %v4195_v10 = vpack.c.bf16 %v1748_v49, %v1733_v0  ;;  %vm7713_vm1 = vmpackc.low %vm2400_vm7, %vm2399_vm3  ;;  %vm2483_vm4 = vcmp.eq.s32.totalorder %v4559_v5, %v2333_v60  ;;  %vm2431_vm11 = vcmp.eq.s32.totalorder %v4559_v5, %v10333_v29  ;;  %v10334_v8 = vmov 0  ;;  %v10359_v49 = vld [vmem:[#allocation22_spill] sm:$0xff]  ;;  %v10366_v0 = vld [vmem:[#allocation20_spill] sm:$0xff] }
 0x253   :  { %3342 = vperm.xlu0 %4360, %v3167_v28   ;;  %vm7730_vm9 = vmpackc.low %vm2484_vm2, %vm2483_vm4  ;;  %vm2463_vm3 = vcmp.eq.s32.totalorder %v4559_v5, %v10336_v36  ;;  %v10337_v21 = vmov 1.0|1.0   ;;  %v3172_v52 = vsel %vm554_vm5, 1, %v10133_v48  ;;  %v3177_v44 = vsel %vm559_vm12, 1, %v10133_v48  ;;  %v10371_v58 = vld [vmem:[#allocation53_spill] sm:$0xff]  ;;  %v10374_v24 = vld [vmem:[#allocation119_spill] sm:$0xff] }
 0x254   :  { %4196 = vmatpush.bf16.msk.msra.mxu0 %vm7693_vm13, %v4195_v10  ;;  %4346 = vmatpush.bf16.msk.msra.mxu1 %vm7693_vm13, %v4195_v10  ;;  %v10335_v8 = vsel %vm7730_vm9, 4294967295, %v10334_v8  ;;  %vm4261_vm7 = vmpackc.low %vm2432_vm0, %vm2431_vm11  ;;  %v3170_v38 = vsel %vm552_vm14, 1, %v10133_v48  ;;  %vm555_vm5 = vcmp.ne.s32.totalorder %v10340_v3, 0  ;;  %vm2480_vm0 = vcmp.eq.s32.totalorder %v4559_v5, %v7649_v63  ;;  %v10347_v63 = vld [vmem:[#allocation160_spill] sm:$0xff]  ;;  %v10372_v60 = vld [vmem:[#allocation61_spill] sm:$0xff] }
 0x255   :  { %4347 = vmatpush.bf16.msk.msra.mxu2 %vm7693_vm13, %v4195_v10  ;;  %4348 = vmatpush.bf16.msk.msra.mxu3 %vm7693_vm13, %v4195_v10  ;;  %vm4293_vm15 = vmpackc.low %vm2464_vm8, %vm2463_vm3  ;;  %vm557_vm13 = vcmp.ne.s32.totalorder %v10338_v31, 0  ;;  %v10341_v54 = vmov 0  ;;  %vm2369_vm8 = vcmp.eq.s32.totalorder %v4559_v5, %v10343_v42  ;;  %vm2370_vm2 = vcmp.eq.s32.totalorder %v4559_v5, %v10344_v20  ;;  %v10375_v29 = vld [vmem:[#allocation159_spill] sm:$0xff] }
 0x256   :  { %v3175_v7 = vsel %vm557_vm13, 1, %v10133_v48  ;;  %vm2401_vm4 = vcmp.eq.s32.totalorder %v4559_v5, %v10345_v39  ;;  %vm2402_vm14 = vcmp.eq.s32.totalorder %v4559_v5, %v10346_v35  ;;  %v3173_v27 = vsel %vm555_vm5, 1, %v10133_v48  ;;  %v10386_v39 = vld [vmem:[#allocation36_spill] sm:$0xff] }
 0x257   :  { %4198 = vmatmul.msk.bf16.vlgmr.msra.gmra.mxu0 %vm7701_vm10, %v10337_v21  ;;  %4230 = vmatmul.msk.bf16.vlgmr.msra.gmra.mxu1 %vm7713_vm1, %v10337_v21  ;;  %vm562_vm10 = vcmp.ne.s32.totalorder %v10339_v17, 0  ;;  %vm2434_vm11 = vcmp.eq.s32.totalorder %v4559_v5, %v10347_v63  ;;  %vm7787_vm13 = vmpackc.low %vm2402_vm14, %vm2401_vm4  ;;  %vm558_vm4 = vcmp.ne.s32.totalorder %v10359_v49, 0  ;;  %vm2481_vm14 = vcmp.eq.s32.totalorder %v4559_v5, %v7558_v15  ;;  %v10381_v17 = vld [vmem:[#allocation28_spill] sm:$0xff] }
 0x258   :  { %4262 = vmatmul.msk.bf16.vlgmr.msra.gmra.mxu2 %vm4261_vm7, %v10337_v21  ;;  %4294 = vmatmul.msk.bf16.vlgmr.msra.gmra.mxu3 %vm4293_vm15, %v10337_v21  ;;  %v2354_v41 = vpop.permute.xlu2 %2353  ;;  %v2342_v62 = vpop.permute.xlu1 %2341  ;;  %v3180_v51 = vsel %vm562_vm10, 1, %v10133_v48  ;;  %vm7781_vm7 = vmpackc.low %vm2370_vm2, %vm2369_vm8  ;;  %vm2433_vm10 = vcmp.eq.s32.totalorder %v4559_v5, %v10354_v40  ;;  %v10360_v14 = vmov 0  ;;  %v10362_v32 = vmov 0 }
 0x259   :  { %v2321_v6 = vpop.permute.xlu0 %2320  ;;  %vm7795_vm5 = vmpackc.low %vm2434_vm11, %vm2433_vm10  ;;  %vm2490_vm8 = vcmp.eq.s32.totalorder %v4559_v5, %v2354_v41  ;;  %v3176_v34 = vsel %vm558_vm4, 1, %v10133_v48  ;;  %v10369_v10 = vmov 0  ;;  %vm2371_vm4 = vcmp.eq.s32.totalorder %v4559_v5, %v10371_v58  ;;  %v10379_v41 = vld [vmem:[#allocation33_spill] sm:$0xff]  ;;  %v10404_v58 = vld [vmem:[#allocation32_spill] sm:$0xff] }
 0x25a   :  { %3357 = vperm.xlu2 %4359, %v3172_v52   ;;  %3372 = vperm.xlu1 %4361, %v3177_v44   ;;  %vm2479_vm12 = vcmp.eq.s32.totalorder %v4559_v5, %v2321_v6  ;;  %v10382_v6 = vld [vmem:[#allocation239_spill] sm:$0xff]  ;;  %v10383_v3 = vmov 0  ;;  %v10388_v63 = vmov 0 }
 0x25b   :  { %3351 = vperm.xlu0 %4360, %v3170_v38   ;;  %vm7764_vm1 = vmpackc.low %vm2480_vm0, %vm2479_vm12  ;;  %vm2466_vm0 = vcmp.eq.s32.totalorder %v4559_v5, %v10357_v46  ;;  %vm2465_vm12 = vcmp.eq.s32.totalorder %v4559_v5, %v10358_v9  ;;  %v10378_v38 = vld [vmem:[#allocation23_spill] sm:$0xff]  ;;  %v10394_v46 = vld [vmem:[#allocation162_spill] sm:$0xff] }
 0x25c   :  { %v10342_v54 = vsel %vm7764_vm1, 4294967295, %v10341_v54  ;;  %vm4295_vm3 = vmpackc.low %vm2466_vm0, %vm2465_vm12  ;;  %vm561_vm0 = vcmp.ne.s32.totalorder %v10368_v59, 0  ;;  %vm2486_vm12 = vcmp.eq.s32.totalorder %v4559_v5, %v2342_v62  ;;  %v10380_v62 = vld [vmem:[#allocation158_spill] sm:$0xff] }
 0x25d   :  { %v3179_v43 = vsel %vm561_vm0, 1, %v10133_v48  ;;  %vm571_vm0 = vcmp.ne.s32.totalorder %v10379_v41, 0  ;;  %v10408_v41 = vld [vmem:[#allocation70_spill] sm:$0xff] }
 0x260   :  { %v7793_v53 = vpop.permute.xlu2 %2362  ;;  %v2351_v2 = vpop.permute.xlu1 %2350 }
 0x261   :  { %vm2489_vm2 = vcmp.eq.s32.totalorder %v4559_v5, %v2351_v2  ;;  %v2330_v37 = vpop.permute.xlu0 %2329  ;;  %v10392_v2 = vld [vmem:[#allocation117_spill] sm:$0xff] }
 0x262   :  { %3366 = vperm.xlu2 %4359, %v3175_v7   ;;  %3381 = vperm.xlu1 %4361, %v3180_v51   ;;  %vm7808_vm11 = vmpackc.low %vm2490_vm8, %vm2489_vm2  ;;  %vm2482_vm10 = vcmp.eq.s32.totalorder %v4559_v5, %v2330_v37  ;;  %vm10364_vm8 = vcmp.ne.s32.totalorder %v10350_v33, 0  ;;  %vm10365_vm2 = vcmp.ne.s32.totalorder %v10351_v25, 0  ;;  %v10385_v51 = vld [vmem:[#allocation26_spill] sm:$0xff]  ;;  %v10390_v25 = vld [vmem:[#allocation60_spill] sm:$0xff] }
 0x263   :  { %3360 = vperm.xlu0 %4360, %v3173_v27   ;;  %v10361_v14 = vsel %vm7808_vm11, 4294967295, %v10360_v14  ;;  %vm7813_vm15 = vmpackc.low %vm2482_vm10, %vm2481_vm14  ;;  %v3178_v15 = vsel %vm10364_vm8, 1, %v10133_v48  ;;  %v3183_v4 = vsel %vm10365_vm2, 1, %v10133_v48  ;;  %vm2372_vm14 = vcmp.eq.s32.totalorder %v4559_v5, %v10372_v60  ;;  %v10387_v27 = vld [vmem:[#allocation31_spill] sm:$0xff]  ;;  %v10405_v60 = vld [vmem:[#allocation42_spill] sm:$0xff] }
 0x264   :  { %v10363_v32 = vsel %vm7813_vm15, 4294967295, %v10362_v32  ;;  %vm2403_vm10 = vcmp.eq.s32.totalorder %v4559_v5, %v10373_v1  ;;  %vm2404_vm8 = vcmp.eq.s32.totalorder %v4559_v5, %v10374_v24  ;;  %vm2435_vm2 = vcmp.eq.s32.totalorder %v4559_v5, %v10375_v29  ;;  %v10406_v1 = vld [vmem:[#allocation37_spill] sm:$0xff] }
 0x265   :  { %vm2467_vm11 = vcmp.eq.s32.totalorder %v4559_v5, %v7464_v11  ;;  %vm2468_vm15 = vcmp.eq.s32.totalorder %v4559_v5, %v10382_v6 }
 0x267   :  { %4200 = vmatmul.msk.bf16.gmra.mxu0 %vm7781_vm7, %v10337_v21  ;;  %4232 = vmatmul.msk.bf16.gmra.mxu1 %vm7787_vm13, %v10337_v21  ;;  %vm563_vm7 = vcmp.ne.s32.totalorder %v10366_v0, 0  ;;  %vm568_vm13 = vcmp.ne.s32.totalorder %v10367_v61, 0  ;;  %v10400_v0 = vld [vmem:[#allocation34_spill] sm:$0xff]  ;;  %v10401_v61 = vld [vmem:[#allocation236_spill] sm:$0xff] }
 0x268   :  { %4264 = vmatmul.msk.bf16.gmra.mxu2 %vm7795_vm5, %v10337_v21  ;;  %4296 = vmatmul.msk.bf16.gmra.mxu3 %vm4295_vm3, %v10337_v21  ;;  %v7834_v28 = vpop.permute.xlu2 %3276  ;;  %v2360_v23 = vpop.permute.xlu1 %2359  ;;  %v3181_v50 = vsel %vm563_vm7, 1, %v10133_v48  ;;  %v3186_v19 = vsel %vm568_vm13, 1, %v10133_v48  ;;  %vm7858_vm7 = vmpackc.low %vm2372_vm14, %vm2371_vm4  ;;  %vm566_vm13 = vcmp.ne.s32.totalorder %v10378_v38, 0  ;;  %vm564_vm4 = vcmp.ne.s32.totalorder %v10381_v17, 0  ;;  %v10407_v38 = vld [vmem:[#allocation66_spill] sm:$0xff]  ;;  %v10411_v17 = vld [vmem:[#allocation169_spill] sm:$0xff] }
 0x269   :  { %v2339_v47 = vpop.permute.xlu0 %2338  ;;  %v3184_v11 = vsel %vm566_vm13, 1, %v10133_v48  ;;  %v3182_v42 = vsel %vm564_vm4, 1, %v10133_v48  ;;  %vm2374_vm13 = vcmp.eq.s32.totalorder %v4559_v5, %v10391_v56  ;;  %v10417_v56 = vld [vmem:[#allocation38_spill] sm:$0xff] }
 0x26a   :  { %3375 = vperm.xlu2 %4359, %v3178_v15   ;;  %3390 = vperm.xlu1 %4361, %v3183_v4   ;;  %vm2485_vm5 = vcmp.eq.s32.totalorder %v4559_v5, %v2339_v47  ;;  %v10397_v15 = vld [vmem:[#allocation29_spill] sm:$0xff]  ;;  %v10398_v4 = vld [vmem:[#allocation39_spill] sm:$0xff] }
 0x26b   :  { %3369 = vperm.xlu0 %4360, %v3176_v34   ;;  %vm7841_vm3 = vmpackc.low %vm2486_vm12, %vm2485_vm5  ;;  %vm2436_vm5 = vcmp.eq.s32.totalorder %v4559_v5, %v10380_v62  ;;  %v10399_v34 = vld [vmem:[#allocation163_spill] sm:$0xff] }
 0x26c   :  { %v10370_v10 = vsel %vm7841_vm3, 4294967295, %v10369_v10  ;;  %vm4233_vm12 = vmpackc.low %vm2404_vm8, %vm2403_vm10  ;;  %vm2487_vm3 = vcmp.eq.s32.totalorder %v4559_v5, %v7707_v55  ;;  %v3189_v55 = vsel %vm571_vm0, 1, %v10133_v48  ;;  %vm2406_vm0 = vcmp.eq.s32.totalorder %v4559_v5, %v10392_v2  ;;  %v10409_v62 = vld [vmem:[#allocation123_spill] sm:$0xff] }
 0x26d   :  { %vm4265_vm14 = vmpackc.low %vm2436_vm5, %vm2435_vm2  ;;  %vm2438_vm5 = vcmp.eq.s32.totalorder %v4559_v5, %v10394_v46  ;;  %v10419_v46 = vld [vmem:[#allocation43_spill] sm:$0xff] }
 0x26e   :  { %vm4297_vm10 = vmpackc.low %vm2468_vm15, %vm2467_vm11  ;;  %vm574_vm15 = vcmp.ne.s32.totalorder %v10386_v39, 0  ;;  %vm567_vm11 = vcmp.ne.s32.totalorder %v10387_v27, 0  ;;  %v10414_v39 = vld [vmem:[#allocation40_spill] sm:$0xff]  ;;  %v10416_v27 = vld [vmem:[#allocation238_spill] sm:$0xff] }
 0x26f   :  { %v3192_v33 = vsel %vm574_vm15, 1, %v10133_v48  ;;  %v3185_v40 = vsel %vm567_vm11, 1, %v10133_v48  ;;  %vm2437_vm15 = vcmp.eq.s32.totalorder %v4559_v5, %v10399_v34  ;;  %vm2470_vm11 = vcmp.eq.s32.totalorder %v4559_v5, %v7579_v30  ;;  %v10420_v34 = vld [vmem:[#allocation77_spill] sm:$0xff] }
 0x270   :  { %v7862_v52 = vpop.permute.xlu2 %3285  ;;  %v7864_v44 = vpop.permute.xlu1 %3273 }
 0x271   :  { %v2348_v31 = vpop.permute.xlu0 %2347 }
 0x272   :  { %3384 = vperm.xlu2 %4359, %v3181_v50   ;;  %3399 = vperm.xlu1 %4361, %v3186_v19   ;;  %vm2488_vm9 = vcmp.eq.s32.totalorder %v4559_v5, %v2348_v31  ;;  %v10410_v31 = vld [vmem:[#allocation122_spill] sm:$0xff] }
 0x273   :  { %3378 = vperm.xlu0 %4360, %v3179_v43   ;;  %vm7878_vm1 = vmpackc.low %vm2488_vm9, %vm2487_vm3  ;;  %vm569_vm9 = vcmp.ne.s32.totalorder %v10385_v51, 0  ;;  %vm2492_vm3 = vcmp.eq.s32.totalorder %v4559_v5, %v2360_v23 }
 0x274   :  { %v10384_v3 = vsel %vm7878_vm1, 4294967295, %v10383_v3  ;;  %v3187_v45 = vsel %vm569_vm9, 1, %v10133_v48 }
 0x277   :  { %4202 = vmatmul.msk.bf16.gmra.mxu0 %vm7858_vm7, %v10337_v21  ;;  %4234 = vmatmul.msk.bf16.gmra.mxu1 %vm4233_vm12, %v10337_v21  ;;  %vm2373_vm7 = vcmp.eq.s32.totalorder %v4559_v5, %v10390_v25  ;;  %vm2405_vm12 = vcmp.eq.s32.totalorder %v4559_v5, %v10393_v12 }
 0x278   :  { %4266 = vmatmul.msk.bf16.gmra.mxu2 %vm4265_vm14, %v10337_v21  ;;  %4298 = vmatmul.msk.bf16.gmra.mxu3 %vm4297_vm10, %v10337_v21  ;;  %v7891_v20 = vpop.permute.xlu2 %3294  ;;  %v7893_v7 = vpop.permute.xlu1 %3282  ;;  %vm7917_vm4 = vmpackc.low %vm2374_vm13, %vm2373_vm7  ;;  %vm572_vm14 = vcmp.ne.s32.totalorder %v10397_v15, 0  ;;  %vm577_vm10 = vcmp.ne.s32.totalorder %v10398_v4, 0  ;;  %vm2493_vm7 = vcmp.eq.s32.totalorder %v4559_v5, %v7793_v53 }
 0x279   :  { %v2357_v35 = vpop.permute.xlu0 %2356  ;;  %vm4235_vm9 = vmpackc.low %vm2406_vm0, %vm2405_vm12  ;;  %v3190_v30 = vsel %vm572_vm14, 1, %v10133_v48  ;;  %v3195_v53 = vsel %vm577_vm10, 1, %v10133_v48  ;;  %vm580_vm12 = vcmp.ne.s32.totalorder %v10405_v60, 0  ;;  %vm2375_vm14 = vcmp.eq.s32.totalorder %v4559_v5, %v10408_v41  ;;  %v10429_v41 = vld [vmem:[#allocation44_spill] sm:$0xff] }
 0x27a   :  { %3393 = vperm.xlu2 %4359, %v3184_v11   ;;  %3408 = vperm.xlu1 %4361, %v3189_v55   ;;  %vm2491_vm8 = vcmp.eq.s32.totalorder %v4559_v5, %v2357_v35  ;;  %v3198_v29 = vsel %vm580_vm12, 1, %v10133_v48  ;;  %vm2407_vm10 = vcmp.eq.s32.totalorder %v4559_v5, %v10409_v62  ;;  %v10412_v11 = vld [vmem:[#allocation35_spill] sm:$0xff]  ;;  %v10413_v55 = vld [vmem:[#allocation45_spill] sm:$0xff] }
 0x27b   :  { %3387 = vperm.xlu0 %4360, %v3182_v42   ;;  %vm7900_vm2 = vmpackc.low %vm2492_vm3, %vm2491_vm8  ;;  %vm570_vm3 = vcmp.ne.s32.totalorder %v10400_v0, 0  ;;  %v10415_v35 = vld [vmem:[#allocation161_spill] sm:$0xff]  ;;  %v10422_v0 = vld [vmem:[#allocation120_spill] sm:$0xff] }
 0x27c   :  { %v10389_v63 = vsel %vm7900_vm2, 4294967295, %v10388_v63  ;;  %vm4267_vm8 = vmpackc.low %vm2438_vm5, %vm2437_vm15  ;;  %vm2469_vm2 = vcmp.eq.s32.totalorder %v4559_v5, %v10401_v61  ;;  %v3188_v59 = vsel %vm570_vm3, 1, %v10133_v48  ;;  %vm573_vm5 = vcmp.ne.s32.totalorder %v10406_v1, 0  ;;  %v10423_v61 = vld [vmem:[#allocation128_spill] sm:$0xff] }
 0x27d   :  { %vm4299_vm0 = vmpackc.low %vm2470_vm11, %vm2469_vm2  ;;  %vm575_vm2 = vcmp.ne.s32.totalorder %v10404_v58, 0  ;;  %v3191_v36 = vsel %vm573_vm5, 1, %v10133_v48  ;;  %vm2440_vm15 = vcmp.eq.s32.totalorder %v4559_v5, %v10411_v17  ;;  %vm578_vm11 = vcmp.ne.s32.totalorder %v10412_v11, 0  ;;  %v10426_v58 = vld [vmem:[#allocation54_spill] sm:$0xff] }
 0x27e   :  { %v3193_v24 = vsel %vm575_vm2, 1, %v10133_v48  ;;  %vm2439_vm2 = vcmp.eq.s32.totalorder %v4559_v5, %v10415_v35  ;;  %vm2472_vm5 = vcmp.eq.s32.totalorder %v4559_v5, %v10416_v27  ;;  %v10432_v17 = vld [vmem:[#allocation50_spill] sm:$0xff]  ;;  %v10433_v27 = vld [vmem:[#allocation72_spill] sm:$0xff] }
 0x27f   :  { %vm4269_vm12 = vmpackc.low %vm2440_vm15, %vm2439_vm2  ;;  %vm2377_vm15 = vcmp.eq.s32.totalorder %v4559_v5, %v10420_v34  ;;  %vm589_vm2 = vcmp.ne.s32.totalorder %v10426_v58, 0  ;;  %v10443_v34 = vld [vmem:[#allocation175_spill] sm:$0xff] }
 0x280   :  { %v7921_v37 = vpop.permute.xlu2 %3303  ;;  %v7923_v49 = vpop.permute.xlu1 %3291 }
 0x281   :  { %v2366_v23 = vpop.permute.xlu0 %2365 }
 0x282   :  { %3402 = vperm.xlu2 %4359, %v3187_v45   ;;  %3417 = vperm.xlu1 %4361, %v3192_v33   ;;  %vm2494_vm13 = vcmp.eq.s32.totalorder %v4559_v5, %v2366_v23  ;;  %v10421_v23 = vld [vmem:[#allocation76_spill] sm:$0xff] }
 0x283   :  { %3396 = vperm.xlu0 %4360, %v3185_v40   ;;  %vm7937_vm1 = vmpackc.low %vm2494_vm13, %vm2493_vm7  ;;  %vm2471_vm7 = vcmp.eq.s32.totalorder %v4559_v5, %v7332_v13  ;;  %vm576_vm13 = vcmp.ne.s32.totalorder %v10414_v39, 0  ;;  %v3196_v13 = vsel %vm578_vm11, 1, %v10133_v48  ;;  %v10418_v40 = vld [vmem:[#allocation49_spill] sm:$0xff]  ;;  %vm2378_vm11 = vcmp.eq.s32.totalorder %v4559_v5, %v10421_v23 }
 0x284   :  { %v3194_v33 = vsel %vm576_vm13, 1, %v10133_v48 }
 0x287   :  { %4204 = vmatmul.msk.bf16.gmra.mxu0 %vm7917_vm4, %v10337_v21  ;;  %4236 = vmatmul.msk.bf16.gmra.mxu1 %vm4235_vm9, %v10337_v21  ;;  %vm2376_vm4 = vcmp.eq.s32.totalorder %v4559_v5, %v10407_v38  ;;  %vm2408_vm9 = vcmp.eq.s32.totalorder %v4559_v5, %v10410_v31 }
 0x288   :  { %4268 = vmatmul.msk.bf16.gmra.mxu2 %vm4267_vm8, %v10337_v21  ;;  %4300 = vmatmul.msk.bf16.gmra.mxu3 %vm4299_vm0, %v10337_v21  ;;  %v7950_v50 = vpop.permute.xlu2 %3312  ;;  %v7952_v19 = vpop.permute.xlu1 %3300  ;;  %vm4205_vm3 = vmpackc.low %vm2376_vm4, %vm2375_vm14  ;;  %vm583_vm8 = vcmp.ne.s32.totalorder %v10413_v55, 0  ;;  %vm581_vm14 = vcmp.ne.s32.totalorder %v10417_v56, 0  ;;  %v10437_v56 = vld [vmem:[#allocation171_spill] sm:$0xff] }
 0x289   :  { %v7956_v43 = vpop.permute.xlu0 %3279  ;;  %vm4237_vm0 = vmpackc.low %vm2408_vm9, %vm2407_vm10  ;;  %v3201_v45 = vsel %vm583_vm8, 1, %v10133_v48  ;;  %vm586_vm10 = vcmp.ne.s32.totalorder %v10418_v40, 0  ;;  %vm579_vm9 = vcmp.ne.s32.totalorder %v10419_v46, 0  ;;  %v3199_v9 = vsel %vm581_vm14, 1, %v10133_v48  ;;  %v10438_v40 = vld [vmem:[#allocation48_spill] sm:$0xff]  ;;  %v10439_v46 = vld [vmem:[#allocation63_spill] sm:$0xff] }
 0x28a   :  { %3411 = vperm.xlu2 %4359, %v3190_v30   ;;  %3426 = vperm.xlu1 %4361, %v3195_v53   ;;  %vm4301_vm4 = vmpackc.low %vm2472_vm5, %vm2471_vm7  ;;  %v3204_v15 = vsel %vm586_vm10, 1, %v10133_v48  ;;  %v3197_v4 = vsel %vm579_vm9, 1, %v10133_v48  ;;  %vm2410_vm8 = vcmp.eq.s32.totalorder %v4559_v5, %v10423_v61  ;;  %v10424_v30 = vld [vmem:[#allocation166_spill] sm:$0xff]  ;;  %vm2474_vm9 = vcmp.eq.s32.totalorder %v4559_v5, %v7451_v22 }
 0x28b   :  { %3405 = vperm.xlu0 %4360, %v3188_v59   ;;  %vm2441_vm7 = vcmp.eq.s32.totalorder %v4559_v5, %v10424_v30  ;;  %v10425_v59 = vld [vmem:[#allocation41_spill] sm:$0xff]  ;;  %v10430_v22 = vld [vmem:[#allocation58_spill] sm:$0xff]  ;;  %v10444_v30 = vld [vmem:[#allocation52_spill] sm:$0xff] }
 0x28c   :  { %vm584_vm13 = vcmp.ne.s32.totalorder %v10425_v59, 0 }
 0x290   :  { %v7972_v6 = vpop.permute.xlu1 %3309 }
 0x291   :  { %v7978_v42 = vpop.permute.xlu2 %3321  ;;  %v7980_v51 = vpop.permute.xlu0 %3288 }
 0x292   :  { %3420 = vperm.xlu2 %4359, %v3193_v24   ;;  %3435 = vperm.xlu1 %4361, %v3198_v29   ;;  %v10427_v24 = vld [vmem:[#allocation46_spill] sm:$0xff]  ;;  %v10428_v29 = vld [vmem:[#allocation164_spill] sm:$0xff] }
 0x293   :  { %3414 = vperm.xlu0 %4360, %v3191_v36   ;;  %vm582_vm5 = vcmp.ne.s32.totalorder %v10427_v24, 0  ;;  %vm2442_vm14 = vcmp.eq.s32.totalorder %v4559_v5, %v10428_v29  ;;  %v3207_v36 = vsel %vm589_vm2, 1, %v10133_v48  ;;  %v10448_v24 = vld [vmem:[#allocation59_spill] sm:$0xff] }
 0x294   :  { %vm4271_vm10 = vmpackc.low %vm2442_vm14, %vm2441_vm7  ;;  %v3200_v38 = vsel %vm582_vm5, 1, %v10133_v48  ;;  %vm2379_vm7 = vcmp.eq.s32.totalorder %v4559_v5, %v10433_v27  ;;  %vm595_vm14 = vcmp.ne.s32.totalorder %v10439_v46, 0  ;;  %v10455_v27 = vld [vmem:[#allocation181_spill] sm:$0xff] }
 0x297   :  { %4206 = vmatmul.msk.bf16.gmra.mxu0 %vm4205_vm3, %v10337_v21  ;;  %4238 = vmatmul.msk.bf16.gmra.mxu1 %vm4237_vm0, %v10337_v21  ;;  %vm2409_vm3 = vcmp.eq.s32.totalorder %v4559_v5, %v10422_v0  ;;  %vm4207_vm0 = vmpackc.low %vm2378_vm11, %vm2377_vm15  ;;  %vm587_vm11 = vcmp.ne.s32.totalorder %v10429_v41, 0  ;;  %v3213_v0 = vsel %vm595_vm14, 1, %v10133_v48  ;;  %v10449_v41 = vld [vmem:[#allocation81_spill] sm:$0xff] }
 0x298   :  { %4270 = vmatmul.msk.bf16.gmra.mxu2 %vm4269_vm12, %v10337_v21  ;;  %4302 = vmatmul.msk.bf16.gmra.mxu3 %vm4301_vm4, %v10337_v21  ;;  %v7994_v25 = vpop.permute.xlu1 %3318  ;;  %vm2473_vm12 = vcmp.eq.s32.totalorder %v4559_v5, %v7656_v16  ;;  %vm4239_vm4 = vmpackc.low %vm2410_vm8, %vm2409_vm3  ;;  %v3202_v16 = vsel %vm584_vm13, 1, %v10133_v48  ;;  %vm592_vm3 = vcmp.ne.s32.totalorder %v10430_v22, 0  ;;  %vm585_vm8 = vcmp.ne.s32.totalorder %v10432_v17, 0  ;;  %v10450_v22 = vld [vmem:[#allocation82_spill] sm:$0xff]  ;;  %v10451_v17 = vld [vmem:[#allocation132_spill] sm:$0xff] }
 0x299   :  { %v7998_v2 = vpop.permute.xlu2 %3330  ;;  %v8000_v12 = vpop.permute.xlu0 %3297  ;;  %vm4303_vm15 = vmpackc.low %vm2474_vm9, %vm2473_vm12  ;;  %v3205_v55 = vsel %vm587_vm11, 1, %v10133_v48  ;;  %v3210_v39 = vsel %vm592_vm3, 1, %v10133_v48  ;;  %v3203_v35 = vsel %vm585_vm8, 1, %v10133_v48  ;;  %vm2444_vm12 = vcmp.eq.s32.totalorder %v4559_v5, %v10437_v56 }
 0x29a   :  { %3429 = vperm.xlu2 %4359, %v3196_v13   ;;  %3444 = vperm.xlu1 %4361, %v3201_v45   ;;  %v10434_v13 = vld [vmem:[#allocation86_spill] sm:$0xff]  ;;  %v10435_v45 = vld [vmem:[#allocation125_spill] sm:$0xff]  ;;  %vm2443_vm11 = vcmp.eq.s32.totalorder %v4559_v5, %v10443_v34  ;;  %vm2475_vm8 = vcmp.eq.s32.totalorder %v4559_v5, %v7330_v26  ;;  %v10445_v26 = vld [vmem:[#allocation68_spill] sm:$0xff] }
 0x29b   :  { %3423 = vperm.xlu0 %4360, %v3194_v33   ;;  %vm2380_vm13 = vcmp.eq.s32.totalorder %v4559_v5, %v10434_v13  ;;  %v10436_v33 = vld [vmem:[#allocation126_spill] sm:$0xff]  ;;  %vm4273_vm3 = vmpackc.low %vm2444_vm12, %vm2443_vm11  ;;  %vm2382_vm12 = vcmp.eq.s32.totalorder %v4559_v5, %v10449_v41  ;;  %v10465_v41 = vld [vmem:[#allocation91_spill] sm:$0xff] }
 0x29c   :  { %vm2411_vm2 = vcmp.eq.s32.totalorder %v4559_v5, %v10436_v33  ;;  %vm4209_vm5 = vmpackc.low %vm2380_vm13, %vm2379_vm7  ;;  %vm593_vm13 = vcmp.ne.s32.totalorder %v10444_v30, 0  ;;  %v10457_v33 = vld [vmem:[#allocation64_spill] sm:$0xff] }
 0x2a0   :  { %v8016_v53 = vpop.permute.xlu1 %3327 }
 0x2a1   :  { %v8024_v1 = vpop.permute.xlu0 %3306 }
 0x2a2   :  { %3438 = vperm.xlu2 %4359, %v3199_v9   ;;  %3453 = vperm.xlu1 %4361, %v3204_v15  }
 0x2a3   :  { %3432 = vperm.xlu0 %4360, %v3197_v4   ;;  %v8022_v60 = vpop.permute.xlu2 %3339  ;;  %v10442_v4 = vld [vmem:[#allocation55_spill] sm:$0xff] }
 0x2a4   :  { %vm588_vm9 = vcmp.ne.s32.totalorder %v10442_v4, 0 }
 0x2a5   :  { %v3206_v61 = vsel %vm588_vm9, 1, %v10133_v48 }
 0x2a7   :  { %4208 = vmatmul.msk.bf16.gmra.mxu0 %vm4207_vm0, %v10337_v21  ;;  %4240 = vmatmul.msk.bf16.gmra.mxu1 %vm4239_vm4, %v10337_v21  ;;  %vm2412_vm0 = vcmp.eq.s32.totalorder %v4559_v5, %v10435_v45  ;;  %vm590_vm4 = vcmp.ne.s32.totalorder %v10438_v40, 0  ;;  %v10459_v40 = vld [vmem:[#allocation170_spill] sm:$0xff] }
 0x2a8   :  { %4272 = vmatmul.msk.bf16.gmra.mxu2 %vm4271_vm10, %v10337_v21  ;;  %4304 = vmatmul.msk.bf16.gmra.mxu3 %vm4303_vm15, %v10337_v21  ;;  %vm2476_vm10 = vcmp.eq.s32.totalorder %v4559_v5, %v7721_v57  ;;  %vm4241_vm15 = vmpackc.low %vm2412_vm0, %vm2411_vm2  ;;  %v3208_v57 = vsel %vm590_vm4, 1, %v10133_v48  ;;  %vm598_vm0 = vcmp.ne.s32.totalorder %v10445_v26, 0  ;;  %vm591_vm2 = vcmp.ne.s32.totalorder %v10448_v24, 0  ;;  %v10462_v26 = vld [vmem:[#allocation69_spill] sm:$0xff] }
 0x2a9   :  { %v8042_v31 = vpop.permute.xlu1 %3336  ;;  %vm4305_vm7 = vmpackc.low %vm2476_vm10, %vm2475_vm8  ;;  %vm2413_vm4 = vcmp.eq.s32.totalorder %v4559_v5, %v10451_v17  ;;  %v10467_v17 = vld [vmem:[#allocation136_spill] sm:$0xff] }
 0x2aa   :  { %3447 = vperm.xlu2 %4359, %v3202_v16   ;;  %3462 = vperm.xlu1 %4361, %v3207_v36   ;;  %v8045_v11 = vpop.permute.xlu0 %3315  ;;  %v3211_v16 = vsel %vm593_vm13, 1, %v10133_v48  ;;  %v3216_v36 = vsel %vm598_vm0, 1, %v10133_v48 }
 0x2ab   :  { %3441 = vperm.xlu0 %4360, %v3200_v38   ;;  %v3209_v38 = vsel %vm591_vm2, 1, %v10133_v48 }
 0x2ac   :  { %v8040_v62 = vpop.permute.xlu2 %3348 }
 0x2ad   :  { %10431 = vst [vmem:[#allocation9_spill] sm:$0xff] %v8040_v62 }
 0x2b1   :  { %v8066_v15 = vpop.permute.xlu1 %3345 }
 0x2b2   :  { %3456 = vperm.xlu2 %4359, %v3205_v55   ;;  %3471 = vperm.xlu1 %4361, %v3210_v39   ;;  %10441 = vst [vmem:[#allocation4_spill] sm:$0xff] %v8066_v15  ;;  %v10452_v55 = vld [vmem:[#allocation131_spill] sm:$0xff]  ;;  %v10453_v39 = vld [vmem:[#allocation57_spill] sm:$0xff] }
 0x2b3   :  { %3450 = vperm.xlu0 %4360, %v3203_v35   ;;  %v8071_v23 = vpop.permute.xlu0 %3324  ;;  %vm2414_vm14 = vcmp.eq.s32.totalorder %v4559_v5, %v10452_v55  ;;  %vm596_vm10 = vcmp.ne.s32.totalorder %v10453_v39, 0  ;;  %v10454_v35 = vld [vmem:[#allocation74_spill] sm:$0xff]  ;;  %v10468_v55 = vld [vmem:[#allocation67_spill] sm:$0xff]  ;;  %v10469_v39 = vld [vmem:[#allocation84_spill] sm:$0xff] }
 0x2b4   :  { %v8064_v9 = vpop.permute.xlu2 %3357  ;;  %vm601_vm9 = vcmp.ne.s32.totalorder %v10454_v35, 0  ;;  %vm4243_vm8 = vmpackc.low %vm2414_vm14, %vm2413_vm4  ;;  %v3214_v46 = vsel %vm596_vm10, 1, %v10133_v48  ;;  %vm2416_vm14 = vcmp.eq.s32.totalorder %v4559_v5, %v10467_v17  ;;  %vm602_vm10 = vcmp.ne.s32.totalorder %v10468_v55, 0  ;;  %v10470_v35 = vld [vmem:[#allocation180_spill] sm:$0xff] }
 0x2b5   :  { %10440 = vst [vmem:[#allocation5_spill] sm:$0xff] %v8064_v9  ;;  %v3219_v4 = vsel %vm601_vm9, 1, %v10133_v48  ;;  %vm607_vm9 = vcmp.ne.s32.totalorder %v10469_v39, 0  ;;  %v10477_v39 = vld [vmem:[#allocation80_spill] sm:$0xff] }
 0x2b7   :  { %4210 = vmatmul.msk.bf16.gmra.mxu0 %vm4209_vm5, %v10337_v21  ;;  %4242 = vmatmul.msk.bf16.gmra.mxu1 %vm4241_vm15, %v10337_v21  ;;  %vm2381_vm5 = vcmp.eq.s32.totalorder %v4559_v5, %v10450_v22  ;;  %vm2446_vm15 = vcmp.eq.s32.totalorder %v4559_v5, %v10455_v27  ;;  %v10466_v22 = vld [vmem:[#allocation129_spill] sm:$0xff] }
 0x2b8   :  { %4274 = vmatmul.msk.bf16.gmra.mxu2 %vm4273_vm3, %v10337_v21  ;;  %4306 = vmatmul.msk.bf16.gmra.mxu3 %vm4305_vm7, %v10337_v21  ;;  %vm4211_vm11 = vmpackc.low %vm2382_vm12, %vm2381_vm5  ;;  %vm594_vm3 = vcmp.ne.s32.totalorder %v10457_v33, 0  ;;  %vm2445_vm7 = vcmp.eq.s32.totalorder %v4559_v5, %v10459_v40  ;;  %vm597_vm12 = vcmp.ne.s32.totalorder %v10462_v26, 0  ;;  %vm2384_vm5 = vcmp.eq.s32.totalorder %v4559_v5, %v10465_v41  ;;  %v10471_v40 = vld [vmem:[#allocation75_spill] sm:$0xff] }
 0x2b9   :  { %vm4275_vm13 = vmpackc.low %vm2446_vm15, %vm2445_vm7  ;;  %v3212_v34 = vsel %vm594_vm3, 1, %v10133_v48  ;;  %vm2415_vm4 = vcmp.eq.s32.totalorder %v4559_v5, %v10466_v22  ;;  %vm2447_vm15 = vcmp.eq.s32.totalorder %v4559_v5, %v10470_v35  ;;  %vm600_vm3 = vcmp.ne.s32.totalorder %v10471_v40, 0  ;;  %v10475_v22 = vld [vmem:[#allocation73_spill] sm:$0xff] }
 0x2ba   :  { %3465 = vperm.xlu2 %4359, %v3208_v57   ;;  %3480 = vperm.xlu1 %4361, %v3213_v0   ;;  %v10460_v57 = vld [vmem:[#allocation62_spill] sm:$0xff]  ;;  %v10461_v0 = vld [vmem:[#allocation79_spill] sm:$0xff] }
 0x2bb   :  { %3459 = vperm.xlu0 %4360, %v3206_v61   ;;  %v8086_v58 = vpop.permute.xlu1 %3354  ;;  %vm599_vm0 = vcmp.ne.s32.totalorder %v10460_v57, 0  ;;  %vm604_vm2 = vcmp.ne.s32.totalorder %v10461_v0, 0  ;;  %v4394_v57 = vld [vmem:[%s9730_s2] sm:$0xff] }
 0x2bc   :  { %v8084_v59 = vpop.permute.xlu2 %3366  ;;  %10447 = vst [vmem:[#allocation7_spill] sm:$0xff] %v8086_v58  ;;  %v8089_v29 = vpop.permute.xlu0 %3333  ;;  %v3217_v18 = vsel %vm599_vm0, 1, %v10133_v48 }
 0x2bd   :  { %10446 = vst [vmem:[#allocation12_spill] sm:$0xff] %v8084_v59 }
 0x2c2   :  { %3474 = vperm.xlu2 %4359, %v3211_v16   ;;  %3489 = vperm.xlu1 %4361, %v3216_v36   ;;  %v3222_v16 = vsel %vm604_vm2, 1, %v10133_v48  ;;  %v3215_v36 = vsel %vm597_vm12, 1, %v10133_v48  ;;  %vm3656_vm2 = vcmp.eq.s32.totalorder %v7864_v44, 1  ;;  %vm10474_vm12 = vnez %v10342_v54  ;;  %v10476_v54 = vld [vmem:[#allocation89_spill] sm:$0xff] }
 0x2c3   :  { %3468 = vperm.xlu0 %4360, %v3209_v38   ;;  %v10464_v38 = vld [vmem:[#allocation92_spill] sm:$0xff]  ;;  %v3218_v44 = vsel %vm600_vm3, 1, %v10133_v48 }
 0x2c4   :  { %v8106_v13 = vpop.permute.xlu2 %3375  ;;  %v8108_v45 = vpop.permute.xlu1 %3363 }
 0x2c5   :  { %10456 = vst [vmem:[#allocation6_spill] sm:$0xff] %v8108_v45  ;;  %v8111_v56 = vpop.permute.xlu0 %3342 }
 0x2c6   :  { %10458 = vst [vmem:[#allocation15_spill] sm:$0xff] %v8111_v56  ;;  %v10533_v56 = vld [vmem:[#allocation168_spill] sm:$0xff] }
 0x2c7   :  { %4212 = vmatmul.msk.bf16.gmra.mxu0 %vm4211_vm11, %v10337_v21  ;;  %4244 = vmatmul.msk.bf16.gmra.mxu1 %vm4243_vm8, %v10337_v21  ;;  %vm4245_vm8 = vmpackc.low %vm2416_vm14, %vm2415_vm4  ;;  %vm603_vm4 = vcmp.ne.s32.totalorder %v10477_v39, 0  ;;  %vm3657_vm14 = vcmp.eq.s32.totalorder %v7834_v28, 1  ;;  %v10480_v39 = vld [vmem:[#allocation135_spill] sm:$0xff] }
 0x2c8   :  { %4276 = vmatmul.msk.bf16.gmra.mxu2 %vm4275_vm13, %v10337_v21  ;;  %4308 = vmatmul.msk.bf16.gmra.mxu3 %vm7589_vm6, %v10337_v21  ;;  %vm2383_vm6 = vcmp.eq.s32.totalorder %v4559_v5, %v10464_v38  ;;  %vm3912_vm13 = vcmask 56320   ;;  %vm2417_vm3 = vcmp.eq.s32.totalorder %v4559_v5, %v10480_v39 }
 0x2c9   :  { %vm4213_vm11 = vmpackc.low %vm2384_vm5, %vm2383_vm6  ;;  %vm605_vm6 = vcmp.ne.s32.totalorder %v10475_v22, 0  ;;  %vm610_vm5 = vcmp.ne.s32.totalorder %v10476_v54, 0  ;;  %v10478_v54 = vld [vmem:[#allocation87_spill] sm:$0xff] }
 0x2ca   :  { %3483 = vperm.xlu2 %4359, %v3214_v46   ;;  %3498 = vperm.xlu1 %4361, %v3219_v4   ;;  %v3228_v28 = vsel %vm610_vm5, 1, %v10133_v48 }
 0x2cb   :  { %3477 = vperm.xlu0 %4360, %v3212_v34   ;;  %v10473_v34 = vld [vmem:[#allocation176_spill] sm:$0xff] }
 0x2cc   :  { %v8126_v61 = vpop.permute.xlu2 %3384  ;;  %v8128_v30 = vpop.permute.xlu1 %3372  ;;  %vm2448_vm7 = vcmp.eq.s32.totalorder %v4559_v5, %v10473_v34 }
 0x2cd   :  { %v8131_v24 = vpop.permute.xlu0 %3351  ;;  %vm4277_vm0 = vmpackc.low %vm2448_vm7, %vm2447_vm15  ;;  %vm2385_vm15 = vcmp.eq.s32.totalorder %v4559_v5, %v10478_v54 }
 0x2ce   :  { %10463 = vst [vmem:[#allocation155_spill] sm:$0xff] %v8131_v24 }
 0x2d2   :  { %3492 = vperm.xlu2 %4359, %v3217_v18   ;;  %3507 = vperm.xlu1 %4361, %v3222_v16   ;;  %v3220_v18 = vsel %vm602_vm10, 1, %v10133_v48  ;;  %v3225_v16 = vsel %vm607_vm9, 1, %v10133_v48  ;;  %vm3689_vm9 = vcmp.eq.s32.totalorder %v8128_v30, 1  ;;  %v10479_v30 = vld [vmem:[#allocation98_spill] sm:$0xff] }
 0x2d3   :  { %3486 = vperm.xlu0 %4360, %v3215_v36  }
 0x2d4   :  { %v8148_v27 = vpop.permute.xlu2 %3393  ;;  %v8150_v33 = vpop.permute.xlu1 %3381 }
 0x2d5   :  { %v8153_v46 = vpop.permute.xlu0 %3360  ;;  %v2696_v4 = vpop.f32.mrf.mxu0 }
 0x2d6   :  { %10472 = vst [vmem:[#allocation10_spill] sm:$0xff] %v8153_v46  ;;  %v3016_v0 = vsub.f32 %v4394_v57, %v2696_v4  ;;  %v2776_v26 = vpop.f32.mrf.mxu1 }
 0x2d7   :  { %4214 = vmatmul.msk.bf16.gmra.mxu0 %vm4213_vm11, %v10337_v21  ;;  %4246 = vmatmul.msk.bf16.gmra.mxu1 %vm4245_vm8, %v10337_v21  ;;  %vm2386_vm11 = vcmp.eq.s32.totalorder %v4559_v5, %v10479_v30 }
 0x2d8   :  { %v3784_v36 = vsel %vm3656_vm2, %v3016_v0, 0.0  ;;  %4278 = vmatmul.msk.bf16.gmra.mxu2 %vm4277_vm0, %v10337_v21  ;;  %4310 = vmatmul.msk.bf16.gmra.mxu3 %vm10474_vm12, %v10337_v21  ;;  %vm4215_vm2 = vmpackc.low %vm2386_vm11, %vm2385_vm15  ;;  %vm10487_vm15 = vnez %v10363_v32 }
 0x2d9   :  { %3913 = vst.msk [vmem:[%s9732_s3] sm:$0xff] %vm3912_vm13, %v3784_v36 }
 0x2da   :  { %3501 = vperm.xlu2 %4359, %v3220_v18   ;;  %3516 = vperm.xlu1 %4361, %v3225_v16  }
 0x2db   :  { %3495 = vperm.xlu0 %4360, %v3218_v44   ;;  %v8180_v38 = vpop.f32.mrf.mxu2  ;;  %v8182_v41 = vpop.f32.mrf.mxu3 }
 0x2dc   :  { %v8186_v17 = vpop.permute.xlu2 %3402  ;;  %v8188_v55 = vpop.permute.xlu1 %3390 }
 0x2dd   :  { %v3370_v4 = vpop.permute.xlu0 %3369  ;;  %v2698_v34 = vpop.f32.mrf.mxu0 }
 0x2de   :  { %vm3688_vm10 = vcmp.eq.s32.totalorder %v3370_v4, 1  ;;  %v2778_v18 = vpop.f32.mrf.mxu1 }
 0x2e0   :  { %v4395_v35 = vld [vmem:[%s9730_s2 + $0x100] sm:$0xff]  ;;  %v4396_v57 = vld [vmem:[%s9730_s2 + $0x8] sm:$0xff] }
 0x2e1   :  { %v3048_v40 = vsub.f32 %v4395_v35, %v2776_v26  ;;  %v3017_v0 = vsub.f32 %v4396_v57, %v2698_v34  ;;  %v4397_v36 = vld [vmem:[%s9730_s2 + $0x108] sm:$0xff]  ;;  %v3223_v26 = vsel %vm605_vm6, 1, %v10133_v48  ;;  %v10481_v57 = vld [vmem:[#allocation78_spill] sm:$0xff] }
 0x2e2   :  { %v3049_v44 = vsub.f32 %v4397_v36, %v2778_v18  ;;  %3510 = vperm.xlu2 %4359, %v3223_v26   ;;  %3525 = vperm.xlu1 %4361, %v3228_v28   ;;  %vm608_vm8 = vcmp.ne.s32.totalorder %v10481_v57, 0  ;;  %v10483_v18 = vld [vmem:[#allocation186_spill] sm:$0xff]  ;;  %v10485_v26 = vld [vmem:[#allocation133_spill] sm:$0xff] }
 0x2e3   :  { %v3816_v16 = vsel %vm3688_vm10, %v3048_v40, 0.0  ;;  %v3785_v35 = vsel %vm3657_vm14, %v3017_v0, 0.0  ;;  %v3221_v40 = vsel %vm603_vm4, 1, %v10133_v48  ;;  %v8229_v4 = vpop.f32.mrf.mxu2  ;;  %v8231_v34 = vpop.f32.mrf.mxu3  ;;  %v10482_v0 = vld [vmem:[#allocation95_spill] sm:$0xff]  ;;  %vm2450_vm0 = vcmp.eq.s32.totalorder %v4559_v5, %v10483_v18 }
 0x2e4   :  { %3945 = vst.msk [vmem:[%s9732_s3 + $0x100] sm:$0xff] %vm3912_vm13, %v3816_v16  ;;  %v3817_v22 = vsel %vm3689_vm9, %v3049_v44, 0.0  ;;  %3504 = vperm.xlu0 %4360, %v3221_v40   ;;  %vm613_vm7 = vcmp.ne.s32.totalorder %v10482_v0, 0  ;;  %v8237_v16 = vpop.permute.xlu2 %3411  ;;  %v8239_v36 = vpop.permute.xlu1 %3399  ;;  %v10484_v44 = vld [vmem:[#allocation85_spill] sm:$0xff]  ;;  %vm2418_vm6 = vcmp.eq.s32.totalorder %v4559_v5, %v10485_v26  ;;  %v10486_v40 = vld [vmem:[#allocation187_spill] sm:$0xff]  ;;  %vm3658_vm10 = vcmp.eq.s32.totalorder %v7956_v43, 1 }
 0x2e5   :  { %3914 = vst.msk [vmem:[%s9732_s3 + $0x8] sm:$0xff] %vm3912_vm13, %v3785_v35  ;;  %vm606_vm12 = vcmp.ne.s32.totalorder %v10484_v44, 0  ;;  %v3379_v28 = vpop.permute.xlu0 %3378  ;;  %v2701_v35 = vpop.f32.mrf.mxu0  ;;  %vm4247_vm5 = vmpackc.low %vm2418_vm6, %vm2417_vm3  ;;  %vm2449_vm4 = vcmp.eq.s32.totalorder %v4559_v5, %v10486_v40  ;;  %v3226_v26 = vsel %vm608_vm8, 1, %v10133_v48  ;;  %vm3690_vm9 = vcmp.eq.s32.totalorder %v8106_v13, 1  ;;  %v10489_v0 = vld [vmem:[#allocation83_spill] sm:$0xff] }
 0x2e6   :  { %3946 = vst.msk [vmem:[%s9732_s3 + $0x108] sm:$0xff] %vm3912_vm13, %v3817_v22  ;;  %v2781_v30 = vpop.f32.mrf.mxu1  ;;  %vm4279_vm14 = vmpackc.low %vm2450_vm0, %vm2449_vm4  ;;  %v3224_v40 = vsel %vm606_vm12, 1, %v10133_v48  ;;  %vm611_vm11 = vcmp.ne.s32.totalorder %v10489_v0, 0  ;;  %v10490_v44 = vld [vmem:[#allocation99_spill] sm:$0xff]  ;;  %vm3691_vm0 = vcmp.eq.s32.totalorder %v3379_v28, 1 }
 0x2e7   :  { %4216 = vmatmul.msk.bf16.gmra.mxu0 %vm4215_vm2, %v10337_v21  ;;  %4248 = vmatmul.msk.bf16.gmra.mxu1 %vm4247_vm5, %v10337_v21  ;;  %vm616_vm3 = vcmp.ne.s32.totalorder %v10490_v44, 0  ;;  %v3229_v0 = vsel %vm611_vm11, 1, %v10133_v48  ;;  %v10494_v28 = vld [vmem:[#allocation139_spill] sm:$0xff] }
 0x2e8   :  { %4280 = vmatmul.msk.bf16.gmra.mxu2 %vm4279_vm14, %v10337_v21  ;;  %4312 = vmatmul.msk.bf16.gmra.mxu3 %vm10487_vm15, %v10337_v21  ;;  %v3234_v44 = vsel %vm616_vm3, 1, %v10133_v48  ;;  %vm2420_vm6 = vcmp.eq.s32.totalorder %v4559_v5, %v10494_v28  ;;  %v10500_v28 = vld [vmem:[#allocation182_spill] sm:$0xff] }
 0x2e9   :  { %vm2451_vm3 = vcmp.eq.s32.totalorder %v4559_v5, %v10500_v28 }
 0x2ea   :  { %3519 = vperm.xlu2 %4359, %v3226_v26  }
 0x2eb   :  { %v8277_v32 = vpop.f32.mrf.mxu2  ;;  %v8279_v13 = vpop.f32.mrf.mxu3 }
 0x2ec   :  { %3513 = vperm.xlu0 %4360, %v3224_v40   ;;  %10488 = vst [vmem:[#allocation235_spill] sm:$0xff] %v8279_v13 }
 0x2ed   :  { %v4398_v22 = vld [vmem:[%s9730_s2 + $0x10] sm:$0xff] }
 0x2ee   :  { %v3018_v54 = vsub.f32 %v4398_v22, %v2701_v35  ;;  %v4399_v39 = vld [vmem:[%s9730_s2 + $0x110] sm:$0xff]  ;;  %v3231_v35 = vsel %vm613_vm7, 1, %v10133_v48  ;;  %v8283_v22 = vpop.permute.xlu2 %3420  ;;  %vm3659_vm7 = vcmp.eq.s32.totalorder %v7893_v7, 1  ;;  %v10492_v7 = vld [vmem:[#allocation93_spill] sm:$0xff] }
 0x2ef   :  { %v3050_v18 = vsub.f32 %v4399_v39, %v2781_v30  ;;  %3534 = vperm.xlu1 %4361, %v3231_v35   ;;  %v10491_v30 = vld [vmem:[#allocation90_spill] sm:$0xff]  ;;  %v8288_v39 = vpop.permute.xlu0 %3387  ;;  %vm2388_vm2 = vcmp.eq.s32.totalorder %v4559_v5, %v10492_v7 }
 0x2f0   :  { %v3786_v43 = vsel %vm3658_vm10, %v3018_v54, 0.0  ;;  %v8285_v54 = vpop.permute.xlu1 %3408  ;;  %vm609_vm8 = vcmp.ne.s32.totalorder %v10491_v30, 0 }
 0x2f1   :  { %3915 = vst.msk [vmem:[%s9732_s3 + $0x10] sm:$0xff] %vm3912_vm13, %v3786_v43  ;;  %v3818_v57 = vsel %vm3690_vm9, %v3050_v18, 0.0  ;;  %v2703_v18 = vpop.f32.mrf.mxu0  ;;  %v2783_v43 = vpop.f32.mrf.mxu1  ;;  %v3227_v59 = vsel %vm609_vm8, 1, %v10133_v48 }
 0x2f2   :  { %3947 = vst.msk [vmem:[%s9732_s3 + $0x110] sm:$0xff] %vm3912_vm13, %v3818_v57  ;;  %3528 = vperm.xlu2 %4359, %v3229_v0   ;;  %v10498_v0 = vld [vmem:[#allocation96_spill] sm:$0xff] }
 0x2f3   :  { %vm612_vm9 = vcmp.ne.s32.totalorder %v10498_v0, 0 }
 0x2f4   :  { %3522 = vperm.xlu0 %4360, %v3227_v59  }
 0x2f6   :  { %v8322_v7 = vpop.permute.xlu2 %3429 }
 0x2f7   :  { %3543 = vperm.xlu1 %4361, %v3234_v44   ;;  %v10499_v44 = vld [vmem:[#allocation141_spill] sm:$0xff]  ;;  %v8329_v59 = vpop.permute.xlu0 %3396 }
 0x2f8   :  { %vm2419_vm15 = vcmp.eq.s32.totalorder %v4559_v5, %v10499_v44 }
 0x2f9   :  { %v4400_v26 = vld [vmem:[%s9730_s2 + $0x18] sm:$0xff]  ;;  %vm4249_vm11 = vmpackc.low %vm2420_vm6, %vm2419_vm15  ;;  %v2786_v46 = vpop.f32.mrf.mxu1 }
 0x2fa   :  { %v3019_v35 = vsub.f32 %v4400_v26, %v2703_v18  ;;  %v4401_v40 = vld [vmem:[%s9730_s2 + $0x118] sm:$0xff]  ;;  %4250 = vmatmul.msk.bf16.gmra.mxu1 %vm4249_vm11, %v10337_v21 }
 0x2fb   :  { %v3051_v57 = vsub.f32 %v4401_v40, %v2783_v43  ;;  %v10493_v26 = vld [vmem:[#allocation97_spill] sm:$0xff]  ;;  %v8316_v43 = vpop.f32.mrf.mxu3  ;;  %v10495_v40 = vld [vmem:[#allocation88_spill] sm:$0xff] }
 0x2fc   :  { %v3787_v30 = vsel %vm3659_vm7, %v3019_v35, 0.0  ;;  %vm2387_vm12 = vcmp.eq.s32.totalorder %v4559_v5, %v10493_v26  ;;  %v8314_v35 = vpop.f32.mrf.mxu2  ;;  %vm614_vm5 = vcmp.ne.s32.totalorder %v10495_v40, 0  ;;  %v2706_v26 = vpop.f32.mrf.mxu0  ;;  %vm3660_vm7 = vcmp.eq.s32.totalorder %v7862_v52, 1 }
 0x2fd   :  { %3916 = vst.msk [vmem:[%s9732_s3 + $0x18] sm:$0xff] %vm3912_vm13, %v3787_v30  ;;  %v3819_v18 = vsel %vm3691_vm0, %v3051_v57, 0.0  ;;  %v10496_v57 = vld [vmem:[#allocation196_spill] sm:$0xff]  ;;  %v10497_v30 = vld [vmem:[#allocation167_spill] sm:$0xff]  ;;  %vm4217_vm10 = vmpackc.low %vm2388_vm2, %vm2387_vm12  ;;  %v3232_v28 = vsel %vm614_vm5, 1, %v10133_v48  ;;  %vm3692_vm0 = vcmp.eq.s32.totalorder %v8150_v33, 1  ;;  %vm10501_vm2 = vnez %v10335_v8 }
 0x2fe   :  { %3948 = vst.msk [vmem:[%s9732_s3 + $0x118] sm:$0xff] %vm3912_vm13, %v3819_v18  ;;  %vm2452_vm4 = vcmp.eq.s32.totalorder %v4559_v5, %v10496_v57  ;;  %vm619_vm14 = vcmp.ne.s32.totalorder %v10497_v30, 0  ;;  %v8324_v18 = vpop.permute.xlu1 %3417  ;;  %4218 = vmatmul.msk.bf16.gmra.mxu0 %vm4217_vm10, %v10337_v21  ;;  %4314 = vmatmul.msk.bf16.gmra.mxu3 %vm10501_vm2, %v10337_v21  ;;  %v10502_v33 = vld [vmem:[#allocation94_spill] sm:$0xff]  ;;  %v10503_v30 = vld [vmem:[#allocation172_spill] sm:$0xff]  ;;  %v8370_v0 = vpop.permute.xlu2 %3438 }
 0x2ff   :  { %vm4281_vm8 = vmpackc.low %vm2452_vm4, %vm2451_vm3  ;;  %3537 = vperm.xlu2 %4359, %v3232_v28   ;;  %vm617_vm12 = vcmp.ne.s32.totalorder %v10502_v33, 0  ;;  %vm622_vm6 = vcmp.ne.s32.totalorder %v10503_v30, 0  ;;  %10504 = vst [vmem:[#allocation225_spill] sm:$0xff] %v8370_v0  ;;  %vm3661_vm4 = vcmp.eq.s32.totalorder %v7980_v51, 1  ;;  %v10532_v0 = vld [vmem:[#allocation142_spill] sm:$0xff] }
 0x300   :  { %4282 = vmatmul.msk.bf16.gmra.mxu2 %vm4281_vm8, %v10337_v21  ;;  %v3235_v30 = vsel %vm617_vm12, 1, %v10133_v48 }
 0x304   :  { %v8364_v8 = vpop.f32.mrf.mxu2 }
 0x305   :  { %v4402_v57 = vld [vmem:[%s9730_s2 + $0x20] sm:$0xff] }
 0x306   :  { %v3020_v45 = vsub.f32 %v4402_v57, %v2706_v26  ;;  %v4403_v44 = vld [vmem:[%s9730_s2 + $0x120] sm:$0xff]  ;;  %v3237_v26 = vsel %vm619_vm14, 1, %v10133_v48  ;;  %v8372_v57 = vpop.permute.xlu1 %3426  ;;  %vm3693_vm14 = vcmp.eq.s32.totalorder %v8126_v61, 1  ;;  %v10508_v61 = vld [vmem:[#allocation145_spill] sm:$0xff] }
 0x307   :  { %v3052_v9 = vsub.f32 %v4403_v44, %v2786_v46  ;;  %v3230_v46 = vsel %vm612_vm9, 1, %v10133_v48  ;;  %3552 = vperm.xlu1 %4361, %v3237_v26   ;;  %v8375_v44 = vpop.permute.xlu0 %3405  ;;  %3546 = vperm.xlu2 %4359, %v3235_v30   ;;  %vm2422_vm15 = vcmp.eq.s32.totalorder %v4559_v5, %v10508_v61  ;;  %v10514_v30 = vld [vmem:[#allocation138_spill] sm:$0xff]  ;;  %v10516_v61 = vld [vmem:[#allocation188_spill] sm:$0xff] }
 0x308   :  { %v3788_v52 = vsel %vm3660_vm7, %v3020_v45, 0.0  ;;  %3531 = vperm.xlu0 %4360, %v3230_v46   ;;  %v8366_v45 = vpop.f32.mrf.mxu3  ;;  %v2788_v46 = vpop.f32.mrf.mxu1 }
 0x309   :  { %3917 = vst.msk [vmem:[%s9732_s3 + $0x20] sm:$0xff] %vm3912_vm13, %v3788_v52  ;;  %v3820_v40 = vsel %vm3692_vm0, %v3052_v9, 0.0  ;;  %v10505_v9 = vld [vmem:[#allocation100_spill] sm:$0xff]  ;;  %v2708_v52 = vpop.f32.mrf.mxu0  ;;  %vm2421_vm0 = vcmp.eq.s32.totalorder %v4559_v5, %v10514_v30 }
 0x30a   :  { %3949 = vst.msk [vmem:[%s9732_s3 + $0x120] sm:$0xff] %vm3912_vm13, %v3820_v40  ;;  %vm615_vm5 = vcmp.ne.s32.totalorder %v10505_v9, 0  ;;  %v3240_v9 = vsel %vm622_vm6, 1, %v10133_v48  ;;  %vm4251_vm12 = vmpackc.low %vm2422_vm15, %vm2421_vm0  ;;  %vm2454_vm6 = vcmp.eq.s32.totalorder %v4559_v5, %v10516_v61 }
 0x30b   :  { %v3233_v24 = vsel %vm615_vm5, 1, %v10133_v48  ;;  %4252 = vmatmul.msk.bf16.gmra.mxu1 %vm4251_vm12, %v10337_v21 }
 0x30f   :  { %3561 = vperm.xlu1 %4361, %v3240_v9   ;;  %v8417_v9 = vpop.permute.xlu0 %3414 }
 0x310   :  { %3540 = vperm.xlu0 %4360, %v3233_v24   ;;  %v10515_v24 = vld [vmem:[#allocation103_spill] sm:$0xff]  ;;  %v2791_v15 = vpop.f32.mrf.mxu1 }
 0x311   :  { %v4404_v28 = vld [vmem:[%s9730_s2 + $0x28] sm:$0xff]  ;;  %vm618_vm2 = vcmp.ne.s32.totalorder %v10515_v24, 0 }
 0x312   :  { %v3021_v26 = vsub.f32 %v4404_v28, %v2708_v52  ;;  %v4405_v40 = vld [vmem:[%s9730_s2 + $0x128] sm:$0xff]  ;;  %v10506_v52 = vld [vmem:[#allocation104_spill] sm:$0xff]  ;;  %v10507_v28 = vld [vmem:[#allocation102_spill] sm:$0xff] }
 0x313   :  { %v3053_v33 = vsub.f32 %v4405_v40, %v2788_v46  ;;  %vm2389_vm10 = vcmp.eq.s32.totalorder %v4559_v5, %v10506_v52  ;;  %vm2390_vm9 = vcmp.eq.s32.totalorder %v4559_v5, %v10507_v28  ;;  %v10510_v46 = vld [vmem:[#allocation192_spill] sm:$0xff]  ;;  %v10511_v40 = vld [vmem:[#allocation174_spill] sm:$0xff]  ;;  %v8410_v52 = vpop.permute.xlu2 %3447  ;;  %v2711_v28 = vpop.f32.mrf.mxu0 }
 0x314   :  { %v3789_v58 = vsel %vm3661_vm4, %v3021_v26, 0.0  ;;  %v8402_v26 = vpop.f32.mrf.mxu2  ;;  %vm2453_vm11 = vcmp.eq.s32.totalorder %v4559_v5, %v10510_v46  ;;  %vm620_vm3 = vcmp.ne.s32.totalorder %v10511_v40, 0  ;;  %10513 = vst [vmem:[#allocation216_spill] sm:$0xff] %v8410_v52  ;;  %vm4219_vm7 = vmpackc.low %vm2390_vm9, %vm2389_vm10  ;;  %vm3662_vm4 = vcmp.eq.s32.totalorder %v7923_v49, 1 }
 0x315   :  { %3918 = vst.msk [vmem:[%s9732_s3 + $0x28] sm:$0xff] %vm3912_vm13, %v3789_v58  ;;  %v3821_v51 = vsel %vm3693_vm14, %v3053_v33, 0.0  ;;  %v8404_v58 = vpop.f32.mrf.mxu3  ;;  %v10512_v33 = vld [vmem:[#allocation177_spill] sm:$0xff]  ;;  %vm4283_vm5 = vmpackc.low %vm2454_vm6, %vm2453_vm11  ;;  %4220 = vmatmul.msk.bf16.gmra.mxu0 %vm4219_vm7, %v10337_v21  ;;  %vm3694_vm14 = vcmp.eq.s32.totalorder %v8288_v39, 1  ;;  %vm10517_vm10 = vnez %v10370_v10 }
 0x316   :  { %3950 = vst.msk [vmem:[%s9732_s3 + $0x128] sm:$0xff] %vm3912_vm13, %v3821_v51  ;;  %vm625_vm8 = vcmp.ne.s32.totalorder %v10512_v33, 0  ;;  %v8412_v51 = vpop.permute.xlu1 %3435  ;;  %4284 = vmatmul.msk.bf16.gmra.mxu2 %vm4283_vm5, %v10337_v21  ;;  %4316 = vmatmul.msk.bf16.gmra.mxu3 %vm10517_vm10, %v10337_v21  ;;  %v10518_v33 = vld [vmem:[#allocation179_spill] sm:$0xff]  ;;  %vm624_vm10 = vcmp.ne.s32.totalorder %v10533_v56, 0 }
 0x317   :  { %10509 = vst [vmem:[#allocation223_spill] sm:$0xff] %v8404_v58  ;;  %v3243_v46 = vsel %vm625_vm8, 1, %v10133_v48  ;;  %vm623_vm9 = vcmp.ne.s32.totalorder %v10518_v33, 0  ;;  %v8466_v61 = vpop.permute.xlu0 %3423  ;;  %vm3695_vm8 = vcmp.eq.s32.totalorder %v8188_v55, 1  ;;  %v10525_v55 = vld [vmem:[#allocation144_spill] sm:$0xff]  ;;  %v10537_v56 = vld [vmem:[#allocation191_spill] sm:$0xff] }
 0x318   :  { %3570 = vperm.xlu1 %4361, %v3243_v46   ;;  %v3241_v33 = vsel %vm623_vm9, 1, %v10133_v48 }
 0x31b   :  { %v8461_v24 = vpop.permute.xlu2 %3456 }
 0x31c   :  { %v8455_v10 = vpop.f32.mrf.mxu2  ;;  %10520 = vst [vmem:[#allocation150_spill] sm:$0xff] %v8461_v24 }
 0x31d   :  { %v4406_v62 = vld [vmem:[%s9730_s2 + $0x30] sm:$0xff]  ;;  %v8457_v39 = vpop.f32.mrf.mxu3 }
 0x31e   :  { %v3022_v52 = vsub.f32 %v4406_v62, %v2711_v28  ;;  %v4407_v30 = vld [vmem:[%s9730_s2 + $0x130] sm:$0xff]  ;;  %v3238_v62 = vsel %vm620_vm3, 1, %v10133_v48  ;;  %v8463_v28 = vpop.permute.xlu1 %3444  ;;  %vm3663_vm3 = vcmp.eq.s32.totalorder %v7891_v20, 1 }
 0x31f   :  { %v3054_v58 = vsub.f32 %v4407_v30, %v2791_v15  ;;  %v3236_v15 = vsel %vm618_vm2, 1, %v10133_v48  ;;  %3555 = vperm.xlu2 %4359, %v3238_v62   ;;  %10521 = vst [vmem:[#allocation211_spill] sm:$0xff] %v8463_v28  ;;  %v2713_v30 = vpop.f32.mrf.mxu0  ;;  %vm2423_vm2 = vcmp.eq.s32.totalorder %v4559_v5, %v10525_v55 }
 0x320   :  { %v3790_v49 = vsel %vm3662_vm4, %v3022_v52, 0.0  ;;  %3549 = vperm.xlu0 %4360, %v3236_v15   ;;  %v10519_v52 = vld [vmem:[#allocation183_spill] sm:$0xff] }
 0x321   :  { %3919 = vst.msk [vmem:[%s9732_s3 + $0x30] sm:$0xff] %vm3912_vm13, %v3790_v49  ;;  %v3822_v40 = vsel %vm3694_vm14, %v3054_v58, 0.0  ;;  %vm628_vm15 = vcmp.ne.s32.totalorder %v10519_v52, 0  ;;  %v10522_v58 = vld [vmem:[#allocation165_spill] sm:$0xff]  ;;  %v2793_v49 = vpop.f32.mrf.mxu1  ;;  %vm2424_vm14 = vcmp.eq.s32.totalorder %v4559_v5, %v10532_v0 }
 0x322   :  { %3951 = vst.msk [vmem:[%s9732_s3 + $0x130] sm:$0xff] %vm3912_vm13, %v3822_v40  ;;  %vm621_vm11 = vcmp.ne.s32.totalorder %v10522_v58, 0  ;;  %v3246_v52 = vsel %vm628_vm15, 1, %v10133_v48  ;;  %vm4253_vm15 = vmpackc.low %vm2424_vm14, %vm2423_vm2  ;;  %vm629_vm2 = vcmp.ne.s32.totalorder %v10537_v56, 0  ;;  %vm3697_vm14 = vcmp.eq.s32.totalorder %v8329_v59, 1  ;;  %v10542_v56 = vld [vmem:[#allocation106_spill] sm:$0xff] }
 0x323   :  { %v3239_v24 = vsel %vm621_vm11, 1, %v10133_v48  ;;  %3579 = vperm.xlu1 %4361, %v3246_v52   ;;  %4254 = vmatmul.msk.bf16.gmra.mxu1 %vm4253_vm15, %v10337_v21  ;;  %v10543_v59 = vld [vmem:[#allocation148_spill] sm:$0xff] }
 0x324   :  { %vm2426_vm15 = vcmp.eq.s32.totalorder %v4559_v5, %v10543_v59 }
 0x326   :  { %v8505_v28 = vpop.permute.xlu1 %3453 }
 0x327   :  { %3564 = vperm.xlu2 %4359, %v3241_v33   ;;  %10529 = vst [vmem:[#allocation147_spill] sm:$0xff] %v8505_v28 }
 0x328   :  { %3558 = vperm.xlu0 %4360, %v3239_v24  }
 0x329   :  { %v4408_v62 = vld [vmem:[%s9730_s2 + $0x38] sm:$0xff]  ;;  %v2796_v0 = vpop.f32.mrf.mxu1 }
 0x32a   :  { %v3023_v46 = vsub.f32 %v4408_v62, %v2713_v30  ;;  %v4409_v15 = vld [vmem:[%s9730_s2 + $0x138] sm:$0xff]  ;;  %v10524_v62 = vld [vmem:[#allocation107_spill] sm:$0xff] }
 0x32b   :  { %v3055_v40 = vsub.f32 %v4409_v15, %v2793_v49  ;;  %v10523_v30 = vld [vmem:[#allocation101_spill] sm:$0xff]  ;;  %vm2392_vm0 = vcmp.eq.s32.totalorder %v4559_v5, %v10524_v62  ;;  %v8495_v49 = vpop.f32.mrf.mxu3  ;;  %v10526_v15 = vld [vmem:[#allocation198_spill] sm:$0xff] }
 0x32c   :  { %v3791_v58 = vsel %vm3663_vm3, %v3023_v46, 0.0  ;;  %vm2391_vm7 = vcmp.eq.s32.totalorder %v4559_v5, %v10523_v30  ;;  %v8493_v46 = vpop.f32.mrf.mxu2  ;;  %vm2456_vm12 = vcmp.eq.s32.totalorder %v4559_v5, %v10526_v15  ;;  %v10534_v30 = vld [vmem:[#allocation202_spill] sm:$0xff] }
 0x32d   :  { %3920 = vst.msk [vmem:[%s9732_s3 + $0x38] sm:$0xff] %vm3912_vm13, %v3791_v58  ;;  %v3823_v20 = vsel %vm3695_vm8, %v3055_v40, 0.0  ;;  %v10527_v40 = vld [vmem:[#allocation185_spill] sm:$0xff]  ;;  %vm8513_vm4 = vmpackc.low %vm2392_vm0, %vm2391_vm7  ;;  %vm2455_vm11 = vcmp.eq.s32.totalorder %v4559_v5, %v10534_v30  ;;  %vm3664_vm8 = vcmp.eq.s32.totalorder %v8000_v12, 1  ;;  %vm3696_vm7 = vcmp.eq.s32.totalorder %v8148_v27, 1 }
 0x32e   :  { %3952 = vst.msk [vmem:[%s9732_s3 + $0x138] sm:$0xff] %vm3912_vm13, %v3823_v20  ;;  %vm626_vm6 = vcmp.ne.s32.totalorder %v10527_v40, 0  ;;  %v10528_v58 = vld [vmem:[#allocation189_spill] sm:$0xff]  ;;  %v3466_v20 = vpop.permute.xlu2 %3465  ;;  %vm4285_vm3 = vmpackc.low %vm2456_vm12, %vm2455_vm11  ;;  %4222 = vmatmul.msk.bf16.gmra.mxu0 %vm8513_vm4, %v10337_v21  ;;  %vm10535_vm0 = vnez %v10384_v3  ;;  %v8577_v30 = vpop.permute.xlu1 %3462  ;;  %vm3665_vm4 = vcmp.eq.s32.totalorder %v7952_v19, 1 }
 0x32f   :  { %vm631_vm5 = vcmp.ne.s32.totalorder %v10528_v58, 0  ;;  %vm3720_vm9 = vcmp.eq.s32.totalorder %v3466_v20, 1  ;;  %v3244_v12 = vsel %vm626_vm6, 1, %v10133_v48  ;;  %4286 = vmatmul.msk.bf16.gmra.mxu2 %vm4285_vm3, %v10337_v21  ;;  %4318 = vmatmul.msk.bf16.gmra.mxu3 %vm10535_vm0, %v10337_v21  ;;  %v3242_v20 = vsel %vm624_vm10, 1, %v10133_v48  ;;  %10539 = vst [vmem:[#allocation215_spill] sm:$0xff] %v8577_v30 }
 0x330   :  { %3573 = vperm.xlu2 %4359, %v3244_v12   ;;  %3567 = vperm.xlu0 %4360, %v3242_v20  }
 0x333   :  { %v8569_v27 = vpop.f32.mrf.mxu3 }
 0x334   :  { %v8567_v3 = vpop.f32.mrf.mxu2  ;;  %10536 = vst [vmem:[#allocation233_spill] sm:$0xff] %v8569_v27 }
 0x335   :  { %v4410_v33 = vld [vmem:[%s9730_s2 + $0x200] sm:$0xff] }
 0x336   :  { %v3080_v52 = vsub.f32 %v4410_v33, %v8180_v38  ;;  %v8520_v38 = vpop.permute.xlu0 %3432  ;;  %v2716_v33 = vpop.f32.mrf.mxu0  ;;  %v4411_v28 = vld [vmem:[%s9730_s2 + $0x40] sm:$0xff] }
 0x337   :  { %v3024_v13 = vsub.f32 %v4411_v28, %v2716_v33  ;;  %v3249_v28 = vsel %vm631_vm5, 1, %v10133_v48  ;;  %v3475_v33 = vpop.permute.xlu2 %3474 }
 0x338   :  { %v3848_v62 = vsel %vm3720_vm9, %v3080_v52, 0.0  ;;  %3588 = vperm.xlu1 %4361, %v3249_v28   ;;  %vm3723_vm5 = vcmp.eq.s32.totalorder %v3475_v33, 1  ;;  %vm2393_vm9 = vcmp.eq.s32.totalorder %v4559_v5, %v10542_v56  ;;  %v10551_v56 = vld [vmem:[#allocation197_spill] sm:$0xff] }
 0x339   :  { %3977 = vst.msk [vmem:[%s9732_s3 + $0x200] sm:$0xff] %vm3912_vm13, %v3848_v62  ;;  %v3792_v15 = vsel %vm3664_vm8, %v3024_v13, 0.0  ;;  %v10538_v13 = vld [vmem:[#allocation193_spill] sm:$0xff] }
 0x33a   :  { %vm634_vm12 = vcmp.ne.s32.totalorder %v10538_v13, 0  ;;  %v10540_v62 = vld [vmem:[#allocation173_spill] sm:$0xff]  ;;  %v10544_v13 = vld [vmem:[#allocation207_spill] sm:$0xff] }
 0x33b   :  { %vm627_vm6 = vcmp.ne.s32.totalorder %v10540_v62, 0  ;;  %vm2458_vm11 = vcmp.eq.s32.totalorder %v4559_v5, %v10544_v13 }
 0x33c   :  { %v2878_v62 = vpop.f32.mrf.mxu2 }
 0x340   :  { %v4412_v55 = vld [vmem:[%s9730_s2 + $0x140] sm:$0xff] }
 0x341   :  { %v3056_v52 = vsub.f32 %v4412_v55, %v2796_v0  ;;  %3921 = vst.msk [vmem:[%s9732_s3 + $0x40] sm:$0xff] %vm3912_vm13, %v3792_v15  ;;  %v8580_v0 = vpop.permute.xlu0 %3441  ;;  %v2718_v55 = vpop.f32.mrf.mxu0 }
 0x342   :  { %v2798_v15 = vpop.f32.mrf.mxu1 }
 0x343   :  { %v3824_v40 = vsel %vm3696_vm7, %v3056_v52, 0.0 }
 0x344   :  { %3953 = vst.msk [vmem:[%s9732_s3 + $0x140] sm:$0xff] %vm3912_vm13, %v3824_v40  ;;  %v3247_v40 = vsel %vm629_vm2, 1, %v10133_v48 }
 0x345   :  { %3582 = vperm.xlu2 %4359, %v3247_v40  }
 0x34a   :  { %v2801_v27 = vpop.f32.mrf.mxu1 }
 0x34b   :  { %v4413_v58 = vld [vmem:[%s9730_s2 + $0x218] sm:$0xff]  ;;  %v4414_v12 = vld [vmem:[%s9730_s2 + $0x48] sm:$0xff] }
 0x34c   :  { %v3083_v24 = vsub.f32 %v4413_v58, %v8314_v35  ;;  %v3025_v28 = vsub.f32 %v4414_v12, %v2718_v55  ;;  %v3252_v58 = vsel %vm634_vm12, 1, %v10133_v48  ;;  %v10541_v55 = vld [vmem:[#allocation105_spill] sm:$0xff]  ;;  %v10545_v12 = vld [vmem:[#allocation195_spill] sm:$0xff] }
 0x34d   :  { %vm2394_vm10 = vcmp.eq.s32.totalorder %v4559_v5, %v10541_v55  ;;  %3597 = vperm.xlu1 %4361, %v3252_v58   ;;  %vm632_vm3 = vcmp.ne.s32.totalorder %v10545_v12, 0  ;;  %v3484_v58 = vpop.permute.xlu2 %3483 }
 0x34e   :  { %v3851_v52 = vsel %vm3723_vm5, %v3083_v24, 0.0  ;;  %v3793_v19 = vsel %vm3665_vm4, %v3025_v28, 0.0  ;;  %v3245_v24 = vsel %vm627_vm6, 1, %v10133_v48  ;;  %v10546_v28 = vld [vmem:[#allocation199_spill] sm:$0xff]  ;;  %vm8637_vm7 = vmpackc.low %vm2394_vm10, %vm2393_vm9  ;;  %vm3726_vm12 = vcmp.eq.s32.totalorder %v3484_v58, 1 }
 0x34f   :  { %3980 = vst.msk [vmem:[%s9732_s3 + $0x218] sm:$0xff] %vm3912_vm13, %v3851_v52  ;;  %3576 = vperm.xlu0 %4360, %v3245_v24   ;;  %v8619_v52 = vpop.f32.mrf.mxu3  ;;  %vm637_vm8 = vcmp.ne.s32.totalorder %v10546_v28, 0  ;;  %vm2457_vm4 = vcmp.eq.s32.totalorder %v4559_v5, %v10551_v56  ;;  %vm3666_vm10 = vcmp.eq.s32.totalorder %v7921_v37, 1  ;;  %4224 = vmatmul.msk.bf16.gmra.mxu0 %vm8637_vm7, %v10337_v21  ;;  %v3250_v37 = vsel %vm632_vm3, 1, %v10133_v48  ;;  %v10553_v28 = vld [vmem:[#allocation201_spill] sm:$0xff] }
 0x350   :  { %v3255_v13 = vsel %vm637_vm8, 1, %v10133_v48  ;;  %vm3698_vm9 = vcmp.eq.s32.totalorder %v8239_v36, 1  ;;  %3591 = vperm.xlu2 %4359, %v3250_v37  }
 0x355   :  { %3606 = vperm.xlu1 %4361, %v3255_v13   ;;  %v2803_v13 = vpop.f32.mrf.mxu1 }
 0x356   :  { %v4415_v35 = vld [vmem:[%s9730_s2 + $0x148] sm:$0xff] }
 0x357   :  { %v3057_v20 = vsub.f32 %v4415_v35, %v2798_v15  ;;  %3922 = vst.msk [vmem:[%s9732_s3 + $0x48] sm:$0xff] %vm3912_vm13, %v3793_v19  ;;  %v3472_v19 = vpop.permute.xlu1 %3471 }
 0x358   :  { %vm3722_vm6 = vcmp.eq.s32.totalorder %v3472_v19, 1 }
 0x359   :  { %v3825_v33 = vsel %vm3697_vm14, %v3057_v20, 0.0  ;;  %vm4287_vm14 = vmpackc.low %vm2458_vm11, %vm2457_vm4  ;;  %vm635_vm11 = vcmp.ne.s32.totalorder %v10553_v28, 0 }
 0x35a   :  { %3954 = vst.msk [vmem:[%s9732_s3 + $0x148] sm:$0xff] %vm3912_vm13, %v3825_v33  ;;  %v10549_v33 = vld [vmem:[#allocation149_spill] sm:$0xff]  ;;  %4288 = vmatmul.msk.bf16.gmra.mxu2 %vm4287_vm14, %v10337_v21 }
 0x35b   :  { %vm2425_vm0 = vcmp.eq.s32.totalorder %v4559_v5, %v10549_v33 }
 0x35c   :  { %vm4255_vm5 = vmpackc.low %vm2426_vm15, %vm2425_vm0  ;;  %vm10552_vm15 = vnez %v10361_v14  ;;  %v8695_v14 = vpop.f32.mrf.mxu2 }
 0x35d   :  { %4256 = vmatmul.msk.bf16.gmra.mxu1 %vm4255_vm5, %v10337_v21  ;;  %4320 = vmatmul.msk.bf16.gmra.mxu3 %vm10552_vm15, %v10337_v21 }
 0x35f   :  { %v3481_v56 = vpop.permute.xlu1 %3480 }
 0x360   :  { %vm3725_vm0 = vcmp.eq.s32.totalorder %v3481_v56, 1  ;;  %v10560_v56 = vld [vmem:[#allocation205_spill] sm:$0xff] }
 0x361   :  { %v4416_v15 = vld [vmem:[%s9730_s2 + $0x210] sm:$0xff] }
 0x362   :  { %v3082_v35 = vsub.f32 %v4416_v15, %v8277_v32  ;;  %v4417_v20 = vld [vmem:[%s9730_s2 + $0x230] sm:$0xff]  ;;  %v10550_v32 = vld [vmem:[#allocation178_spill] sm:$0xff]  ;;  %v2721_v15 = vpop.f32.mrf.mxu0 }
 0x363   :  { %v3086_v40 = vsub.f32 %v4417_v20, %v8455_v10  ;;  %vm630_vm2 = vcmp.ne.s32.totalorder %v10550_v32, 0  ;;  %v8644_v10 = vpop.permute.xlu0 %3450  ;;  %v4418_v33 = vld [vmem:[%s9730_s2 + $0x50] sm:$0xff] }
 0x364   :  { %v3850_v20 = vsel %vm3722_vm6, %v3082_v35, 0.0  ;;  %v3026_v30 = vsub.f32 %v4418_v33, %v2721_v15  ;;  %v3248_v12 = vsel %vm630_vm2, 1, %v10133_v48  ;;  %v3493_v15 = vpop.permute.xlu2 %3492  ;;  %vm3667_vm2 = vcmp.eq.s32.totalorder %v8024_v1, 1 }
 0x365   :  { %v3854_v55 = vsel %vm3726_vm12, %v3086_v40, 0.0  ;;  %3585 = vperm.xlu0 %4360, %v3248_v12   ;;  %v10554_v40 = vld [vmem:[#allocation203_spill] sm:$0xff]  ;;  %vm3729_vm7 = vcmp.eq.s32.totalorder %v3493_v15, 1  ;;  %v3253_v12 = vsel %vm635_vm11, 1, %v10133_v48  ;;  %vm3699_vm12 = vcmp.eq.s32.totalorder %v8186_v17, 1  ;;  %v10557_v17 = vld [vmem:[#allocation109_spill] sm:$0xff] }
 0x366   :  { %3983 = vst.msk [vmem:[%s9732_s3 + $0x230] sm:$0xff] %vm3912_vm13, %v3854_v55  ;;  %vm640_vm3 = vcmp.ne.s32.totalorder %v10554_v40, 0  ;;  %v10555_v55 = vld [vmem:[#allocation184_spill] sm:$0xff]  ;;  %v10556_v40 = vld [vmem:[#allocation110_spill] sm:$0xff]  ;;  %vm2396_vm5 = vcmp.eq.s32.totalorder %v4559_v5, %v10557_v17  ;;  %3600 = vperm.xlu2 %4359, %v3253_v12  }
 0x367   :  { %vm633_vm8 = vcmp.ne.s32.totalorder %v10555_v55, 0  ;;  %vm2395_vm6 = vcmp.eq.s32.totalorder %v4559_v5, %v10556_v40  ;;  %v10561_v55 = vld [vmem:[#allocation208_spill] sm:$0xff] }
 0x368   :  { %vm8770_vm11 = vmpackc.low %vm2396_vm5, %vm2395_vm6  ;;  %vm3700_vm5 = vcmp.eq.s32.totalorder %v8375_v44, 1 }
 0x369   :  { %4226 = vmatmul.msk.bf16.gmra.mxu0 %vm8770_vm11, %v10337_v21 }
 0x36a   :  { %v2723_v33 = vpop.f32.mrf.mxu0 }
 0x36d   :  { %v4419_v59 = vld [vmem:[%s9730_s2 + $0x150] sm:$0xff] }
 0x36e   :  { %v3058_v35 = vsub.f32 %v4419_v59, %v2801_v27  ;;  %3979 = vst.msk [vmem:[%s9732_s3 + $0x210] sm:$0xff] %vm3912_vm13, %v3850_v20  ;;  %v3794_v27 = vsel %vm3666_vm10, %v3026_v30, 0.0  ;;  %v8697_v30 = vpop.f32.mrf.mxu3  ;;  %v8709_v20 = vpop.permute.xlu0 %3459  ;;  %vm638_vm10 = vcmp.ne.s32.totalorder %v10560_v56, 0 }
 0x36f   :  { %3923 = vst.msk [vmem:[%s9732_s3 + $0x50] sm:$0xff] %vm3912_vm13, %v3794_v27 }
 0x370   :  { %v3826_v36 = vsel %vm3698_vm9, %v3058_v35, 0.0  ;;  %vm643_vm9 = vcmp.ne.s32.totalorder %v10561_v55, 0 }
 0x371   :  { %3955 = vst.msk [vmem:[%s9732_s3 + $0x150] sm:$0xff] %vm3912_vm13, %v3826_v36  ;;  %v3258_v36 = vsel %vm640_vm3, 1, %v10133_v48 }
 0x372   :  { %3615 = vperm.xlu1 %4361, %v3258_v36  }
 0x376   :  { %v8754_v15 = vpop.f32.mrf.mxu3  ;;  %v3469_v36 = vpop.permute.xlu0 %3468 }
 0x378   :  { %v4420_v58 = vld [vmem:[%s9730_s2 + $0x228] sm:$0xff] }
 0x379   :  { %v3085_v19 = vsub.f32 %v4420_v58, %v8402_v26  ;;  %v4421_v24 = vld [vmem:[%s9730_s2 + $0x248] sm:$0xff]  ;;  %v4422_v26 = vld [vmem:[%s9730_s2 + $0x58] sm:$0xff]  ;;  %v3251_v58 = vsel %vm633_vm8, 1, %v10133_v48 }
 0x37a   :  { %v3089_v32 = vsub.f32 %v4421_v24, %v2878_v62  ;;  %v3027_v37 = vsub.f32 %v4422_v26, %v2723_v33  ;;  %v10559_v24 = vld [vmem:[#allocation153_spill] sm:$0xff]  ;;  %3594 = vperm.xlu0 %4360, %v3251_v58   ;;  %v3502_v26 = vpop.permute.xlu2 %3501 }
 0x37b   :  { %v3853_v35 = vsel %vm3725_vm0, %v3085_v19, 0.0  ;;  %v10558_v19 = vld [vmem:[#allocation146_spill] sm:$0xff]  ;;  %vm2428_vm14 = vcmp.eq.s32.totalorder %v4559_v5, %v10559_v24  ;;  %v10562_v33 = vld [vmem:[#allocation221_spill] sm:$0xff]  ;;  %vm3732_vm11 = vcmp.eq.s32.totalorder %v3502_v26, 1 }
 0x37c   :  { %v3857_v59 = vsel %vm3729_vm7, %v3089_v32, 0.0  ;;  %v3795_v1 = vsel %vm3667_vm2, %v3027_v37, 0.0  ;;  %vm2427_vm4 = vcmp.eq.s32.totalorder %v4559_v5, %v10558_v19  ;;  %v8752_v32 = vpop.f32.mrf.mxu2  ;;  %vm2460_vm15 = vcmp.eq.s32.totalorder %v4559_v5, %v10562_v33  ;;  %v3490_v37 = vpop.permute.xlu1 %3489 }
 0x37d   :  { %3986 = vst.msk [vmem:[%s9732_s3 + $0x248] sm:$0xff] %vm3912_vm13, %v3857_v59  ;;  %vm3728_vm7 = vcmp.eq.s32.totalorder %v3490_v37, 1  ;;  %vm4257_vm0 = vmpackc.low %vm2428_vm14, %vm2427_vm4  ;;  %vm3668_vm2 = vcmp.eq.s32.totalorder %v7972_v6, 1  ;;  %v3256_v33 = vsel %vm638_vm10, 1, %v10133_v48  ;;  %vm10567_vm4 = vnez %v10389_v63  ;;  %v10568_v6 = vld [vmem:[#allocation194_spill] sm:$0xff] }
 0x37e   :  { %4258 = vmatmul.msk.bf16.gmra.mxu1 %vm4257_vm0, %v10337_v21  ;;  %4322 = vmatmul.msk.bf16.gmra.mxu3 %vm10567_vm4, %v10337_v21  ;;  %vm639_vm14 = vcmp.ne.s32.totalorder %v10568_v6, 0  ;;  %v8834_v55 = vpop.f32.mrf.mxu3  ;;  %v10569_v37 = vld [vmem:[#allocation210_spill] sm:$0xff] }
 0x37f   :  { %3609 = vperm.xlu2 %4359, %v3256_v33   ;;  %vm641_vm10 = vcmp.ne.s32.totalorder %v10569_v37, 0 }
 0x384   :  { %v4423_v62 = vld [vmem:[%s9730_s2 + $0x158] sm:$0xff]  ;;  %v2886_v63 = vpop.f32.mrf.mxu2 }
 0x385   :  { %v3059_v27 = vsub.f32 %v4423_v62, %v2803_v13  ;;  %3982 = vst.msk [vmem:[%s9732_s3 + $0x228] sm:$0xff] %vm3912_vm13, %v3853_v35  ;;  %v10565_v62 = vld [vmem:[#allocation206_spill] sm:$0xff]  ;;  %v10570_v13 = vld [vmem:[#allocation212_spill] sm:$0xff] }
 0x386   :  { %3924 = vst.msk [vmem:[%s9732_s3 + $0x58] sm:$0xff] %vm3912_vm13, %v3795_v1  ;;  %vm2459_vm3 = vcmp.eq.s32.totalorder %v4559_v5, %v10565_v62  ;;  %v2726_v1 = vpop.f32.mrf.mxu0 }
 0x387   :  { %v3827_v28 = vsel %vm3699_vm12, %v3059_v27, 0.0  ;;  %v10566_v27 = vld [vmem:[#allocation190_spill] sm:$0xff]  ;;  %vm3721_vm12 = vcmp.eq.s32.totalorder %v3469_v36, 1  ;;  %vm4289_vm6 = vmpackc.low %vm2460_vm15, %vm2459_vm3  ;;  %v8845_v36 = vpop.permute.xlu2 %3510  ;;  %vm3669_vm15 = vcmp.eq.s32.totalorder %v7950_v50, 1  ;;  %v10573_v50 = vld [vmem:[#allocation152_spill] sm:$0xff] }
 0x388   :  { %3956 = vst.msk [vmem:[%s9732_s3 + $0x158] sm:$0xff] %vm3912_vm13, %v3827_v28  ;;  %vm636_vm8 = vcmp.ne.s32.totalorder %v10566_v27, 0  ;;  %4290 = vmatmul.msk.bf16.gmra.mxu2 %vm4289_vm6, %v10337_v21 }
 0x389   :  { %v3254_v56 = vsel %vm636_vm8, 1, %v10133_v48 }
 0x38a   :  { %3603 = vperm.xlu0 %4360, %v3254_v56  }
 0x38c   :  { %v8896_v6 = vpop.f32.mrf.mxu2 }
 0x38e   :  { %4324 = vmatmul.msk.bf16.gmra.mxu3 %vm7937_vm1, %v10337_v21 }
 0x38f   :  { %v4424_v59 = vld [vmem:[%s9730_s2 + $0x240] sm:$0xff] }
 0x390   :  { %v3088_v35 = vsub.f32 %v4424_v59, %v8567_v3  ;;  %v4425_v3 = vld [vmem:[%s9730_s2 + $0x208] sm:$0xff]  ;;  %v4426_v28 = vld [vmem:[%s9730_s2 + $0x60] sm:$0xff]  ;;  %v3261_v59 = vsel %vm643_vm9, 1, %v10133_v48  ;;  %vm646_vm9 = vcmp.ne.s32.totalorder %v10570_v13, 0  ;;  %v10571_v13 = vld [vmem:[#allocation108_spill] sm:$0xff] }
 0x391   :  { %v3081_v12 = vsub.f32 %v4425_v3, %v8229_v4  ;;  %v3028_v40 = vsub.f32 %v4426_v28, %v2726_v1  ;;  %v2806_v4 = vpop.f32.mrf.mxu1  ;;  %3624 = vperm.xlu1 %4361, %v3261_v59   ;;  %v3499_v1 = vpop.permute.xlu1 %3498  ;;  %v3264_v56 = vsel %vm646_vm9, 1, %v10133_v48  ;;  %vm2397_vm0 = vcmp.eq.s32.totalorder %v4559_v5, %v10571_v13  ;;  %v10583_v13 = vld [vmem:[#allocation219_spill] sm:$0xff] }
 0x392   :  { %v3856_v58 = vsel %vm3728_vm7, %v3088_v35, 0.0  ;;  %vm3731_vm3 = vcmp.eq.s32.totalorder %v3499_v1, 1  ;;  %vm3701_vm7 = vcmp.eq.s32.totalorder %v8285_v54, 1  ;;  %v10572_v54 = vld [vmem:[#allocation113_spill] sm:$0xff]  ;;  %v10577_v1 = vld [vmem:[#allocation2_spill] sm:$0xff] }
 0x393   :  { %3985 = vst.msk [vmem:[%s9732_s3 + $0x240] sm:$0xff] %vm3912_vm13, %v3856_v58  ;;  %v3849_v17 = vsel %vm3721_vm12, %v3081_v12, 0.0  ;;  %v3796_v35 = vsel %vm3668_vm2, %v3028_v40, 0.0  ;;  %v3478_v40 = vpop.permute.xlu0 %3477  ;;  %vm2398_vm2 = vcmp.eq.s32.totalorder %v4559_v5, %v10572_v54  ;;  %vm2429_vm12 = vcmp.eq.s32.totalorder %v4559_v5, %v10573_v50 }
 0x394   :  { %vm3724_vm8 = vcmp.eq.s32.totalorder %v3478_v40, 1  ;;  %v2891_v47 = vpop.f32.mrf.mxu2 }
 0x399   :  { %v2808_v33 = vpop.f32.mrf.mxu1  ;;  %3633 = vperm.xlu1 %4361, %v3264_v56  }
 0x39a   :  { %v4427_v19 = vld [vmem:[%s9730_s2 + $0x160] sm:$0xff] }
 0x39b   :  { %v3060_v24 = vsub.f32 %v4427_v19, %v2806_v4  ;;  %3978 = vst.msk [vmem:[%s9732_s3 + $0x208] sm:$0xff] %vm3912_vm13, %v3849_v17 }
 0x39c   :  { %3925 = vst.msk [vmem:[%s9732_s3 + $0x60] sm:$0xff] %vm3912_vm13, %v3796_v35  ;;  %v3259_v35 = vsel %vm641_vm10, 1, %v10133_v48  ;;  %vm8914_vm10 = vmpackc.low %vm2398_vm2, %vm2397_vm0  ;;  %vm3702_vm0 = vcmp.eq.s32.totalorder %v8237_v16, 1  ;;  %vm652_vm2 = vcmp.ne.s32.totalorder %v10583_v13, 0 }
 0x39d   :  { %v3828_v44 = vsel %vm3700_vm5, %v3060_v24, 0.0  ;;  %3618 = vperm.xlu2 %4359, %v3259_v35   ;;  %4228 = vmatmul.msk.bf16.gmra.mxu0 %vm8914_vm10, %v10337_v21 }
 0x39e   :  { %3957 = vst.msk [vmem:[%s9732_s3 + $0x160] sm:$0xff] %vm3912_vm13, %v3828_v44 }
 0x3a5   :  { %v4428_v62 = vld [vmem:[%s9730_s2 + $0x258] sm:$0xff]  ;;  %v4429_v3 = vld [vmem:[%s9730_s2 + $0x260] sm:$0xff]  ;;  %v4431_v19 = vld [vmem:[%s9730_s2 + $0x68] sm:$0xff] }
 0x3a6   :  { %v3091_v27 = vsub.f32 %v4428_v62, %v8752_v32  ;;  %v3092_v12 = vsub.f32 %v4429_v3, %v2886_v63  ;;  %v4430_v58 = vld [vmem:[%s9730_s2 + $0x220] sm:$0xff]  ;;  %v2728_v32 = vpop.f32.mrf.mxu0  ;;  %v3257_v63 = vsel %vm639_vm14, 1, %v10133_v48  ;;  %v8898_v62 = vpop.f32.mrf.mxu3  ;;  %v10575_v3 = vld [vmem:[#allocation217_spill] sm:$0xff]  ;;  %vm2461_vm14 = vcmp.eq.s32.totalorder %v4559_v5, %v10577_v1 }
 0x3a7   :  { %v3084_v28 = vsub.f32 %v4430_v58, %v8364_v8  ;;  %v3029_v24 = vsub.f32 %v4431_v19, %v2728_v32  ;;  %3612 = vperm.xlu0 %4360, %v3257_v63   ;;  %vm649_vm5 = vcmp.ne.s32.totalorder %v10575_v3, 0  ;;  %v8906_v58 = vpop.permute.xlu2 %3519  ;;  %v10580_v32 = vld [vmem:[#allocation151_spill] sm:$0xff] }
 0x3a8   :  { %v3860_v4 = vsel %vm3732_vm11, %v3092_v12, 0.0  ;;  %v3859_v17 = vsel %vm3731_vm3, %v3091_v27, 0.0  ;;  %v10574_v27 = vld [vmem:[#allocation214_spill] sm:$0xff]  ;;  %v10576_v12 = vld [vmem:[#allocation227_spill] sm:$0xff]  ;;  %vm2430_vm9 = vcmp.eq.s32.totalorder %v4559_v5, %v10580_v32  ;;  %vm3670_vm3 = vcmp.eq.s32.totalorder %v8045_v11, 1 }
 0x3a9   :  { %3989 = vst.msk [vmem:[%s9732_s3 + $0x260] sm:$0xff] %vm3912_vm13, %v3860_v4  ;;  %v3852_v59 = vsel %vm3724_vm8, %v3084_v28, 0.0  ;;  %v3797_v44 = vsel %vm3669_vm15, %v3029_v24, 0.0  ;;  %vm644_vm6 = vcmp.ne.s32.totalorder %v10574_v27, 0  ;;  %vm2462_vm4 = vcmp.eq.s32.totalorder %v4559_v5, %v10576_v12  ;;  %v3508_v28 = vpop.permute.xlu1 %3507  ;;  %v10581_v4 = vld [vmem:[#allocation200_spill] sm:$0xff]  ;;  %v3487_v24 = vpop.permute.xlu0 %3486  ;;  %vm4259_vm11 = vmpackc.low %vm2430_vm9, %vm2429_vm12 }
 0x3aa   :  { %vm642_vm15 = vcmp.ne.s32.totalorder %v10581_v4, 0  ;;  %vm3727_vm8 = vcmp.eq.s32.totalorder %v3487_v24, 1  ;;  %4260 = vmatmul.msk.bf16.gmra.mxu1 %vm4259_vm11, %v10337_v21  ;;  %v3262_v56 = vsel %vm644_vm6, 1, %v10133_v48  ;;  %v3267_v5 = vsel %vm649_vm5, 1, %v10133_v48  ;;  %v10584_v12 = vld [vmem:[#allocation204_spill] sm:$0xff] }
 0x3ab   :  { %v3260_v63 = vsel %vm642_vm15, 1, %v10133_v48  ;;  %3627 = vperm.xlu2 %4359, %v3262_v56   ;;  %3642 = vperm.xlu1 %4361, %v3267_v5   ;;  %vm645_vm12 = vcmp.ne.s32.totalorder %v10584_v12, 0  ;;  %vm3734_vm6 = vcmp.eq.s32.totalorder %v3508_v28, 1  ;;  %vm3671_vm5 = vcmp.eq.s32.totalorder %v7994_v25, 1  ;;  %v10585_v56 = vld [vmem:[#allocation220_spill] sm:$0xff] }
 0x3ac   :  { %vm650_vm10 = vcmp.ne.s32.totalorder %v10585_v56, 0  ;;  %vm3735_vm15 = vcmp.eq.s32.totalorder %v8845_v36, 1 }
 0x3af   :  { %3621 = vperm.xlu0 %4360, %v3260_v63   ;;  %v8978_v27 = vpop.permute.xlu2 %3528 }
 0x3b0   :  { %v4432_v8 = vld [vmem:[%s9730_s2 + $0x168] sm:$0xff] }
 0x3b1   :  { %v3061_v26 = vsub.f32 %v4432_v8, %v2808_v33  ;;  %3988 = vst.msk [vmem:[%s9732_s3 + $0x258] sm:$0xff] %vm3912_vm13, %v3859_v17  ;;  %v2731_v33 = vpop.f32.mrf.mxu0  ;;  %v8980_v3 = vpop.permute.xlu1 %3516 }
 0x3b2   :  { %3981 = vst.msk [vmem:[%s9732_s3 + $0x220] sm:$0xff] %vm3912_vm13, %v3852_v59  ;;  %v3496_v32 = vpop.permute.xlu0 %3495 }
 0x3b3   :  { %v3829_v37 = vsel %vm3701_vm7, %v3061_v26, 0.0  ;;  %3926 = vst.msk [vmem:[%s9732_s3 + $0x68] sm:$0xff] %vm3912_vm13, %v3797_v44  ;;  %v2811_v26 = vpop.f32.mrf.mxu1  ;;  %vm4291_vm7 = vmpackc.low %vm2462_vm4, %vm2461_vm14  ;;  %vm3730_vm4 = vcmp.eq.s32.totalorder %v3496_v32, 1  ;;  %vm3703_vm14 = vcmp.eq.s32.totalorder %v8417_v9, 1  ;;  %v2893_v9 = vpop.f32.mrf.mxu2 }
 0x3b4   :  { %3958 = vst.msk [vmem:[%s9732_s3 + $0x168] sm:$0xff] %vm3912_vm13, %v3829_v37  ;;  %4292 = vmatmul.msk.bf16.gmra.mxu2 %vm4291_vm7, %v10337_v21  ;;  %v8971_v21 = vpop.f32.mrf.mxu3  ;;  %v10582_v37 = vld [vmem:[#allocation218_spill] sm:$0xff] }
 0x3b5   :  { %vm647_vm1 = vcmp.ne.s32.totalorder %v10582_v37, 0 }
 0x3b6   :  { %v3265_v25 = vsel %vm647_vm1, 1, %v10133_v48 }
 0x3b7   :  { %3636 = vperm.xlu2 %4359, %v3265_v25   ;;  %v9026_v63 = vpop.permute.xlu2 %3537 }
 0x3b9   :  { %v2733_v4 = vpop.f32.mrf.mxu0 }
 0x3bb   :  { %v4433_v17 = vld [vmem:[%s9730_s2 + $0x238] sm:$0xff]  ;;  %v4434_v59 = vld [vmem:[%s9730_s2 + $0x70] sm:$0xff] }
 0x3bc   :  { %v3087_v19 = vsub.f32 %v4433_v17, %v8493_v46  ;;  %v3030_v8 = vsub.f32 %v4434_v59, %v2731_v33  ;;  %v4435_v35 = vld [vmem:[%s9730_s2 + $0x170] sm:$0xff]  ;;  %v2813_v33 = vpop.f32.mrf.mxu1 }
 0x3bd   :  { %v3062_v11 = vsub.f32 %v4435_v35, %v2811_v26 }
 0x3be   :  { %v3855_v46 = vsel %vm3727_vm8, %v3087_v19, 0.0  ;;  %v3798_v44 = vsel %vm3670_vm3, %v3030_v8, 0.0  ;;  %v3270_v8 = vsel %vm652_vm2, 1, %v10133_v48  ;;  %vm3672_vm3 = vcmp.eq.s32.totalorder %v7978_v42, 1 }
 0x3bf   :  { %3984 = vst.msk [vmem:[%s9732_s3 + $0x238] sm:$0xff] %vm3912_vm13, %v3855_v46  ;;  %v3830_v16 = vsel %vm3702_vm0, %v3062_v11, 0.0  ;;  %v3263_v46 = vsel %vm645_vm12, 1, %v10133_v48  ;;  %3651 = vperm.xlu1 %4361, %v3270_v8   ;;  %v9020_v11 = vpop.f32.mrf.mxu3  ;;  %vm3704_vm8 = vcmp.eq.s32.totalorder %v8324_v18, 1  ;;  %v2896_v18 = vpop.f32.mrf.mxu2  ;;  %vm3673_vm2 = vcmp.eq.s32.totalorder %v8071_v23, 1 }
 0x3c0   :  { %3927 = vst.msk [vmem:[%s9732_s3 + $0x70] sm:$0xff] %vm3912_vm13, %v3798_v44  ;;  %3630 = vperm.xlu0 %4360, %v3263_v46   ;;  %v9072_v25 = vpop.permute.xlu2 %3546  ;;  %vm3705_vm12 = vcmp.eq.s32.totalorder %v8283_v22, 1 }
 0x3c1   :  { %3959 = vst.msk [vmem:[%s9732_s3 + $0x170] sm:$0xff] %vm3912_vm13, %v3830_v16  ;;  %v9028_v16 = vpop.permute.xlu1 %3525 }
 0x3c4   :  { %v2816_v32 = vpop.f32.mrf.mxu1 }
 0x3c7   :  { %v2898_v22 = vpop.f32.mrf.mxu2 }
 0x3c8   :  { %v4436_v54 = vld [vmem:[%s9730_s2 + $0x270] sm:$0xff]  ;;  %v4438_v19 = vld [vmem:[%s9730_s2 + $0x78] sm:$0xff] }
 0x3c9   :  { %v3094_v50 = vsub.f32 %v4436_v54, %v2891_v47  ;;  %v4437_v1 = vld [vmem:[%s9730_s2 + $0x250] sm:$0xff]  ;;  %v3031_v24 = vsub.f32 %v4438_v19, %v2733_v4  ;;  %v10586_v47 = vld [vmem:[#allocation209_spill] sm:$0xff]  ;;  %v3505_v54 = vpop.permute.xlu0 %3504  ;;  %v9074_v8 = vpop.permute.xlu1 %3534 }
 0x3ca   :  { %v3090_v40 = vsub.f32 %v4437_v1, %v8695_v14  ;;  %vm648_vm9 = vcmp.ne.s32.totalorder %v10586_v47, 0  ;;  %vm3733_vm11 = vcmp.eq.s32.totalorder %v3505_v54, 1 }
 0x3cb   :  { %v3862_v17 = vsel %vm3734_vm6, %v3094_v50, 0.0  ;;  %v3799_v26 = vsel %vm3671_vm5, %v3031_v24, 0.0  ;;  %v2736_v50 = vpop.f32.mrf.mxu0  ;;  %v3266_v19 = vsel %vm648_vm9, 1, %v10133_v48  ;;  %vm3737_vm6 = vcmp.eq.s32.totalorder %v8980_v3, 1 }
 0x3cc   :  { %3991 = vst.msk [vmem:[%s9732_s3 + $0x270] sm:$0xff] %vm3912_vm13, %v3862_v17  ;;  %v3858_v59 = vsel %vm3730_vm4, %v3090_v40, 0.0  ;;  %v3268_v17 = vsel %vm650_vm10, 1, %v10133_v48  ;;  %3639 = vperm.xlu0 %4360, %v3266_v19   ;;  %vm3674_vm5 = vcmp.eq.s32.totalorder %v8016_v53, 1  ;;  %vm3706_vm4 = vcmp.eq.s32.totalorder %v8466_v61, 1 }
 0x3cd   :  { %3645 = vperm.xlu2 %4359, %v3268_v17   ;;  %vm3675_vm9 = vcmp.eq.s32.totalorder %v7998_v2, 1 }
 0x3cf   :  { %v2901_v53 = vpop.f32.mrf.mxu2 }
 0x3d1   :  { %v3514_v46 = vpop.permute.xlu0 %3513 }
 0x3d2   :  { %vm3736_vm1 = vcmp.eq.s32.totalorder %v3514_v46, 1 }
 0x3d3   :  { %v4439_v14 = vld [vmem:[%s9730_s2 + $0x178] sm:$0xff] }
 0x3d4   :  { %v3063_v28 = vsub.f32 %v4439_v14, %v2813_v33  ;;  %3987 = vst.msk [vmem:[%s9732_s3 + $0x250] sm:$0xff] %vm3912_vm13, %v3858_v59  ;;  %v9066_v33 = vpop.f32.mrf.mxu3  ;;  %v10587_v59 = vld [vmem:[#allocation222_spill] sm:$0xff] }
 0x3d5   :  { %3928 = vst.msk [vmem:[%s9732_s3 + $0x78] sm:$0xff] %vm3912_vm13, %v3799_v26  ;;  %vm653_vm7 = vcmp.ne.s32.totalorder %v10587_v59, 0  ;;  %v10588_v26 = vld [vmem:[#allocation213_spill] sm:$0xff] }
 0x3d6   :  { %v3831_v35 = vsel %vm3703_vm14, %v3063_v28, 0.0  ;;  %vm651_vm0 = vcmp.ne.s32.totalorder %v10588_v26, 0  ;;  %vm3738_vm14 = vcmp.eq.s32.totalorder %v8906_v58, 1 }
 0x3d7   :  { %3960 = vst.msk [vmem:[%s9732_s3 + $0x178] sm:$0xff] %vm3912_vm13, %v3831_v35  ;;  %v2738_v35 = vpop.f32.mrf.mxu0  ;;  %v3269_v23 = vsel %vm651_vm0, 1, %v10133_v48  ;;  %vm3708_vm0 = vcmp.eq.s32.totalorder %v8322_v7, 1 }
 0x3d8   :  { %3648 = vperm.xlu0 %4360, %v3269_v23  }
 0x3de   :  { %v4440_v5 = vld [vmem:[%s9730_s2 + $0x278] sm:$0xff]  ;;  %v4441_v37 = vld [vmem:[%s9730_s2 + $0x268] sm:$0xff]  ;;  %v4442_v1 = vld [vmem:[%s9730_s2 + $0x80] sm:$0xff] }
 0x3df   :  { %v3095_v44 = vsub.f32 %v4440_v5, %v2893_v9  ;;  %v3093_v13 = vsub.f32 %v4441_v37, %v8896_v6  ;;  %v3032_v40 = vsub.f32 %v4442_v1, %v2736_v50  ;;  %v2818_v5 = vpop.f32.mrf.mxu1 }
 0x3e1   :  { %v3863_v12 = vsel %vm3735_vm15, %v3095_v44, 0.0  ;;  %v3861_v36 = vsel %vm3733_vm11, %v3093_v13, 0.0  ;;  %v3800_v42 = vsel %vm3672_vm3, %v3032_v40, 0.0  ;;  %v3271_v13 = vsel %vm653_vm7, 1, %v10133_v48  ;;  %v9106_v40 = vpop.permute.xlu2 %3555 }
 0x3e2   :  { %3992 = vst.msk [vmem:[%s9732_s3 + $0x278] sm:$0xff] %vm3912_vm13, %v3863_v12  ;;  %3654 = vperm.xlu2 %4359, %v3271_v13   ;;  %v9101_v12 = vpop.f32.mrf.mxu3  ;;  %vm3707_vm15 = vcmp.eq.s32.totalorder %v8372_v57, 1  ;;  %vm3676_vm7 = vcmp.eq.s32.totalorder %v8089_v29, 1 }
 0x3e7   :  { %v2821_v19 = vpop.f32.mrf.mxu1 }
 0x3e9   :  { %v4443_v6 = vld [vmem:[%s9730_s2 + $0x180] sm:$0xff] }
 0x3ea   :  { %v3064_v4 = vsub.f32 %v4443_v6, %v2816_v32  ;;  %3990 = vst.msk [vmem:[%s9732_s3 + $0x268] sm:$0xff] %vm3912_vm13, %v3861_v36  ;;  %v9108_v32 = vpop.permute.xlu1 %3543  ;;  %v3523_v36 = vpop.permute.xlu0 %3522 }
 0x3eb   :  { %3929 = vst.msk [vmem:[%s9732_s3 + $0x80] sm:$0xff] %vm3912_vm13, %v3800_v42  ;;  %v2741_v6 = vpop.f32.mrf.mxu0  ;;  %vm3739_vm11 = vcmp.eq.s32.totalorder %v3523_v36, 1 }
 0x3ec   :  { %v3832_v24 = vsel %vm3704_vm8, %v3064_v4, 0.0 }
 0x3ed   :  { %3961 = vst.msk [vmem:[%s9732_s3 + $0x180] sm:$0xff] %vm3912_vm13, %v3832_v24 }
 0x3ef   :  { %v2823_v13 = vpop.f32.mrf.mxu1 }
 0x3f4   :  { %v4444_v14 = vld [vmem:[%s9730_s2 + $0x280] sm:$0xff]  ;;  %v4445_v9 = vld [vmem:[%s9730_s2 + $0x88] sm:$0xff] }
 0x3f5   :  { %v3096_v28 = vsub.f32 %v4444_v14, %v2896_v18  ;;  %v3033_v56 = vsub.f32 %v4445_v9, %v2738_v35  ;;  %v4446_v47 = vld [vmem:[%s9730_s2 + $0x188] sm:$0xff]  ;;  %v9131_v14 = vpop.f32.mrf.mxu3  ;;  %v3565_v35 = vpop.permute.xlu2 %3564 }
 0x3f6   :  { %v3065_v37 = vsub.f32 %v4446_v47, %v2818_v5  ;;  %v9140_v9 = vpop.permute.xlu1 %3552  ;;  %vm3753_vm10 = vcmp.eq.s32.totalorder %v3565_v35, 1  ;;  %v2743_v5 = vpop.f32.mrf.mxu0 }
 0x3f7   :  { %v3864_v44 = vsel %vm3736_vm1, %v3096_v28, 0.0  ;;  %v3801_v54 = vsel %vm3673_vm2, %v3033_v56, 0.0  ;;  %v9143_v56 = vpop.permute.xlu0 %3531  ;;  %vm3740_vm1 = vcmp.eq.s32.totalorder %v9028_v16, 1 }
 0x3f8   :  { %3993 = vst.msk [vmem:[%s9732_s3 + $0x280] sm:$0xff] %vm3912_vm13, %v3864_v44  ;;  %v3833_v50 = vsel %vm3705_vm12, %v3065_v37, 0.0 }
 0x3f9   :  { %3930 = vst.msk [vmem:[%s9732_s3 + $0x88] sm:$0xff] %vm3912_vm13, %v3801_v54 }
 0x3fa   :  { %3962 = vst.msk [vmem:[%s9732_s3 + $0x188] sm:$0xff] %vm3912_vm13, %v3833_v50  ;;  %v2903_v50 = vpop.f32.mrf.mxu2 }
 0x401   :  { %v4447_v48 = vld [vmem:[%s9730_s2 + $0x288] sm:$0xff]  ;;  %v4448_v17 = vld [vmem:[%s9730_s2 + $0x90] sm:$0xff] }
 0x402   :  { %v3097_v1 = vsub.f32 %v4447_v48, %v2898_v22  ;;  %v3034_v42 = vsub.f32 %v4448_v17, %v2741_v6  ;;  %v9169_v22 = vpop.f32.mrf.mxu3  ;;  %v2906_v29 = vpop.f32.mrf.mxu2 }
 0x404   :  { %v3865_v4 = vsel %vm3737_vm6, %v3097_v1, 0.0  ;;  %v3802_v18 = vsel %vm3674_vm5, %v3034_v42, 0.0  ;;  %v3574_v42 = vpop.permute.xlu2 %3573  ;;  %vm3677_vm6 = vcmp.eq.s32.totalorder %v8042_v31, 1  ;;  %vm3709_vm5 = vcmp.eq.s32.totalorder %v8520_v38, 1 }
 0x405   :  { %3994 = vst.msk [vmem:[%s9732_s3 + $0x288] sm:$0xff] %vm3912_vm13, %v3865_v4  ;;  %vm3756_vm3 = vcmp.eq.s32.totalorder %v3574_v42, 1 }
 0x40a   :  { %v9212_v7 = vpop.f32.mrf.mxu3  ;;  %v2908_v31 = vpop.f32.mrf.mxu2 }
 0x40c   :  { %v4449_v3 = vld [vmem:[%s9730_s2 + $0x190] sm:$0xff] }
 0x40d   :  { %v3066_v24 = vsub.f32 %v4449_v3, %v2821_v19  ;;  %3931 = vst.msk [vmem:[%s9732_s3 + $0x90] sm:$0xff] %vm3912_vm13, %v3802_v18  ;;  %v3562_v19 = vpop.permute.xlu1 %3561  ;;  %v9182_v3 = vpop.permute.xlu0 %3540 }
 0x40e   :  { %vm3752_vm8 = vcmp.eq.s32.totalorder %v3562_v19, 1 }
 0x40f   :  { %v3834_v59 = vsel %vm3706_vm4, %v3066_v24, 0.0  ;;  %v2746_v24 = vpop.f32.mrf.mxu0  ;;  %vm3741_vm4 = vcmp.eq.s32.totalorder %v8978_v27, 1 }
 0x410   :  { %3963 = vst.msk [vmem:[%s9732_s3 + $0x190] sm:$0xff] %vm3912_vm13, %v3834_v59 }
 0x412   :  { %v9256_v38 = vpop.f32.mrf.mxu3 }
 0x417   :  { %v4450_v28 = vld [vmem:[%s9730_s2 + $0x308] sm:$0xff]  ;;  %v4451_v26 = vld [vmem:[%s9730_s2 + $0x290] sm:$0xff] }
 0x418   :  { %v3113_v61 = vsub.f32 %v4450_v28, %v8231_v34  ;;  %v3098_v46 = vsub.f32 %v4451_v26, %v2901_v53  ;;  %v4452_v34 = vld [vmem:[%s9730_s2 + $0x98] sm:$0xff]  ;;  %v2826_v53 = vpop.f32.mrf.mxu1 }
 0x419   :  { %v3035_v37 = vsub.f32 %v4452_v34, %v2743_v5 }
 0x41a   :  { %v3866_v44 = vsel %vm3738_vm14, %v3098_v46, 0.0  ;;  %v3881_v47 = vsel %vm3753_vm10, %v3113_v61, 0.0 }
 0x41b   :  { %3995 = vst.msk [vmem:[%s9732_s3 + $0x290] sm:$0xff] %vm3912_vm13, %v3866_v44  ;;  %v3803_v23 = vsel %vm3675_vm9, %v3035_v37, 0.0  ;;  %vm3678_vm9 = vcmp.eq.s32.totalorder %v8022_v60, 1  ;;  %v2911_v60 = vpop.f32.mrf.mxu2 }
 0x422   :  { %v4453_v58 = vld [vmem:[%s9730_s2 + $0x198] sm:$0xff] }
 0x423   :  { %v3067_v54 = vsub.f32 %v4453_v58, %v2823_v13  ;;  %4010 = vst.msk [vmem:[%s9732_s3 + $0x308] sm:$0xff] %vm3912_vm13, %v3881_v47  ;;  %v3583_v13 = vpop.permute.xlu2 %3582  ;;  %v3571_v58 = vpop.permute.xlu1 %3570 }
 0x424   :  { %3932 = vst.msk [vmem:[%s9732_s3 + $0x98] sm:$0xff] %vm3912_vm13, %v3803_v23  ;;  %vm3759_vm2 = vcmp.eq.s32.totalorder %v3583_v13, 1  ;;  %vm3755_vm12 = vcmp.eq.s32.totalorder %v3571_v58, 1 }
 0x425   :  { %v3835_v2 = vsel %vm3707_vm15, %v3067_v54, 0.0  ;;  %v9226_v54 = vpop.permute.xlu0 %3549  ;;  %vm3710_vm15 = vcmp.eq.s32.totalorder %v8412_v51, 1  ;;  %v9300_v51 = vpop.f32.mrf.mxu3 }
 0x426   :  { %3964 = vst.msk [vmem:[%s9732_s3 + $0x198] sm:$0xff] %vm3912_vm13, %v3835_v2 }
 0x42d   :  { %v4454_v57 = vld [vmem:[%s9730_s2 + $0x300] sm:$0xff]  ;;  %v4456_v4 = vld [vmem:[%s9730_s2 + $0x298] sm:$0xff] }
 0x42e   :  { %v3112_v48 = vsub.f32 %v4454_v57, %v8182_v41  ;;  %v4455_v1 = vld [vmem:[%s9730_s2 + $0x320] sm:$0xff]  ;;  %v3099_v17 = vsub.f32 %v4456_v4, %v2903_v50  ;;  %v2828_v57 = vpop.f32.mrf.mxu1 }
 0x42f   :  { %v3116_v6 = vsub.f32 %v4455_v1, %v8366_v45 }
 0x430   :  { %v3867_v41 = vsel %vm3739_vm11, %v3099_v17, 0.0  ;;  %v3880_v59 = vsel %vm3752_vm8, %v3112_v48, 0.0  ;;  %vm3742_vm11 = vcmp.eq.s32.totalorder %v9143_v56, 1 }
 0x431   :  { %v3884_v18 = vsel %vm3756_vm3, %v3116_v6, 0.0  ;;  %3996 = vst.msk [vmem:[%s9732_s3 + $0x298] sm:$0xff] %vm3912_vm13, %v3867_v41 }
 0x438   :  { %v4457_v45 = vld [vmem:[%s9730_s2 + $0xa0] sm:$0xff] }
 0x439   :  { %v3036_v28 = vsub.f32 %v4457_v45, %v2746_v24  ;;  %v4458_v36 = vld [vmem:[%s9730_s2 + $0x1a0] sm:$0xff]  ;;  %v9270_v45 = vpop.permute.xlu0 %3558 }
 0x43a   :  { %v3068_v61 = vsub.f32 %v4458_v36, %v2826_v53  ;;  %4013 = vst.msk [vmem:[%s9732_s3 + $0x320] sm:$0xff] %vm3912_vm13, %v3884_v18  ;;  %v3580_v53 = vpop.permute.xlu1 %3579 }
 0x43b   :  { %4009 = vst.msk [vmem:[%s9732_s3 + $0x300] sm:$0xff] %vm3912_vm13, %v3880_v59  ;;  %v3804_v26 = vsel %vm3676_vm7, %v3036_v28, 0.0  ;;  %v3592_v59 = vpop.permute.xlu2 %3591  ;;  %vm3758_vm10 = vcmp.eq.s32.totalorder %v3580_v53, 1 }
 0x43c   :  { %v3836_v46 = vsel %vm3708_vm0, %v3068_v61, 0.0  ;;  %3933 = vst.msk [vmem:[%s9732_s3 + $0xa0] sm:$0xff] %vm3912_vm13, %v3804_v26  ;;  %vm3762_vm14 = vcmp.eq.s32.totalorder %v3592_v59, 1  ;;  %v2831_v26 = vpop.f32.mrf.mxu1  ;;  %v9346_v59 = vpop.f32.mrf.mxu3 }
 0x43d   :  { %3965 = vst.msk [vmem:[%s9732_s3 + $0x1a0] sm:$0xff] %vm3912_vm13, %v3836_v46 }
 0x444   :  { %v4459_v35 = vld [vmem:[%s9730_s2 + $0x318] sm:$0xff]  ;;  %v4461_v34 = vld [vmem:[%s9730_s2 + $0x2a0] sm:$0xff] }
 0x445   :  { %v3115_v5 = vsub.f32 %v4459_v35, %v8316_v43  ;;  %v4460_v44 = vld [vmem:[%s9730_s2 + $0x338] sm:$0xff]  ;;  %v3100_v37 = vsub.f32 %v4461_v34, %v2906_v29  ;;  %v2748_v43 = vpop.f32.mrf.mxu0 }
 0x446   :  { %v3119_v47 = vsub.f32 %v4460_v44, %v8495_v49 }
 0x447   :  { %v3868_v23 = vsel %vm3740_vm1, %v3100_v37, 0.0  ;;  %v3883_v50 = vsel %vm3755_vm12, %v3115_v5, 0.0 }
 0x448   :  { %v3887_v2 = vsel %vm3759_vm2, %v3119_v47, 0.0  ;;  %3997 = vst.msk [vmem:[%s9732_s3 + $0x2a0] sm:$0xff] %vm3912_vm13, %v3868_v23  ;;  %v3589_v23 = vpop.permute.xlu1 %3588  ;;  %vm3743_vm2 = vcmp.eq.s32.totalorder %v9074_v8, 1 }
 0x449   :  { %vm3761_vm8 = vcmp.eq.s32.totalorder %v3589_v23, 1 }
 0x44f   :  { %v4462_v49 = vld [vmem:[%s9730_s2 + $0xa8] sm:$0xff] }
 0x450   :  { %v3037_v48 = vsub.f32 %v4462_v49, %v2748_v43  ;;  %v4463_v16 = vld [vmem:[%s9730_s2 + $0x1a8] sm:$0xff]  ;;  %v3601_v43 = vpop.permute.xlu2 %3600 }
 0x451   :  { %v3069_v1 = vsub.f32 %v4463_v16, %v2828_v57  ;;  %4016 = vst.msk [vmem:[%s9732_s3 + $0x338] sm:$0xff] %vm3912_vm13, %v3887_v2  ;;  %vm3765_vm3 = vcmp.eq.s32.totalorder %v3601_v43, 1  ;;  %v10593_v43 = vld [vmem:[#allocation4_spill] sm:$0xff] }
 0x452   :  { %4012 = vst.msk [vmem:[%s9732_s3 + $0x318] sm:$0xff] %vm3912_vm13, %v3883_v50  ;;  %v3805_v6 = vsel %vm3677_vm6, %v3037_v48, 0.0  ;;  %v10589_v50 = vld [vmem:[#allocation235_spill] sm:$0xff] }
 0x453   :  { %v3837_v4 = vsel %vm3709_vm5, %v3069_v1, 0.0  ;;  %3934 = vst.msk [vmem:[%s9732_s3 + $0xa8] sm:$0xff] %vm3912_vm13, %v3805_v6  ;;  %v2833_v1 = vpop.f32.mrf.mxu1 }
 0x454   :  { %3966 = vst.msk [vmem:[%s9732_s3 + $0x1a8] sm:$0xff] %vm3912_vm13, %v3837_v4 }
 0x45b   :  { %v4464_v17 = vld [vmem:[%s9730_s2 + $0x330] sm:$0xff]  ;;  %v4466_v41 = vld [vmem:[%s9730_s2 + $0x2a8] sm:$0xff] }
 0x45c   :  { %v3118_v42 = vsub.f32 %v4464_v17, %v8457_v39  ;;  %v4465_v19 = vld [vmem:[%s9730_s2 + $0x350] sm:$0xff]  ;;  %v3101_v18 = vsub.f32 %v4466_v41, %v2908_v31  ;;  %v2751_v39 = vpop.f32.mrf.mxu0 }
 0x45d   :  { %v3122_v24 = vsub.f32 %v4465_v19, %v8697_v30  ;;  %v10591_v19 = vld [vmem:[#allocation225_spill] sm:$0xff] }
 0x45e   :  { %v3869_v28 = vsel %vm3741_vm4, %v3101_v18, 0.0  ;;  %v3886_v61 = vsel %vm3758_vm10, %v3118_v42, 0.0  ;;  %v10590_v42 = vld [vmem:[#allocation15_spill] sm:$0xff]  ;;  %vm3711_vm1 = vcmp.eq.s32.totalorder %v10591_v19, 1  ;;  %v2913_v18 = vpop.f32.mrf.mxu2  ;;  %vm3680_vm4 = vcmp.eq.s32.totalorder %v10593_v43, 1 }
 0x45f   :  { %v3890_v36 = vsel %vm3762_vm14, %v3122_v24, 0.0  ;;  %3998 = vst.msk [vmem:[%s9732_s3 + $0x2a8] sm:$0xff] %vm3912_vm13, %v3869_v28  ;;  %vm3679_vm0 = vcmp.eq.s32.totalorder %v10590_v42, 1  ;;  %vm3712_vm14 = vcmp.eq.s32.totalorder %v8580_v0, 1  ;;  %vm3744_vm10 = vcmp.eq.s32.totalorder %v9026_v63, 1 }
 0x464   :  { %v2753_v49 = vpop.f32.mrf.mxu0 }
 0x466   :  { %v4467_v30 = vld [vmem:[%s9730_s2 + $0xb0] sm:$0xff]  ;;  %v2916_v0 = vpop.f32.mrf.mxu2 }
 0x467   :  { %v3038_v46 = vsub.f32 %v4467_v30, %v2751_v39  ;;  %v4468_v27 = vld [vmem:[%s9730_s2 + $0x1b0] sm:$0xff]  ;;  %v3610_v30 = vpop.permute.xlu2 %3609 }
 0x468   :  { %v3070_v29 = vsub.f32 %v4468_v27, %v2831_v26  ;;  %4019 = vst.msk [vmem:[%s9732_s3 + $0x350] sm:$0xff] %vm3912_vm13, %v3890_v36  ;;  %v10592_v27 = vld [vmem:[#allocation223_spill] sm:$0xff]  ;;  %vm3768_vm12 = vcmp.eq.s32.totalorder %v3610_v30, 1 }
 0x469   :  { %4015 = vst.msk [vmem:[%s9732_s3 + $0x330] sm:$0xff] %vm3912_vm13, %v3886_v61  ;;  %v3806_v35 = vsel %vm3678_vm9, %v3038_v46, 0.0  ;;  %v3598_v46 = vpop.permute.xlu1 %3597 }
 0x46a   :  { %v3838_v5 = vsel %vm3710_vm15, %v3070_v29, 0.0  ;;  %3935 = vst.msk [vmem:[%s9732_s3 + $0xb0] sm:$0xff] %vm3912_vm13, %v3806_v35  ;;  %vm3764_vm6 = vcmp.eq.s32.totalorder %v3598_v46, 1 }
 0x46b   :  { %3967 = vst.msk [vmem:[%s9732_s3 + $0x1b0] sm:$0xff] %vm3912_vm13, %v3838_v5 }
 0x46c   :  { %v2756_v35 = vpop.f32.mrf.mxu0 }
 0x46e   :  { %v2918_v30 = vpop.f32.mrf.mxu2 }
 0x472   :  { %v4469_v44 = vld [vmem:[%s9730_s2 + $0x348] sm:$0xff]  ;;  %v4471_v13 = vld [vmem:[%s9730_s2 + $0x2b0] sm:$0xff] }
 0x473   :  { %v3121_v47 = vsub.f32 %v4469_v44, %v8619_v52  ;;  %v4470_v34 = vld [vmem:[%s9730_s2 + $0x368] sm:$0xff]  ;;  %v3102_v58 = vsub.f32 %v4471_v13, %v2911_v60  ;;  %v4472_v2 = vld [vmem:[%s9730_s2 + $0x310] sm:$0xff]  ;;  %v3568_v52 = vpop.permute.xlu0 %3567 }
 0x474   :  { %v3125_v37 = vsub.f32 %v4470_v34, %v8898_v62  ;;  %v3114_v57 = vsub.f32 %v4472_v2, %v10589_v50  ;;  %vm3754_vm7 = vcmp.eq.s32.totalorder %v3568_v52, 1  ;;  %v9396_v50 = vpop.f32.mrf.mxu3 }
 0x475   :  { %v3870_v62 = vsel %vm3742_vm11, %v3102_v58, 0.0  ;;  %v3889_v16 = vsel %vm3761_vm8, %v3121_v47, 0.0  ;;  %v2836_v47 = vpop.f32.mrf.mxu1 }
 0x476   :  { %v3893_v48 = vsel %vm3765_vm3, %v3125_v37, 0.0  ;;  %3999 = vst.msk [vmem:[%s9732_s3 + $0x2b0] sm:$0xff] %vm3912_vm13, %v3870_v62  ;;  %v3882_v6 = vsel %vm3754_vm7, %v3114_v57, 0.0  ;;  %vm3745_vm7 = vcmp.eq.s32.totalorder %v9182_v3, 1 }
 0x47c   :  { %v2998_v46 = vpop.f32.mrf.mxu3 }
 0x47d   :  { %v4473_v4 = vld [vmem:[%s9730_s2 + $0xb8] sm:$0xff] }
 0x47e   :  { %v3039_v56 = vsub.f32 %v4473_v4, %v2753_v49  ;;  %v4474_v31 = vld [vmem:[%s9730_s2 + $0x1b8] sm:$0xff] }
 0x47f   :  { %v3071_v17 = vsub.f32 %v4474_v31, %v2833_v1  ;;  %4022 = vst.msk [vmem:[%s9732_s3 + $0x368] sm:$0xff] %vm3912_vm13, %v3893_v48  ;;  %v3619_v1 = vpop.permute.xlu2 %3618  ;;  %v10594_v4 = vld [vmem:[#allocation233_spill] sm:$0xff]  ;;  %v2758_v31 = vpop.f32.mrf.mxu0 }
 0x480   :  { %4018 = vst.msk [vmem:[%s9732_s3 + $0x348] sm:$0xff] %vm3912_vm13, %v3889_v16  ;;  %v3807_v24 = vsel %vm3679_vm0, %v3039_v56, 0.0  ;;  %vm3771_vm9 = vcmp.eq.s32.totalorder %v3619_v1, 1 }
 0x481   :  { %v3839_v41 = vsel %vm3711_vm1, %v3071_v17, 0.0  ;;  %4011 = vst.msk [vmem:[%s9732_s3 + $0x310] sm:$0xff] %vm3912_vm13, %v3882_v6  ;;  %v3607_v6 = vpop.permute.xlu1 %3606 }
 0x482   :  { %3936 = vst.msk [vmem:[%s9732_s3 + $0xb8] sm:$0xff] %vm3912_vm13, %v3807_v24  ;;  %vm3767_vm15 = vcmp.eq.s32.totalorder %v3607_v6, 1  ;;  %v2838_v24 = vpop.f32.mrf.mxu1 }
 0x489   :  { %v4475_v53 = vld [vmem:[%s9730_s2 + $0x360] sm:$0xff] }
 0x48a   :  { %v3124_v39 = vsub.f32 %v4475_v53, %v8834_v55  ;;  %v4476_v28 = vld [vmem:[%s9730_s2 + $0x380] sm:$0xff] }
 0x48b   :  { %v3128_v36 = vsub.f32 %v4476_v28, %v9066_v33  ;;  %3968 = vst.msk [vmem:[%s9732_s3 + $0x1b8] sm:$0xff] %vm3912_vm13, %v3839_v41  ;;  %v3577_v33 = vpop.permute.xlu0 %3576  ;;  %v10595_v28 = vld [vmem:[#allocation9_spill] sm:$0xff] }
 0x48c   :  { %v3892_v44 = vsel %vm3764_vm6, %v3124_v39, 0.0  ;;  %vm3757_vm5 = vcmp.eq.s32.totalorder %v3577_v33, 1  ;;  %vm3681_vm3 = vcmp.eq.s32.totalorder %v10595_v28, 1 }
 0x48d   :  { %v3896_v60 = vsel %vm3768_vm12, %v3128_v36, 0.0  ;;  %v10596_v36 = vld [vmem:[#allocation211_spill] sm:$0xff] }
 0x48e   :  { %vm3713_vm8 = vcmp.eq.s32.totalorder %v10596_v36, 1  ;;  %v10599_v36 = vld [vmem:[#allocation7_spill] sm:$0xff] }
 0x492   :  { %v4477_v61 = vld [vmem:[%s9730_s2 + $0x2b8] sm:$0xff]  ;;  %v4478_v55 = vld [vmem:[%s9730_s2 + $0x328] sm:$0xff] }
 0x493   :  { %v3103_v26 = vsub.f32 %v4477_v61, %v2913_v18  ;;  %v3117_v29 = vsub.f32 %v4478_v55, %v10592_v27 }
 0x495   :  { %v3871_v5 = vsel %vm3743_vm2, %v3103_v26, 0.0  ;;  %v3885_v34 = vsel %vm3757_vm5, %v3117_v29, 0.0  ;;  %vm3746_vm5 = vcmp.eq.s32.totalorder %v9108_v32, 1 }
 0x496   :  { %4000 = vst.msk [vmem:[%s9732_s3 + $0x2b8] sm:$0xff] %vm3912_vm13, %v3871_v5 }
 0x49d   :  { %v4479_v37 = vld [vmem:[%s9730_s2 + $0xc0] sm:$0xff] }
 0x49e   :  { %v3040_v8 = vsub.f32 %v4479_v37, %v2756_v35  ;;  %v4480_v13 = vld [vmem:[%s9730_s2 + $0x1c0] sm:$0xff] }
 0x49f   :  { %v3072_v58 = vsub.f32 %v4480_v13, %v2836_v47  ;;  %4025 = vst.msk [vmem:[%s9732_s3 + $0x380] sm:$0xff] %vm3912_vm13, %v3896_v60  ;;  %v3628_v60 = vpop.permute.xlu2 %3627 }
 0x4a0   :  { %4021 = vst.msk [vmem:[%s9732_s3 + $0x360] sm:$0xff] %vm3912_vm13, %v3892_v44  ;;  %v3808_v23 = vsel %vm3680_vm4, %v3040_v8, 0.0  ;;  %v3616_v44 = vpop.permute.xlu1 %3615  ;;  %vm3774_vm0 = vcmp.eq.s32.totalorder %v3628_v60, 1 }
 0x4a1   :  { %v3840_v2 = vsel %vm3712_vm14, %v3072_v58, 0.0  ;;  %4014 = vst.msk [vmem:[%s9732_s3 + $0x328] sm:$0xff] %vm3912_vm13, %v3885_v34  ;;  %vm3770_vm1 = vcmp.eq.s32.totalorder %v3616_v44, 1  ;;  %v2761_v34 = vpop.f32.mrf.mxu0  ;;  %v2841_v58 = vpop.f32.mrf.mxu1 }
 0x4a2   :  { %3937 = vst.msk [vmem:[%s9732_s3 + $0xc0] sm:$0xff] %vm3912_vm13, %v3808_v23 }
 0x4a9   :  { %v4481_v57 = vld [vmem:[%s9730_s2 + $0x378] sm:$0xff] }
 0x4aa   :  { %v3127_v52 = vsub.f32 %v4481_v57, %v9020_v11  ;;  %v4482_v49 = vld [vmem:[%s9730_s2 + $0x398] sm:$0xff]  ;;  %v10598_v57 = vld [vmem:[#allocation216_spill] sm:$0xff] }
 0x4ab   :  { %v3131_v62 = vsub.f32 %v4482_v49, %v9169_v22  ;;  %3969 = vst.msk [vmem:[%s9732_s3 + $0x1c0] sm:$0xff] %vm3912_vm13, %v3840_v2  ;;  %v3586_v22 = vpop.permute.xlu0 %3585  ;;  %vm3714_vm6 = vcmp.eq.s32.totalorder %v10598_v57, 1 }
 0x4ac   :  { %v3895_v19 = vsel %vm3767_vm15, %v3127_v52, 0.0  ;;  %vm3760_vm11 = vcmp.eq.s32.totalorder %v3586_v22, 1  ;;  %v3637_v22 = vpop.permute.xlu2 %3636  ;;  %vm3715_vm15 = vcmp.eq.s32.totalorder %v8644_v10, 1 }
 0x4ad   :  { %v3899_v42 = vsel %vm3771_vm9, %v3131_v62, 0.0  ;;  %v2921_v62 = vpop.f32.mrf.mxu2  ;;  %vm3777_vm4 = vcmp.eq.s32.totalorder %v3637_v22, 1  ;;  %vm3683_vm9 = vcmp.eq.s32.totalorder %v10599_v36, 1 }
 0x4b2   :  { %v4483_v48 = vld [vmem:[%s9730_s2 + $0x2c0] sm:$0xff] }
 0x4b3   :  { %v3104_v16 = vsub.f32 %v4483_v48, %v2916_v0  ;;  %v4484_v11 = vld [vmem:[%s9730_s2 + $0x340] sm:$0xff]  ;;  %v10597_v0 = vld [vmem:[#allocation155_spill] sm:$0xff]  ;;  %v9494_v48 = vpop.f32.mrf.mxu3 }
 0x4b4   :  { %v3120_v56 = vsub.f32 %v4484_v11, %v10594_v4  ;;  %vm3682_vm12 = vcmp.eq.s32.totalorder %v10597_v0, 1 }
 0x4b5   :  { %v3872_v17 = vsel %vm3744_vm10, %v3104_v16, 0.0  ;;  %v2923_v10 = vpop.f32.mrf.mxu2 }
 0x4b6   :  { %4001 = vst.msk [vmem:[%s9732_s3 + $0x2c0] sm:$0xff] %vm3912_vm13, %v3872_v17  ;;  %v3888_v41 = vsel %vm3760_vm11, %v3120_v56, 0.0  ;;  %vm3747_vm11 = vcmp.eq.s32.totalorder %v9072_v25, 1 }
 0x4bd   :  { %v4485_v18 = vld [vmem:[%s9730_s2 + $0xc8] sm:$0xff] }
 0x4be   :  { %v3041_v63 = vsub.f32 %v4485_v18, %v2758_v31  ;;  %v4486_v53 = vld [vmem:[%s9730_s2 + $0x1c8] sm:$0xff]  ;;  %v3625_v31 = vpop.permute.xlu1 %3624 }
 0x4bf   :  { %v3073_v39 = vsub.f32 %v4486_v53, %v2838_v24  ;;  %4028 = vst.msk [vmem:[%s9732_s3 + $0x398] sm:$0xff] %vm3912_vm13, %v3899_v42  ;;  %vm3773_vm14 = vcmp.eq.s32.totalorder %v3625_v31, 1 }
 0x4c0   :  { %4024 = vst.msk [vmem:[%s9732_s3 + $0x378] sm:$0xff] %vm3912_vm13, %v3895_v19  ;;  %v3809_v61 = vsel %vm3681_vm3, %v3041_v63, 0.0  ;;  %v2763_v19 = vpop.f32.mrf.mxu0  ;;  %v2843_v63 = vpop.f32.mrf.mxu1 }
 0x4c1   :  { %v3841_v26 = vsel %vm3713_vm8, %v3073_v39, 0.0  ;;  %4017 = vst.msk [vmem:[%s9732_s3 + $0x340] sm:$0xff] %vm3912_vm13, %v3888_v41 }
 0x4c2   :  { %3938 = vst.msk [vmem:[%s9732_s3 + $0xc8] sm:$0xff] %vm3912_vm13, %v3809_v61 }
 0x4c8   :  { %v2766_v60 = vpop.f32.mrf.mxu0 }
 0x4c9   :  { %v4487_v55 = vld [vmem:[%s9730_s2 + $0x390] sm:$0xff] }
 0x4ca   :  { %v3130_v27 = vsub.f32 %v4487_v55, %v9131_v14  ;;  %v4488_v29 = vld [vmem:[%s9730_s2 + $0x3b0] sm:$0xff] }
 0x4cb   :  { %v3134_v33 = vsub.f32 %v4488_v29, %v9300_v51  ;;  %3970 = vst.msk [vmem:[%s9732_s3 + $0x1c8] sm:$0xff] %vm3912_vm13, %v3841_v26  ;;  %v3595_v51 = vpop.permute.xlu0 %3594 }
 0x4cc   :  { %v3898_v13 = vsel %vm3770_vm1, %v3130_v27, 0.0  ;;  %vm3763_vm2 = vcmp.eq.s32.totalorder %v3595_v51, 1  ;;  %vm3748_vm1 = vcmp.eq.s32.totalorder %v9226_v54, 1 }
 0x4cd   :  { %v3902_v8 = vsel %vm3774_vm0, %v3134_v33, 0.0  ;;  %v3634_v33 = vpop.permute.xlu1 %3633 }
 0x4ce   :  { %vm3776_vm3 = vcmp.eq.s32.totalorder %v3634_v33, 1 }
 0x4d2   :  { %v4489_v35 = vld [vmem:[%s9730_s2 + $0x2c8] sm:$0xff]  ;;  %v4490_v14 = vld [vmem:[%s9730_s2 + $0x358] sm:$0xff] }
 0x4d3   :  { %v3105_v5 = vsub.f32 %v4489_v35, %v2918_v30  ;;  %v3123_v47 = vsub.f32 %v4490_v14, %v8754_v15  ;;  %v3604_v42 = vpop.permute.xlu0 %3603  ;;  %v3003_v30 = vpop.f32.mrf.mxu3 }
 0x4d4   :  { %vm3766_vm10 = vcmp.eq.s32.totalorder %v3604_v42, 1 }
 0x4d5   :  { %v3873_v37 = vsel %vm3745_vm7, %v3105_v5, 0.0  ;;  %v3891_v43 = vsel %vm3763_vm2, %v3123_v47, 0.0 }
 0x4d6   :  { %4002 = vst.msk [vmem:[%s9732_s3 + $0x2c8] sm:$0xff] %vm3912_vm13, %v3873_v37  ;;  %v10600_v37 = vld [vmem:[#allocation5_spill] sm:$0xff] }
 0x4d7   :  { %vm3684_vm7 = vcmp.eq.s32.totalorder %v10600_v37, 1 }
 0x4dd   :  { %v4491_v15 = vld [vmem:[%s9730_s2 + $0xd0] sm:$0xff] }
 0x4de   :  { %v3042_v3 = vsub.f32 %v4491_v15, %v2761_v34  ;;  %v4492_v23 = vld [vmem:[%s9730_s2 + $0x1d0] sm:$0xff]  ;;  %v2846_v34 = vpop.f32.mrf.mxu1  ;;  %v3646_v15 = vpop.permute.xlu2 %3645 }
 0x4df   :  { %v3074_v2 = vsub.f32 %v4492_v23, %v2841_v58  ;;  %4031 = vst.msk [vmem:[%s9732_s3 + $0x3b0] sm:$0xff] %vm3912_vm13, %v3902_v8  ;;  %v3006_v23 = vpop.f32.mrf.mxu3  ;;  %vm3780_vm2 = vcmp.eq.s32.totalorder %v3646_v15, 1  ;;  %v10605_v15 = vld [vmem:[#allocation12_spill] sm:$0xff] }
 0x4e0   :  { %4027 = vst.msk [vmem:[%s9732_s3 + $0x390] sm:$0xff] %vm3912_vm13, %v3898_v13  ;;  %v3810_v52 = vsel %vm3682_vm12, %v3042_v3, 0.0  ;;  %v10601_v13 = vld [vmem:[#allocation147_spill] sm:$0xff]  ;;  %v2926_v3 = vpop.f32.mrf.mxu2 }
 0x4e1   :  { %v3842_v49 = vsel %vm3714_vm6, %v3074_v2, 0.0  ;;  %4020 = vst.msk [vmem:[%s9732_s3 + $0x358] sm:$0xff] %vm3912_vm13, %v3891_v43  ;;  %vm3716_vm0 = vcmp.eq.s32.totalorder %v10601_v13, 1 }
 0x4e2   :  { %3939 = vst.msk [vmem:[%s9732_s3 + $0xd0] sm:$0xff] %vm3912_vm13, %v3810_v52 }
 0x4e9   :  { %v4493_v16 = vld [vmem:[%s9730_s2 + $0x3a8] sm:$0xff] }
 0x4ea   :  { %v3133_v1 = vsub.f32 %v4493_v16, %v9256_v38  ;;  %v4494_v6 = vld [vmem:[%s9730_s2 + $0x3c8] sm:$0xff]  ;;  %v3643_v16 = vpop.permute.xlu1 %3642 }
 0x4eb   :  { %v3137_v11 = vsub.f32 %v4494_v6, %v2998_v46  ;;  %3971 = vst.msk [vmem:[%s9732_s3 + $0x1d0] sm:$0xff] %vm3912_vm13, %v3842_v49  ;;  %vm3779_vm12 = vcmp.eq.s32.totalorder %v3643_v16, 1 }
 0x4ec   :  { %v3901_v18 = vsel %vm3773_vm14, %v3133_v1, 0.0  ;;  %vm3749_vm14 = vcmp.eq.s32.totalorder %v9140_v9, 1 }
 0x4ed   :  { %v3905_v41 = vsel %vm3777_vm4, %v3137_v11, 0.0 }
 0x4f2   :  { %v4495_v4 = vld [vmem:[%s9730_s2 + $0x2d0] sm:$0xff] }
 0x4f3   :  { %v3106_v56 = vsub.f32 %v4495_v4, %v2921_v62  ;;  %v4496_v38 = vld [vmem:[%s9730_s2 + $0x370] sm:$0xff]  ;;  %v2768_v4 = vpop.f32.mrf.mxu0 }
 0x4f4   :  { %v3126_v17 = vsub.f32 %v4496_v38, %v8971_v21  ;;  %v2848_v38 = vpop.f32.mrf.mxu1 }
 0x4f5   :  { %v3874_v24 = vsel %vm3746_vm5, %v3106_v56, 0.0 }
 0x4f6   :  { %4003 = vst.msk [vmem:[%s9732_s3 + $0x2d0] sm:$0xff] %vm3912_vm13, %v3874_v24  ;;  %v3894_v53 = vsel %vm3766_vm10, %v3126_v17, 0.0  ;;  %v10602_v24 = vld [vmem:[#allocation10_spill] sm:$0xff] }
 0x4f7   :  { %vm3685_vm5 = vcmp.eq.s32.totalorder %v10602_v24, 1 }
 0x4fd   :  { %v4497_v21 = vld [vmem:[%s9730_s2 + $0xd8] sm:$0xff] }
 0x4fe   :  { %v3043_v32 = vsub.f32 %v4497_v21, %v2763_v19  ;;  %v4498_v39 = vld [vmem:[%s9730_s2 + $0x1d8] sm:$0xff]  ;;  %v9629_v21 = vpop.f32.mrf.mxu3 }
 0x4ff   :  { %v3075_v28 = vsub.f32 %v4498_v39, %v2843_v63  ;;  %4034 = vst.msk [vmem:[%s9732_s3 + $0x3c8] sm:$0xff] %vm3912_vm13, %v3905_v41  ;;  %v10603_v41 = vld [vmem:[#allocation150_spill] sm:$0xff] }
 0x500   :  { %4030 = vst.msk [vmem:[%s9732_s3 + $0x3a8] sm:$0xff] %vm3912_vm13, %v3901_v18  ;;  %v3811_v61 = vsel %vm3683_vm9, %v3043_v32, 0.0  ;;  %vm3717_vm4 = vcmp.eq.s32.totalorder %v10603_v41, 1 }
 0x501   :  { %v3843_v26 = vsel %vm3715_vm15, %v3075_v28, 0.0  ;;  %4023 = vst.msk [vmem:[%s9732_s3 + $0x370] sm:$0xff] %vm3912_vm13, %v3894_v53  ;;  %v2928_v53 = vpop.f32.mrf.mxu2  ;;  %vm3718_vm15 = vcmp.eq.s32.totalorder %v8709_v20, 1 }
 0x502   :  { %3940 = vst.msk [vmem:[%s9732_s3 + $0xd8] sm:$0xff] %vm3912_vm13, %v3811_v61 }
 0x506   :  { %v3011_v20 = vpop.f32.mrf.mxu3 }
 0x509   :  { %v4499_v46 = vld [vmem:[%s9730_s2 + $0x3c0] sm:$0xff] }
 0x50a   :  { %v3136_v55 = vsub.f32 %v4499_v46, %v9396_v50  ;;  %3972 = vst.msk [vmem:[%s9732_s3 + $0x1d8] sm:$0xff] %vm3912_vm13, %v3843_v26  ;;  %v3613_v50 = vpop.permute.xlu0 %3612  ;;  %v2771_v26 = vpop.f32.mrf.mxu0 }
 0x50b   :  { %vm3769_vm8 = vcmp.eq.s32.totalorder %v3613_v50, 1  ;;  %v2931_v50 = vpop.f32.mrf.mxu2 }
 0x50c   :  { %v3904_v14 = vsel %vm3776_vm3, %v3136_v55, 0.0  ;;  %v2851_v55 = vpop.f32.mrf.mxu1 }
 0x511   :  { %v4500_v27 = vld [vmem:[%s9730_s2 + $0x2d8] sm:$0xff]  ;;  %v4501_v35 = vld [vmem:[%s9730_s2 + $0x388] sm:$0xff]  ;;  %v4502_v47 = vld [vmem:[%s9730_s2 + $0xe0] sm:$0xff] }
 0x512   :  { %v3107_v29 = vsub.f32 %v4500_v27, %v2923_v10  ;;  %v3129_v5 = vsub.f32 %v4501_v35, %v9101_v12  ;;  %v3044_v51 = vsub.f32 %v4502_v47, %v2766_v60  ;;  %v3622_v11 = vpop.permute.xlu0 %3621  ;;  %v10604_v27 = vld [vmem:[#allocation6_spill] sm:$0xff] }
 0x513   :  { %vm3772_vm6 = vcmp.eq.s32.totalorder %v3622_v11, 1  ;;  %vm3686_vm9 = vcmp.eq.s32.totalorder %v10604_v27, 1 }
 0x514   :  { %v3875_v44 = vsel %vm3747_vm11, %v3107_v29, 0.0  ;;  %v3897_v25 = vsel %vm3769_vm8, %v3129_v5, 0.0  ;;  %v3812_v58 = vsel %vm3684_vm7, %v3044_v51, 0.0  ;;  %v3652_v5 = vpop.permute.xlu1 %3651  ;;  %vm3750_vm11 = vcmp.eq.s32.totalorder %v9106_v40, 1 }
 0x515   :  { %4004 = vst.msk [vmem:[%s9732_s3 + $0x2d8] sm:$0xff] %vm3912_vm13, %v3875_v44  ;;  %vm3782_vm3 = vcmp.eq.s32.totalorder %v3652_v5, 1  ;;  %vm3687_vm7 = vcmp.eq.s32.totalorder %v10605_v15, 1 }
 0x51a   :  { %v3631_v61 = vpop.permute.xlu0 %3630 }
 0x51b   :  { %vm3775_vm10 = vcmp.eq.s32.totalorder %v3631_v61, 1 }
 0x51c   :  { %v4503_v12 = vld [vmem:[%s9730_s2 + $0x1e0] sm:$0xff] }
 0x51d   :  { %v3076_v8 = vsub.f32 %v4503_v12, %v2846_v34  ;;  %4033 = vst.msk [vmem:[%s9732_s3 + $0x3c0] sm:$0xff] %vm3912_vm13, %v3904_v14 }
 0x51e   :  { %4026 = vst.msk [vmem:[%s9732_s3 + $0x388] sm:$0xff] %vm3912_vm13, %v3897_v25  ;;  %v2773_v25 = vpop.f32.mrf.mxu0 }
 0x51f   :  { %v3844_v43 = vsel %vm3716_vm0, %v3076_v8, 0.0  ;;  %3941 = vst.msk [vmem:[%s9732_s3 + $0xe0] sm:$0xff] %vm3912_vm13, %v3812_v58 }
 0x520   :  { %3973 = vst.msk [vmem:[%s9732_s3 + $0x1e0] sm:$0xff] %vm3912_vm13, %v3844_v43  ;;  %v2853_v43 = vpop.f32.mrf.mxu1 }
 0x522   :  { %v3640_v37 = vpop.permute.xlu0 %3639 }
 0x523   :  { %vm3778_vm8 = vcmp.eq.s32.totalorder %v3640_v37, 1 }
 0x527   :  { %v4504_v2 = vld [vmem:[%s9730_s2 + $0x3d8] sm:$0xff]  ;;  %v4505_v57 = vld [vmem:[%s9730_s2 + $0x2e0] sm:$0xff] }
 0x528   :  { %v3139_v0 = vsub.f32 %v4504_v2, %v3003_v30  ;;  %v3108_v52 = vsub.f32 %v4505_v57, %v2926_v3  ;;  %v4506_v49 = vld [vmem:[%s9730_s2 + $0x3e0] sm:$0xff]  ;;  %v3655_v57 = vpop.permute.xlu2 %3654 }
 0x529   :  { %v3140_v62 = vsub.f32 %v4506_v49, %v3006_v23  ;;  %v4507_v1 = vld [vmem:[%s9730_s2 + $0x3a0] sm:$0xff]  ;;  %v10606_v23 = vld [vmem:[#allocation215_spill] sm:$0xff]  ;;  %v3013_v49 = vpop.f32.mrf.mxu3 }
 0x52a   :  { %v3132_v6 = vsub.f32 %v4507_v1, %v9212_v7  ;;  %v3876_v56 = vsel %vm3748_vm1, %v3108_v52, 0.0  ;;  %v3907_v31 = vsel %vm3779_vm12, %v3139_v0, 0.0  ;;  %vm3719_vm0 = vcmp.eq.s32.totalorder %v10606_v23, 1  ;;  %v2933_v52 = vpop.f32.mrf.mxu2 }
 0x52b   :  { %v3908_v22 = vsel %vm3780_vm2, %v3140_v62, 0.0  ;;  %4005 = vst.msk [vmem:[%s9732_s3 + $0x2e0] sm:$0xff] %vm3912_vm13, %v3876_v56  ;;  %vm3751_vm1 = vcmp.eq.s32.totalorder %v9270_v45, 1  ;;  %vm3783_vm2 = vcmp.eq.s32.totalorder %v3655_v57, 1  ;;  %v3649_v56 = vpop.permute.xlu0 %3648 }
 0x52c   :  { %v3900_v17 = vsel %vm3772_vm6, %v3132_v6, 0.0  ;;  %vm3781_vm12 = vcmp.eq.s32.totalorder %v3649_v56, 1 }
 0x532   :  { %v4508_v7 = vld [vmem:[%s9730_s2 + $0xe8] sm:$0xff] }
 0x533   :  { %v3045_v54 = vsub.f32 %v4508_v7, %v2768_v4  ;;  %v4509_v42 = vld [vmem:[%s9730_s2 + $0x1e8] sm:$0xff] }
 0x534   :  { %v3077_v19 = vsub.f32 %v4509_v42, %v2848_v38  ;;  %4037 = vst.msk [vmem:[%s9732_s3 + $0x3e0] sm:$0xff] %vm3912_vm13, %v3908_v22 }
 0x535   :  { %4036 = vst.msk [vmem:[%s9732_s3 + $0x3d8] sm:$0xff] %vm3912_vm13, %v3907_v31  ;;  %v3813_v18 = vsel %vm3685_vm5, %v3045_v54, 0.0 }
 0x536   :  { %v3845_v63 = vsel %vm3717_vm4, %v3077_v19, 0.0  ;;  %4029 = vst.msk [vmem:[%s9732_s3 + $0x3a0] sm:$0xff] %vm3912_vm13, %v3900_v17 }
 0x537   :  { %3942 = vst.msk [vmem:[%s9732_s3 + $0xe8] sm:$0xff] %vm3912_vm13, %v3813_v18 }
 0x538   :  { %3974 = vst.msk [vmem:[%s9732_s3 + $0x1e8] sm:$0xff] %vm3912_vm13, %v3845_v63 }
 0x53f   :  { %v4510_v32 = vld [vmem:[%s9730_s2 + $0x2e8] sm:$0xff]  ;;  %v4511_v28 = vld [vmem:[%s9730_s2 + $0x3b8] sm:$0xff]  ;;  %v4512_v30 = vld [vmem:[%s9730_s2 + $0xf0] sm:$0xff] }
 0x540   :  { %v3109_v39 = vsub.f32 %v4510_v32, %v2928_v53  ;;  %v3135_v36 = vsub.f32 %v4511_v28, %v9346_v59  ;;  %v3046_v46 = vsub.f32 %v4512_v30, %v2771_v26 }
 0x542   :  { %v3877_v10 = vsel %vm3749_vm14, %v3109_v39, 0.0  ;;  %v3903_v9 = vsel %vm3775_vm10, %v3135_v36, 0.0  ;;  %v3814_v33 = vsel %vm3686_vm9, %v3046_v46, 0.0 }
 0x543   :  { %4006 = vst.msk [vmem:[%s9732_s3 + $0x2e8] sm:$0xff] %vm3912_vm13, %v3877_v10 }
 0x54a   :  { %v4513_v59 = vld [vmem:[%s9730_s2 + $0x1f0] sm:$0xff] }
 0x54b   :  { %v3078_v29 = vsub.f32 %v4513_v59, %v2851_v55  ;;  %4032 = vst.msk [vmem:[%s9732_s3 + $0x3b8] sm:$0xff] %vm3912_vm13, %v3903_v9 }
 0x54c   :  { %3943 = vst.msk [vmem:[%s9732_s3 + $0xf0] sm:$0xff] %vm3912_vm13, %v3814_v33 }
 0x54d   :  { %v3846_v35 = vsel %vm3718_vm15, %v3078_v29, 0.0 }
 0x54e   :  { %3975 = vst.msk [vmem:[%s9732_s3 + $0x1f0] sm:$0xff] %vm3912_vm13, %v3846_v35 }
 0x555   :  { %v4514_v60 = vld [vmem:[%s9730_s2 + $0x2f0] sm:$0xff]  ;;  %v4517_v13 = vld [vmem:[%s9730_s2 + $0xf8] sm:$0xff] }
 0x556   :  { %v3110_v44 = vsub.f32 %v4514_v60, %v2931_v50  ;;  %v4515_v14 = vld [vmem:[%s9730_s2 + $0x3f0] sm:$0xff]  ;;  %v3047_v58 = vsub.f32 %v4517_v13, %v2773_v25 }
 0x557   :  { %v3142_v47 = vsub.f32 %v4515_v14, %v3011_v20  ;;  %v4516_v51 = vld [vmem:[%s9730_s2 + $0x3d0] sm:$0xff] }
 0x558   :  { %v3138_v34 = vsub.f32 %v4516_v51, %v9494_v48  ;;  %v3878_v12 = vsel %vm3750_vm11, %v3110_v44, 0.0  ;;  %v3815_v2 = vsel %vm3687_vm7, %v3047_v58, 0.0 }
 0x559   :  { %v3910_v8 = vsel %vm3782_vm3, %v3142_v47, 0.0  ;;  %4007 = vst.msk [vmem:[%s9732_s3 + $0x2f0] sm:$0xff] %vm3912_vm13, %v3878_v12 }
 0x55a   :  { %v3906_v40 = vsel %vm3778_vm8, %v3138_v34, 0.0 }
 0x560   :  { %v4518_v48 = vld [vmem:[%s9730_s2 + $0x1f8] sm:$0xff] }
 0x561   :  { %v3079_v3 = vsub.f32 %v4518_v48, %v2853_v43  ;;  %4039 = vst.msk [vmem:[%s9732_s3 + $0x3f0] sm:$0xff] %vm3912_vm13, %v3910_v8 }
 0x562   :  { %4035 = vst.msk [vmem:[%s9732_s3 + $0x3d0] sm:$0xff] %vm3912_vm13, %v3906_v40 }
 0x563   :  { %v3847_v0 = vsel %vm3719_vm0, %v3079_v3, 0.0  ;;  %3944 = vst.msk [vmem:[%s9732_s3 + $0xf8] sm:$0xff] %vm3912_vm13, %v3815_v2 }
 0x564   :  { %3976 = vst.msk [vmem:[%s9732_s3 + $0x1f8] sm:$0xff] %vm3912_vm13, %v3847_v0 }
 0x56b   :  { %v4519_v62 = vld [vmem:[%s9730_s2 + $0x2f8] sm:$0xff]  ;;  %v4521_v11 = vld [vmem:[%s9730_s2 + $0x3e8] sm:$0xff] }
 0x56c   :  { %v3111_v16 = vsub.f32 %v4519_v62, %v2933_v52  ;;  %v4520_v1 = vld [vmem:[%s9730_s2 + $0x3f8] sm:$0xff]  ;;  %v3141_v4 = vsub.f32 %v4521_v11, %v9629_v21 }
 0x56d   :  { %v3143_v6 = vsub.f32 %v4520_v1, %v3013_v49 }
 0x56e   :  { %v3879_v22 = vsel %vm3751_vm1, %v3111_v16, 0.0  ;;  %v3909_v38 = vsel %vm3781_vm12, %v3141_v4, 0.0 }
 0x56f   :  { %v3911_v31 = vsel %vm3783_vm2, %v3143_v6, 0.0  ;;  %4008 = vst.msk [vmem:[%s9732_s3 + $0x2f8] sm:$0xff] %vm3912_vm13, %v3879_v22 }
 0x570   :  { %4040 = vst.msk [vmem:[%s9732_s3 + $0x3f8] sm:$0xff] %vm3912_vm13, %v3911_v31 }
 0x571   :  { %4038 = vst.msk [vmem:[%s9732_s3 + $0x3e8] sm:$0xff] %vm3912_vm13, %v3909_v38 }

</bundles_post_ra>
